<compile_context>
chip_gen: v6e
topology: v6e:2x2x1
jax: 0.10.0
libtpu: 0.0.40
codegen_flags: <defaults>
</compile_context>

<pallas_src>
import functools

import jax
import jax.numpy as jnp
from jax.experimental import pallas as pl
from jax.experimental.pallas import tpu as pltpu

LANE = 128


def _round_up(x, m):
    return (x + m - 1) // m * m


# ----------------------------------------------------------------------------
# Pallas kernels
# ----------------------------------------------------------------------------
def _conv_mm_kernel(*refs, n_x):
    """(max over n_x patch slabs of) x @ w  -> + bias -> ReLU -> store.

    refs = (x_0, ..., x_{n_x-1}, w, b, o)
      x_i : [TM, K]    bf16  (im2col patches; 4 slabs = the 4 pool taps)
      w   : [K, Npad]  bf16  (shared across all slabs, stays resident)
      b   : [1, Npad]  f32
      o   : [TM, Npad] f32
    """
    x_refs = refs[:n_x]
    w_ref, b_ref, o_ref = refs[n_x], refs[n_x + 1], refs[n_x + 2]
    w = w_ref[...]
    acc = jnp.dot(x_refs[0][...], w, preferred_element_type=jnp.float32)
    for xr in x_refs[1:]:
        acc = jnp.maximum(
            acc, jnp.dot(xr[...], w, preferred_element_type=jnp.float32))
    acc = acc + b_ref[...]
    acc = jnp.maximum(acc, 0.0)          # ReLU (commutes with the pool max)
    o_ref[...] = acc.astype(o_ref.dtype)


def _fc_chain_kernel(x_ref, w1_ref, b1_ref, w2_ref, b2_ref, w3_ref, b3_ref,
                     o_ref):
    """fc1+ReLU -> fc2+ReLU -> fc3 in one kernel, weights resident in VMEM."""
    h = jnp.dot(x_ref[...], w1_ref[...], preferred_element_type=jnp.float32)
    h = jnp.maximum(h + b1_ref[...], 0.0)
    # TODO(synk): Dropout(0.5) is identity in inference mode; not applied here.
    h = jnp.dot(h.astype(jnp.bfloat16), w2_ref[...],
                preferred_element_type=jnp.float32)
    h = jnp.maximum(h + b2_ref[...], 0.0)
    h = jnp.dot(h.astype(jnp.bfloat16), w3_ref[...],
                preferred_element_type=jnp.float32)
    o_ref[...] = (h + b3_ref[...]).astype(o_ref.dtype)


# ----------------------------------------------------------------------------
# Pallas call wrappers
# ----------------------------------------------------------------------------
def conv_matmul(x_slabs, w_packed, b_packed, *, tm=256):
    """max_i(x_i @ w) + b -> ReLU.  x_i: [M, K] bf16, w: [K, 128k] bf16."""
    M, K = x_slabs[0].shape
    _, N = w_packed.shape
    tm = min(tm, _round_up(M, 8))
    m_pad = _round_up(M, tm)
    if m_pad != M:
        x_slabs = [jnp.pad(x, ((0, m_pad - M), (0, 0))) for x in x_slabs]
    n_x = len(x_slabs)
    kernel = functools.partial(_conv_mm_kernel, n_x=n_x)
    x_spec = pl.BlockSpec((tm, K), lambda i: (i, 0))
    out = pl.pallas_call(
        kernel,
        out_shape=jax.ShapeDtypeStruct((m_pad, N), jnp.float32),
        grid=(m_pad // tm,),
        in_specs=[x_spec] * n_x + [
            pl.BlockSpec((K, N), lambda i: (0, 0)),
            pl.BlockSpec((1, N), lambda i: (0, 0)),
        ],
        out_specs=pl.BlockSpec((tm, N), lambda i: (i, 0)),
        compiler_params=pltpu.CompilerParams(
            dimension_semantics=("parallel",)),
    )(*x_slabs, w_packed, b_packed)
    return out[:M] if m_pad != M else out


def _im2col(x_nhwc, dh, dw, stride, k_pad):
    """3x3 (pad 1) patches for output positions (stride*ho+dh, stride*wo+dw).
    Returns [B*Ho*Wo, k_pad] bf16, columns ordered (kh, kw, cin)."""
    B, H, W, C = x_nhwc.shape
    Ho, Wo = H // stride, W // stride
    xp = jnp.pad(x_nhwc, ((0, 0), (1, 1), (1, 1), (0, 0)))
    cols = [xp[:, dh + kh: dh + kh + stride * Ho: stride,
                  dw + kw: dw + kw + stride * Wo: stride, :]
            for kh in range(3) for kw in range(3)]
    p = jnp.concatenate(cols, axis=-1).reshape(B * Ho * Wo, 9 * C)
    if 9 * C < k_pad:
        p = jnp.pad(p, ((0, 0), (0, k_pad - 9 * C)))
    return p.astype(jnp.bfloat16)


def conv_block(x_nhwc, layer, cout, *, pool, keep_pad=False):
    """3x3 conv (stride 1, pad 1) + ReLU [+ fused 2x2/2 max-pool]."""
    w_packed, b_packed = layer
    B, H, W, _ = x_nhwc.shape
    k_pad = w_packed.shape[0]
    if pool:
        Ho, Wo = H // 2, W // 2
        slabs = [_im2col(x_nhwc, dh, dw, 2, k_pad)
                 for dh in (0, 1) for dw in (0, 1)]
    else:
        Ho, Wo = H, W
        slabs = [_im2col(x_nhwc, 0, 0, 1, k_pad)]
    out = conv_matmul(slabs, w_packed, b_packed)          # [B*Ho*Wo, 128]
    c = out.shape[-1] if keep_pad else cout
    return out[:, :c].reshape(B, Ho, Wo, c)


def fc_chain(x_flat, fcs):
    """Fused fc1+ReLU -> fc2+ReLU -> fc3 in a single pallas_call."""
    (w1, b1), (w2, b2), (w3, b3) = fcs
    B, _ = x_flat.shape
    m_pad = _round_up(B, 8)
    x = jnp.pad(x_flat, ((0, m_pad - B), (0, 0))).astype(jnp.bfloat16)
    n_out = w3.shape[1]

    def full(shape):
        return pl.BlockSpec(shape, lambda i: (0,) * len(shape))

    out = pl.pallas_call(
        _fc_chain_kernel,
        out_shape=jax.ShapeDtypeStruct((m_pad, n_out), jnp.float32),
        grid=(1,),
        in_specs=[full(x.shape), full(w1.shape), full(b1.shape),
                  full(w2.shape), full(b2.shape), full(w3.shape),
                  full(b3.shape)],
        out_specs=full((m_pad, n_out)),
        compiler_params=pltpu.CompilerParams(
            dimension_semantics=("arbitrary",)),
    )(x, w1, b1, w2, b2, w3, b3)
    return out[:B]


# ----------------------------------------------------------------------------
# Parameters (torch layout) + one-time packing to Pallas-friendly layouts
# ----------------------------------------------------------------------------
def init_params(key):
    def nrm(k, shape, scale=0.05):
        return jax.random.normal(k, shape, dtype=jnp.float32) * scale

    ks = jax.random.split(key, 16)
    return {
        "c1w": nrm(ks[0], (6, 3, 3, 3)),    "c1b": nrm(ks[1], (6,)),
        "c2w": nrm(ks[2], (16, 6, 3, 3)),   "c2b": nrm(ks[3], (16,)),
        "c3w": nrm(ks[4], (32, 16, 3, 3)),  "c3b": nrm(ks[5], (32,)),
        "c4w": nrm(ks[6], (32, 32, 3, 3)),  "c4b": nrm(ks[7], (32,)),
        "c5w": nrm(ks[8], (64, 32, 3, 3)),  "c5b": nrm(ks[9], (64,)),
        "fc1w": nrm(ks[10], (512, 1024)),   "fc1b": nrm(ks[11], (512,)),
        "fc2w": nrm(ks[12], (512, 512)),    "fc2b": nrm(ks[13], (512,)),
        "fc3w": nrm(ks[14], (10, 512)),     "fc3b": nrm(ks[15], (10,)),
    }


def pack_params(p):
    """Hoist ALL weight re-layouts out of the forward pass."""
    def pack_conv(w, b):
        cout, cin = w.shape[0], w.shape[1]
        k = 9 * cin
        k_pad = _round_up(k, 16)                       # bf16 sublane packing
        w2 = jnp.transpose(w, (2, 3, 1, 0)).reshape(k, cout)   # (kh,kw,cin)xCout
        w2 = jnp.pad(w2, ((0, k_pad - k), (0, LANE - cout)))   # lane-dense N=128
        b2 = jnp.pad(b, (0, LANE - cout)).reshape(1, LANE)
        return w2.astype(jnp.bfloat16), b2.astype(jnp.float32)

    def pack_fc(w, b, n_pad=None):
        wt = jnp.transpose(w)                          # [in, out]
        n = wt.shape[1]
        if n_pad is not None and n_pad > n:
            wt = jnp.pad(wt, ((0, 0), (0, n_pad - n)))
            b = jnp.pad(b, (0, n_pad - n))
        return wt.astype(jnp.bfloat16), b.reshape(1, -1).astype(jnp.float32)

    packed = {
        "conv1": pack_conv(p["c1w"], p["c1b"]),
        "conv2": pack_conv(p["c2w"], p["c2b"]),
        "conv3": pack_conv(p["c3w"], p["c3b"]),
        "conv4": pack_conv(p["c4w"], p["c4b"]),
        "conv5": pack_conv(p["c5w"], p["c5b"]),
    }
    # fc1: permute input columns from PyTorch NCHW-flatten order (c,h,w) to the
    # NHWC(+channel-pad) order of the conv5 output [B, 4, 4, 128].
    w1t = jnp.transpose(p["fc1w"])                     # [1024, 512], rows (c,h,w)
    w1t = w1t.reshape(64, 4, 4, 512).transpose(1, 2, 0, 3)      # (h, w, c, out)
    w1t = jnp.pad(w1t, ((0, 0), (0, 0), (0, LANE - 64), (0, 0)))
    w1t = w1t.reshape(4 * 4 * LANE, 512)
    packed["fc"] = (
        (w1t.astype(jnp.bfloat16),
         p["fc1b"].reshape(1, -1).astype(jnp.float32)),
        pack_fc(p["fc2w"], p["fc2b"]),
        pack_fc(p["fc3w"], p["fc3b"], n_pad=LANE),
    )
    return packed


# ----------------------------------------------------------------------------
# Forward pass
# ----------------------------------------------------------------------------
def alexnet_forward(packed, x_nchw):
    # NCHW (PyTorch) -> NHWC (internal, channels on the lane axis)
    x = jnp.transpose(x_nchw, (0, 2, 3, 1)).astype(jnp.float32)

    x = conv_block(x, packed["conv1"], 6, pool=True)              # [B,16,16, 6]
    x = conv_block(x, packed["conv2"], 16, pool=True)             # [B, 8, 8,16]
    x = conv_block(x, packed["conv3"], 32, pool=False)            # [B, 8, 8,32]
    x = conv_block(x, packed["conv4"], 32, pool=False)            # [B, 8, 8,32]
    x = conv_block(x, packed["conv5"], 64, pool=True, keep_pad=True)  # [B,4,4,128]

    B = x.shape[0]
    x = x.reshape(B, -1)            # [B, 2048]: (h,w,c_pad); padded channels are 0
    logits = fc_chain(x, packed["fc"])                            # [B, 128]
    return logits[:, :10]


# ----------------------------------------------------------------------------
# Main
# ----------------------------------------------------------------------------
if __name__ == "__main__":
    key = jax.random.PRNGKey(0)
    k_params, k_x = jax.random.split(key)

    params = init_params(k_params)
    packed = pack_params(params)        # weight re-layouts done once, at init

    # AlexNet-for-CIFAR: 3 input channels, 32x32 spatial (flatten == 1024).
    x = jax.random.normal(k_x, (2, 3, 32, 32), dtype=jnp.float32)

    fwd = jax.jit(alexnet_forward)
    out = fwd(packed, x)
    out = jax.block_until_ready(out)

    assert out.shape == (2, 10), out.shape
    assert out.dtype == jnp.float32
    print("KERNEL_OK")
</pallas_src>

<mosaic_0001>
module attributes {stable_mosaic.version = 11 : i64} {
  func.func @_conv_mm_kernel(%arg0: i32, %arg1: memref<256x32xbf16, #tpu.memory_space<vmem>>, %arg2: memref<256x32xbf16, #tpu.memory_space<vmem>>, %arg3: memref<256x32xbf16, #tpu.memory_space<vmem>>, %arg4: memref<256x32xbf16, #tpu.memory_space<vmem>>, %arg5: memref<32x128xbf16, #tpu.memory_space<vmem>>, %arg6: memref<1x128xf32, #tpu.memory_space<vmem>>, %arg7: memref<256x128xf32, #tpu.memory_space<vmem>>) attributes {dimension_semantics = [#tpu.dimension_semantics<parallel>], iteration_bounds = array<i64: 2>, scalar_prefetch = 0 : i64, scratch_operands = 0 : i64, tpu.core_type = #tpu.core_type<tc>, window_params = [{transform_indices = @transform_0, window_bounds = array<i64: 256, 32>}, {transform_indices = @transform_1, window_bounds = array<i64: 256, 32>}, {transform_indices = @transform_2, window_bounds = array<i64: 256, 32>}, {transform_indices = @transform_3, window_bounds = array<i64: 256, 32>}, {pipeline_mode = #tpu.pipeline_mode<synchronous>, transform_indices = @transform_4, window_bounds = array<i64: 32, 128>}, {pipeline_mode = #tpu.pipeline_mode<synchronous>, transform_indices = @transform_5, window_bounds = array<i64: 1, 128>}, {transform_indices = @transform_6, window_bounds = array<i64: 256, 128>}]} {
    %c0 = arith.constant 0 : index
    %c0_0 = arith.constant 0 : index
    %0 = vector.load %arg5[%c0, %c0_0] : memref<32x128xbf16, #tpu.memory_space<vmem>>, vector<32x128xbf16>
    %c0_1 = arith.constant 0 : index
    %c0_2 = arith.constant 0 : index
    %1 = vector.load %arg1[%c0_1, %c0_2] : memref<256x32xbf16, #tpu.memory_space<vmem>>, vector<256x32xbf16>
    %cst = arith.constant dense<0.000000e+00> : vector<256x128xf32>
    %2 = tpu.matmul %1, %0, %cst {dimension_numbers = #tpu.dot_dimension_numbers<[1], [0], [0], [1], [0, 0, 1, 1], [], []>} : vector<256x32xbf16>, vector<32x128xbf16>, vector<256x128xf32> -> vector<256x128xf32>
    %c0_3 = arith.constant 0 : index
    %c0_4 = arith.constant 0 : index
    %3 = vector.load %arg2[%c0_3, %c0_4] : memref<256x32xbf16, #tpu.memory_space<vmem>>, vector<256x32xbf16>
    %cst_5 = arith.constant dense<0.000000e+00> : vector<256x128xf32>
    %4 = tpu.matmul %3, %0, %cst_5 {dimension_numbers = #tpu.dot_dimension_numbers<[1], [0], [0], [1], [0, 0, 1, 1], [], []>} : vector<256x32xbf16>, vector<32x128xbf16>, vector<256x128xf32> -> vector<256x128xf32>
    %5 = arith.maximumf %2, %4 : vector<256x128xf32>
    %c0_6 = arith.constant 0 : index
    %c0_7 = arith.constant 0 : index
    %6 = vector.load %arg3[%c0_6, %c0_7] : memref<256x32xbf16, #tpu.memory_space<vmem>>, vector<256x32xbf16>
    %cst_8 = arith.constant dense<0.000000e+00> : vector<256x128xf32>
    %7 = tpu.matmul %6, %0, %cst_8 {dimension_numbers = #tpu.dot_dimension_numbers<[1], [0], [0], [1], [0, 0, 1, 1], [], []>} : vector<256x32xbf16>, vector<32x128xbf16>, vector<256x128xf32> -> vector<256x128xf32>
    %8 = arith.maximumf %5, %7 : vector<256x128xf32>
    %c0_9 = arith.constant 0 : index
    %c0_10 = arith.constant 0 : index
    %9 = vector.load %arg4[%c0_9, %c0_10] : memref<256x32xbf16, #tpu.memory_space<vmem>>, vector<256x32xbf16>
    %cst_11 = arith.constant dense<0.000000e+00> : vector<256x128xf32>
    %10 = tpu.matmul %9, %0, %cst_11 {dimension_numbers = #tpu.dot_dimension_numbers<[1], [0], [0], [1], [0, 0, 1, 1], [], []>} : vector<256x32xbf16>, vector<32x128xbf16>, vector<256x128xf32> -> vector<256x128xf32>
    %11 = arith.maximumf %8, %10 : vector<256x128xf32>
    %c0_12 = arith.constant 0 : index
    %c0_13 = arith.constant 0 : index
    %12 = vector.load %arg6[%c0_12, %c0_13] : memref<1x128xf32, #tpu.memory_space<vmem>>, vector<1x128xf32>
    %13 = vector.broadcast %12 : vector<1x128xf32> to vector<256x128xf32>
    %14 = arith.addf %11, %13 : vector<256x128xf32>
    %cst_14 = arith.constant 0.000000e+00 : f32
    %15 = vector.broadcast %cst_14 : f32 to vector<256x128xf32>
    %16 = arith.maximumf %14, %15 : vector<256x128xf32>
    %c0_15 = arith.constant 0 : index
    %c0_16 = arith.constant 0 : index
    %17 = vector.load %arg7[%c0_15, %c0_16] : memref<256x128xf32, #tpu.memory_space<vmem>>, vector<256x128xf32>
    tpu.vector_store %arg7[%c0_15, %c0_16], %16 {strides = array<i32>} : memref<256x128xf32, #tpu.memory_space<vmem>>, vector<256x128xf32>,
    return
  }
  func.func @transform_0(%arg0: i32) -> (i32, i32) {
    %c0_i32 = arith.constant 0 : i32
    %c0_i32_0 = arith.constant 0 : i32
    return %arg0, %c0_i32 : i32, i32
  }
  func.func @transform_1(%arg0: i32) -> (i32, i32) {
    %c0_i32 = arith.constant 0 : i32
    %c0_i32_0 = arith.constant 0 : i32
    return %arg0, %c0_i32 : i32, i32
  }
  func.func @transform_2(%arg0: i32) -> (i32, i32) {
    %c0_i32 = arith.constant 0 : i32
    %c0_i32_0 = arith.constant 0 : i32
    return %arg0, %c0_i32 : i32, i32
  }
  func.func @transform_3(%arg0: i32) -> (i32, i32) {
    %c0_i32 = arith.constant 0 : i32
    %c0_i32_0 = arith.constant 0 : i32
    return %arg0, %c0_i32 : i32, i32
  }
  func.func @transform_4(%arg0: i32) -> (i32, i32) {
    %c0_i32 = arith.constant 0 : i32
    %c0_i32_0 = arith.constant 0 : i32
    %c0_i32_1 = arith.constant 0 : i32
    return %c0_i32, %c0_i32_0 : i32, i32
  }
  func.func @transform_5(%arg0: i32) -> (i32, i32) {
    %c0_i32 = arith.constant 0 : i32
    %c0_i32_0 = arith.constant 0 : i32
    %c0_i32_1 = arith.constant 0 : i32
    return %c0_i32, %c0_i32_0 : i32, i32
  }
  func.func @transform_6(%arg0: i32) -> (i32, i32) {
    %c0_i32 = arith.constant 0 : i32
    %c0_i32_0 = arith.constant 0 : i32
    return %arg0, %c0_i32 : i32, i32
  }
}

module attributes {stable_mosaic.version = 11 : i64} {
  func.func @_conv_mm_kernel(%arg0: i32, %arg1: memref<128x64xbf16, #tpu.memory_space<vmem>>, %arg2: memref<128x64xbf16, #tpu.memory_space<vmem>>, %arg3: memref<128x64xbf16, #tpu.memory_space<vmem>>, %arg4: memref<128x64xbf16, #tpu.memory_space<vmem>>, %arg5: memref<64x128xbf16, #tpu.memory_space<vmem>>, %arg6: memref<1x128xf32, #tpu.memory_space<vmem>>, %arg7: memref<128x128xf32, #tpu.memory_space<vmem>>) attributes {dimension_semantics = [#tpu.dimension_semantics<parallel>], iteration_bounds = array<i64: 1>, scalar_prefetch = 0 : i64, scratch_operands = 0 : i64, tpu.core_type = #tpu.core_type<tc>, window_params = [{transform_indices = @transform_0, window_bounds = array<i64: 128, 64>}, {transform_indices = @transform_1, window_bounds = array<i64: 128, 64>}, {transform_indices = @transform_2, window_bounds = array<i64: 128, 64>}, {transform_indices = @transform_3, window_bounds = array<i64: 128, 64>}, {pipeline_mode = #tpu.pipeline_mode<synchronous>, transform_indices = @transform_4, window_bounds = array<i64: 64, 128>}, {pipeline_mode = #tpu.pipeline_mode<synchronous>, transform_indices = @transform_5, window_bounds = array<i64: 1, 128>}, {transform_indices = @transform_6, window_bounds = array<i64: 128, 128>}]} {
    %c0 = arith.constant 0 : index
    %c0_0 = arith.constant 0 : index
    %0 = vector.load %arg5[%c0, %c0_0] : memref<64x128xbf16, #tpu.memory_space<vmem>>, vector<64x128xbf16>
    %c0_1 = arith.constant 0 : index
    %c0_2 = arith.constant 0 : index
    %1 = vector.load %arg1[%c0_1, %c0_2] : memref<128x64xbf16, #tpu.memory_space<vmem>>, vector<128x64xbf16>
    %cst = arith.constant dense<0.000000e+00> : vector<128x128xf32>
    %2 = tpu.matmul %1, %0, %cst {dimension_numbers = #tpu.dot_dimension_numbers<[1], [0], [0], [1], [0, 0, 1, 1], [], []>} : vector<128x64xbf16>, vector<64x128xbf16>, vector<128x128xf32> -> vector<128x128xf32>
    %c0_3 = arith.constant 0 : index
    %c0_4 = arith.constant 0 : index
    %3 = vector.load %arg2[%c0_3, %c0_4] : memref<128x64xbf16, #tpu.memory_space<vmem>>, vector<128x64xbf16>
    %cst_5 = arith.constant dense<0.000000e+00> : vector<128x128xf32>
    %4 = tpu.matmul %3, %0, %cst_5 {dimension_numbers = #tpu.dot_dimension_numbers<[1], [0], [0], [1], [0, 0, 1, 1], [], []>} : vector<128x64xbf16>, vector<64x128xbf16>, vector<128x128xf32> -> vector<128x128xf32>
    %5 = arith.maximumf %2, %4 : vector<128x128xf32>
    %c0_6 = arith.constant 0 : index
    %c0_7 = arith.constant 0 : index
    %6 = vector.load %arg3[%c0_6, %c0_7] : memref<128x64xbf16, #tpu.memory_space<vmem>>, vector<128x64xbf16>
    %cst_8 = arith.constant dense<0.000000e+00> : vector<128x128xf32>
    %7 = tpu.matmul %6, %0, %cst_8 {dimension_numbers = #tpu.dot_dimension_numbers<[1], [0], [0], [1], [0, 0, 1, 1], [], []>} : vector<128x64xbf16>, vector<64x128xbf16>, vector<128x128xf32> -> vector<128x128xf32>
    %8 = arith.maximumf %5, %7 : vector<128x128xf32>
    %c0_9 = arith.constant 0 : index
    %c0_10 = arith.constant 0 : index
    %9 = vector.load %arg4[%c0_9, %c0_10] : memref<128x64xbf16, #tpu.memory_space<vmem>>, vector<128x64xbf16>
    %cst_11 = arith.constant dense<0.000000e+00> : vector<128x128xf32>
    %10 = tpu.matmul %9, %0, %cst_11 {dimension_numbers = #tpu.dot_dimension_numbers<[1], [0], [0], [1], [0, 0, 1, 1], [], []>} : vector<128x64xbf16>, vector<64x128xbf16>, vector<128x128xf32> -> vector<128x128xf32>
    %11 = arith.maximumf %8, %10 : vector<128x128xf32>
    %c0_12 = arith.constant 0 : index
    %c0_13 = arith.constant 0 : index
    %12 = vector.load %arg6[%c0_12, %c0_13] : memref<1x128xf32, #tpu.memory_space<vmem>>, vector<1x128xf32>
    %13 = vector.broadcast %12 : vector<1x128xf32> to vector<128x128xf32>
    %14 = arith.addf %11, %13 : vector<128x128xf32>
    %cst_14 = arith.constant 0.000000e+00 : f32
    %15 = vector.broadcast %cst_14 : f32 to vector<128x128xf32>
    %16 = arith.maximumf %14, %15 : vector<128x128xf32>
    %c0_15 = arith.constant 0 : index
    %c0_16 = arith.constant 0 : index
    %17 = vector.load %arg7[%c0_15, %c0_16] : memref<128x128xf32, #tpu.memory_space<vmem>>, vector<128x128xf32>
    tpu.vector_store %arg7[%c0_15, %c0_16], %16 {strides = array<i32>} : memref<128x128xf32, #tpu.memory_space<vmem>>, vector<128x128xf32>,
    return
  }
  func.func @transform_0(%arg0: i32) -> (i32, i32) {
    %c0_i32 = arith.constant 0 : i32
    %c0_i32_0 = arith.constant 0 : i32
    return %arg0, %c0_i32 : i32, i32
  }
  func.func @transform_1(%arg0: i32) -> (i32, i32) {
    %c0_i32 = arith.constant 0 : i32
    %c0_i32_0 = arith.constant 0 : i32
    return %arg0, %c0_i32 : i32, i32
  }
  func.func @transform_2(%arg0: i32) -> (i32, i32) {
    %c0_i32 = arith.constant 0 : i32
    %c0_i32_0 = arith.constant 0 : i32
    return %arg0, %c0_i32 : i32, i32
  }
  func.func @transform_3(%arg0: i32) -> (i32, i32) {
    %c0_i32 = arith.constant 0 : i32
    %c0_i32_0 = arith.constant 0 : i32
    return %arg0, %c0_i32 : i32, i32
  }
  func.func @transform_4(%arg0: i32) -> (i32, i32) {
    %c0_i32 = arith.constant 0 : i32
    %c0_i32_0 = arith.constant 0 : i32
    %c0_i32_1 = arith.constant 0 : i32
    return %c0_i32, %c0_i32_0 : i32, i32
  }
  func.func @transform_5(%arg0: i32) -> (i32, i32) {
    %c0_i32 = arith.constant 0 : i32
    %c0_i32_0 = arith.constant 0 : i32
    %c0_i32_1 = arith.constant 0 : i32
    return %c0_i32, %c0_i32_0 : i32, i32
  }
  func.func @transform_6(%arg0: i32) -> (i32, i32) {
    %c0_i32 = arith.constant 0 : i32
    %c0_i32_0 = arith.constant 0 : i32
    return %arg0, %c0_i32 : i32, i32
  }
}

module attributes {stable_mosaic.version = 11 : i64} {
  func.func @_conv_mm_kernel(%arg0: i32, %arg1: memref<128x144xbf16, #tpu.memory_space<vmem>>, %arg2: memref<144x128xbf16, #tpu.memory_space<vmem>>, %arg3: memref<1x128xf32, #tpu.memory_space<vmem>>, %arg4: memref<128x128xf32, #tpu.memory_space<vmem>>) attributes {dimension_semantics = [#tpu.dimension_semantics<parallel>], iteration_bounds = array<i64: 1>, scalar_prefetch = 0 : i64, scratch_operands = 0 : i64, tpu.core_type = #tpu.core_type<tc>, window_params = [{transform_indices = @transform_0, window_bounds = array<i64: 128, 144>}, {pipeline_mode = #tpu.pipeline_mode<synchronous>, transform_indices = @transform_1, window_bounds = array<i64: 144, 128>}, {pipeline_mode = #tpu.pipeline_mode<synchronous>, transform_indices = @transform_2, window_bounds = array<i64: 1, 128>}, {transform_indices = @transform_3, window_bounds = array<i64: 128, 128>}]} {
    %c0 = arith.constant 0 : index
    %c0_0 = arith.constant 0 : index
    %0 = vector.load %arg2[%c0, %c0_0] : memref<144x128xbf16, #tpu.memory_space<vmem>>, vector<144x128xbf16>
    %c0_1 = arith.constant 0 : index
    %c0_2 = arith.constant 0 : index
    %1 = vector.load %arg1[%c0_1, %c0_2] : memref<128x144xbf16, #tpu.memory_space<vmem>>, vector<128x144xbf16>
    %cst = arith.constant dense<0.000000e+00> : vector<128x128xf32>
    %2 = tpu.matmul %1, %0, %cst {dimension_numbers = #tpu.dot_dimension_numbers<[1], [0], [0], [1], [0, 0, 1, 1], [], []>} : vector<128x144xbf16>, vector<144x128xbf16>, vector<128x128xf32> -> vector<128x128xf32>
    %c0_3 = arith.constant 0 : index
    %c0_4 = arith.constant 0 : index
    %3 = vector.load %arg3[%c0_3, %c0_4] : memref<1x128xf32, #tpu.memory_space<vmem>>, vector<1x128xf32>
    %4 = vector.broadcast %3 : vector<1x128xf32> to vector<128x128xf32>
    %5 = arith.addf %2, %4 : vector<128x128xf32>
    %cst_5 = arith.constant 0.000000e+00 : f32
    %6 = vector.broadcast %cst_5 : f32 to vector<128x128xf32>
    %7 = arith.maximumf %5, %6 : vector<128x128xf32>
    %c0_6 = arith.constant 0 : index
    %c0_7 = arith.constant 0 : index
    %8 = vector.load %arg4[%c0_6, %c0_7] : memref<128x128xf32, #tpu.memory_space<vmem>>, vector<128x128xf32>
    tpu.vector_store %arg4[%c0_6, %c0_7], %7 {strides = array<i32>} : memref<128x128xf32, #tpu.memory_space<vmem>>, vector<128x128xf32>,
    return
  }
  func.func @transform_0(%arg0: i32) -> (i32, i32) {
    %c0_i32 = arith.constant 0 : i32
    %c0_i32_0 = arith.constant 0 : i32
    return %arg0, %c0_i32 : i32, i32
  }
  func.func @transform_1(%arg0: i32) -> (i32, i32) {
    %c0_i32 = arith.constant 0 : i32
    %c0_i32_0 = arith.constant 0 : i32
    %c0_i32_1 = arith.constant 0 : i32
    return %c0_i32, %c0_i32_0 : i32, i32
  }
  func.func @transform_2(%arg0: i32) -> (i32, i32) {
    %c0_i32 = arith.constant 0 : i32
    %c0_i32_0 = arith.constant 0 : i32
    %c0_i32_1 = arith.constant 0 : i32
    return %c0_i32, %c0_i32_0 : i32, i32
  }
  func.func @transform_3(%arg0: i32) -> (i32, i32) {
    %c0_i32 = arith.constant 0 : i32
    %c0_i32_0 = arith.constant 0 : i32
    return %arg0, %c0_i32 : i32, i32
  }
}

module attributes {stable_mosaic.version = 11 : i64} {
  func.func @_conv_mm_kernel(%arg0: i32, %arg1: memref<128x288xbf16, #tpu.memory_space<vmem>>, %arg2: memref<288x128xbf16, #tpu.memory_space<vmem>>, %arg3: memref<1x128xf32, #tpu.memory_space<vmem>>, %arg4: memref<128x128xf32, #tpu.memory_space<vmem>>) attributes {dimension_semantics = [#tpu.dimension_semantics<parallel>], iteration_bounds = array<i64: 1>, scalar_prefetch = 0 : i64, scratch_operands = 0 : i64, tpu.core_type = #tpu.core_type<tc>, window_params = [{transform_indices = @transform_0, window_bounds = array<i64: 128, 288>}, {pipeline_mode = #tpu.pipeline_mode<synchronous>, transform_indices = @transform_1, window_bounds = array<i64: 288, 128>}, {pipeline_mode = #tpu.pipeline_mode<synchronous>, transform_indices = @transform_2, window_bounds = array<i64: 1, 128>}, {transform_indices = @transform_3, window_bounds = array<i64: 128, 128>}]} {
    %c0 = arith.constant 0 : index
    %c0_0 = arith.constant 0 : index
    %0 = vector.load %arg2[%c0, %c0_0] : memref<288x128xbf16, #tpu.memory_space<vmem>>, vector<288x128xbf16>
    %c0_1 = arith.constant 0 : index
    %c0_2 = arith.constant 0 : index
    %1 = vector.load %arg1[%c0_1, %c0_2] : memref<128x288xbf16, #tpu.memory_space<vmem>>, vector<128x288xbf16>
    %cst = arith.constant dense<0.000000e+00> : vector<128x128xf32>
    %2 = tpu.matmul %1, %0, %cst {dimension_numbers = #tpu.dot_dimension_numbers<[1], [0], [0], [1], [0, 0, 1, 1], [], []>} : vector<128x288xbf16>, vector<288x128xbf16>, vector<128x128xf32> -> vector<128x128xf32>
    %c0_3 = arith.constant 0 : index
    %c0_4 = arith.constant 0 : index
    %3 = vector.load %arg3[%c0_3, %c0_4] : memref<1x128xf32, #tpu.memory_space<vmem>>, vector<1x128xf32>
    %4 = vector.broadcast %3 : vector<1x128xf32> to vector<128x128xf32>
    %5 = arith.addf %2, %4 : vector<128x128xf32>
    %cst_5 = arith.constant 0.000000e+00 : f32
    %6 = vector.broadcast %cst_5 : f32 to vector<128x128xf32>
    %7 = arith.maximumf %5, %6 : vector<128x128xf32>
    %c0_6 = arith.constant 0 : index
    %c0_7 = arith.constant 0 : index
    %8 = vector.load %arg4[%c0_6, %c0_7] : memref<128x128xf32, #tpu.memory_space<vmem>>, vector<128x128xf32>
    tpu.vector_store %arg4[%c0_6, %c0_7], %7 {strides = array<i32>} : memref<128x128xf32, #tpu.memory_space<vmem>>, vector<128x128xf32>,
    return
  }
  func.func @transform_0(%arg0: i32) -> (i32, i32) {
    %c0_i32 = arith.constant 0 : i32
    %c0_i32_0 = arith.constant 0 : i32
    return %arg0, %c0_i32 : i32, i32
  }
  func.func @transform_1(%arg0: i32) -> (i32, i32) {
    %c0_i32 = arith.constant 0 : i32
    %c0_i32_0 = arith.constant 0 : i32
    %c0_i32_1 = arith.constant 0 : i32
    return %c0_i32, %c0_i32_0 : i32, i32
  }
  func.func @transform_2(%arg0: i32) -> (i32, i32) {
    %c0_i32 = arith.constant 0 : i32
    %c0_i32_0 = arith.constant 0 : i32
    %c0_i32_1 = arith.constant 0 : i32
    return %c0_i32, %c0_i32_0 : i32, i32
  }
  func.func @transform_3(%arg0: i32) -> (i32, i32) {
    %c0_i32 = arith.constant 0 : i32
    %c0_i32_0 = arith.constant 0 : i32
    return %arg0, %c0_i32 : i32, i32
  }
}

module attributes {stable_mosaic.version = 11 : i64} {
  func.func @_conv_mm_kernel(%arg0: i32, %arg1: memref<32x288xbf16, #tpu.memory_space<vmem>>, %arg2: memref<32x288xbf16, #tpu.memory_space<vmem>>, %arg3: memref<32x288xbf16, #tpu.memory_space<vmem>>, %arg4: memref<32x288xbf16, #tpu.memory_space<vmem>>, %arg5: memref<288x128xbf16, #tpu.memory_space<vmem>>, %arg6: memref<1x128xf32, #tpu.memory_space<vmem>>, %arg7: memref<32x128xf32, #tpu.memory_space<vmem>>) attributes {dimension_semantics = [#tpu.dimension_semantics<parallel>], iteration_bounds = array<i64: 1>, scalar_prefetch = 0 : i64, scratch_operands = 0 : i64, tpu.core_type = #tpu.core_type<tc>, window_params = [{transform_indices = @transform_0, window_bounds = array<i64: 32, 288>}, {transform_indices = @transform_1, window_bounds = array<i64: 32, 288>}, {transform_indices = @transform_2, window_bounds = array<i64: 32, 288>}, {transform_indices = @transform_3, window_bounds = array<i64: 32, 288>}, {pipeline_mode = #tpu.pipeline_mode<synchronous>, transform_indices = @transform_4, window_bounds = array<i64: 288, 128>}, {pipeline_mode = #tpu.pipeline_mode<synchronous>, transform_indices = @transform_5, window_bounds = array<i64: 1, 128>}, {transform_indices = @transform_6, window_bounds = array<i64: 32, 128>}]} {
    %c0 = arith.constant 0 : index
    %c0_0 = arith.constant 0 : index
    %0 = vector.load %arg5[%c0, %c0_0] : memref<288x128xbf16, #tpu.memory_space<vmem>>, vector<288x128xbf16>
    %c0_1 = arith.constant 0 : index
    %c0_2 = arith.constant 0 : index
    %1 = vector.load %arg1[%c0_1, %c0_2] : memref<32x288xbf16, #tpu.memory_space<vmem>>, vector<32x288xbf16>
    %cst = arith.constant dense<0.000000e+00> : vector<32x128xf32>
    %2 = tpu.matmul %1, %0, %cst {dimension_numbers = #tpu.dot_dimension_numbers<[1], [0], [0], [1], [0, 0, 1, 1], [], []>} : vector<32x288xbf16>, vector<288x128xbf16>, vector<32x128xf32> -> vector<32x128xf32>
    %c0_3 = arith.constant 0 : index
    %c0_4 = arith.constant 0 : index
    %3 = vector.load %arg2[%c0_3, %c0_4] : memref<32x288xbf16, #tpu.memory_space<vmem>>, vector<32x288xbf16>
    %cst_5 = arith.constant dense<0.000000e+00> : vector<32x128xf32>
    %4 = tpu.matmul %3, %0, %cst_5 {dimension_numbers = #tpu.dot_dimension_numbers<[1], [0], [0], [1], [0, 0, 1, 1], [], []>} : vector<32x288xbf16>, vector<288x128xbf16>, vector<32x128xf32> -> vector<32x128xf32>
    %5 = arith.maximumf %2, %4 : vector<32x128xf32>
    %c0_6 = arith.constant 0 : index
    %c0_7 = arith.constant 0 : index
    %6 = vector.load %arg3[%c0_6, %c0_7] : memref<32x288xbf16, #tpu.memory_space<vmem>>, vector<32x288xbf16>
    %cst_8 = arith.constant dense<0.000000e+00> : vector<32x128xf32>
    %7 = tpu.matmul %6, %0, %cst_8 {dimension_numbers = #tpu.dot_dimension_numbers<[1], [0], [0], [1], [0, 0, 1, 1], [], []>} : vector<32x288xbf16>, vector<288x128xbf16>, vector<32x128xf32> -> vector<32x128xf32>
    %8 = arith.maximumf %5, %7 : vector<32x128xf32>
    %c0_9 = arith.constant 0 : index
    %c0_10 = arith.constant 0 : index
    %9 = vector.load %arg4[%c0_9, %c0_10] : memref<32x288xbf16, #tpu.memory_space<vmem>>, vector<32x288xbf16>
    %cst_11 = arith.constant dense<0.000000e+00> : vector<32x128xf32>
    %10 = tpu.matmul %9, %0, %cst_11 {dimension_numbers = #tpu.dot_dimension_numbers<[1], [0], [0], [1], [0, 0, 1, 1], [], []>} : vector<32x288xbf16>, vector<288x128xbf16>, vector<32x128xf32> -> vector<32x128xf32>
    %11 = arith.maximumf %8, %10 : vector<32x128xf32>
    %c0_12 = arith.constant 0 : index
    %c0_13 = arith.constant 0 : index
    %12 = vector.load %arg6[%c0_12, %c0_13] : memref<1x128xf32, #tpu.memory_space<vmem>>, vector<1x128xf32>
    %13 = vector.broadcast %12 : vector<1x128xf32> to vector<32x128xf32>
    %14 = arith.addf %11, %13 : vector<32x128xf32>
    %cst_14 = arith.constant 0.000000e+00 : f32
    %15 = vector.broadcast %cst_14 : f32 to vector<32x128xf32>
    %16 = arith.maximumf %14, %15 : vector<32x128xf32>
    %c0_15 = arith.constant 0 : index
    %c0_16 = arith.constant 0 : index
    %17 = vector.load %arg7[%c0_15, %c0_16] : memref<32x128xf32, #tpu.memory_space<vmem>>, vector<32x128xf32>
    tpu.vector_store %arg7[%c0_15, %c0_16], %16 {strides = array<i32>} : memref<32x128xf32, #tpu.memory_space<vmem>>, vector<32x128xf32>,
    return
  }
  func.func @transform_0(%arg0: i32) -> (i32, i32) {
    %c0_i32 = arith.constant 0 : i32
    %c0_i32_0 = arith.constant 0 : i32
    return %arg0, %c0_i32 : i32, i32
  }
  func.func @transform_1(%arg0: i32) -> (i32, i32) {
    %c0_i32 = arith.constant 0 : i32
    %c0_i32_0 = arith.constant 0 : i32
    return %arg0, %c0_i32 : i32, i32
  }
  func.func @transform_2(%arg0: i32) -> (i32, i32) {
    %c0_i32 = arith.constant 0 : i32
    %c0_i32_0 = arith.constant 0 : i32
    return %arg0, %c0_i32 : i32, i32
  }
  func.func @transform_3(%arg0: i32) -> (i32, i32) {
    %c0_i32 = arith.constant 0 : i32
    %c0_i32_0 = arith.constant 0 : i32
    return %arg0, %c0_i32 : i32, i32
  }
  func.func @transform_4(%arg0: i32) -> (i32, i32) {
    %c0_i32 = arith.constant 0 : i32
    %c0_i32_0 = arith.constant 0 : i32
    %c0_i32_1 = arith.constant 0 : i32
    return %c0_i32, %c0_i32_0 : i32, i32
  }
  func.func @transform_5(%arg0: i32) -> (i32, i32) {
    %c0_i32 = arith.constant 0 : i32
    %c0_i32_0 = arith.constant 0 : i32
    %c0_i32_1 = arith.constant 0 : i32
    return %c0_i32, %c0_i32_0 : i32, i32
  }
  func.func @transform_6(%arg0: i32) -> (i32, i32) {
    %c0_i32 = arith.constant 0 : i32
    %c0_i32_0 = arith.constant 0 : i32
    return %arg0, %c0_i32 : i32, i32
  }
}

module attributes {stable_mosaic.version = 11 : i64} {
  func.func @_fc_chain_kernel(%arg0: i32, %arg1: memref<8x2048xbf16, #tpu.memory_space<vmem>>, %arg2: memref<2048x512xbf16, #tpu.memory_space<vmem>>, %arg3: memref<1x512xf32, #tpu.memory_space<vmem>>, %arg4: memref<512x512xbf16, #tpu.memory_space<vmem>>, %arg5: memref<1x512xf32, #tpu.memory_space<vmem>>, %arg6: memref<512x128xbf16, #tpu.memory_space<vmem>>, %arg7: memref<1x128xf32, #tpu.memory_space<vmem>>, %arg8: memref<8x128xf32, #tpu.memory_space<vmem>>) attributes {dimension_semantics = [#tpu.dimension_semantics<arbitrary>], iteration_bounds = array<i64: 1>, scalar_prefetch = 0 : i64, scratch_operands = 0 : i64, tpu.core_type = #tpu.core_type<tc>, window_params = [{pipeline_mode = #tpu.pipeline_mode<synchronous>, transform_indices = @transform_0, window_bounds = array<i64: 8, 2048>}, {pipeline_mode = #tpu.pipeline_mode<synchronous>, transform_indices = @transform_1, window_bounds = array<i64: 2048, 512>}, {pipeline_mode = #tpu.pipeline_mode<synchronous>, transform_indices = @transform_2, window_bounds = array<i64: 1, 512>}, {pipeline_mode = #tpu.pipeline_mode<synchronous>, transform_indices = @transform_3, window_bounds = array<i64: 512, 512>}, {pipeline_mode = #tpu.pipeline_mode<synchronous>, transform_indices = @transform_4, window_bounds = array<i64: 1, 512>}, {pipeline_mode = #tpu.pipeline_mode<synchronous>, transform_indices = @transform_5, window_bounds = array<i64: 512, 128>}, {pipeline_mode = #tpu.pipeline_mode<synchronous>, transform_indices = @transform_6, window_bounds = array<i64: 1, 128>}, {pipeline_mode = #tpu.pipeline_mode<synchronous>, transform_indices = @transform_7, window_bounds = array<i64: 8, 128>}]} {
    %c0 = arith.constant 0 : index
    %c0_0 = arith.constant 0 : index
    %0 = vector.load %arg1[%c0, %c0_0] : memref<8x2048xbf16, #tpu.memory_space<vmem>>, vector<8x2048xbf16>
    %c0_1 = arith.constant 0 : index
    %c0_2 = arith.constant 0 : index
    %1 = vector.load %arg2[%c0_1, %c0_2] : memref<2048x512xbf16, #tpu.memory_space<vmem>>, vector<2048x512xbf16>
    %cst = arith.constant dense<0.000000e+00> : vector<8x512xf32>
    %2 = tpu.matmul %0, %1, %cst {dimension_numbers = #tpu.dot_dimension_numbers<[1], [0], [0], [1], [0, 0, 1, 1], [], []>} : vector<8x2048xbf16>, vector<2048x512xbf16>, vector<8x512xf32> -> vector<8x512xf32>
    %c0_3 = arith.constant 0 : index
    %c0_4 = arith.constant 0 : index
    %3 = vector.load %arg3[%c0_3, %c0_4] : memref<1x512xf32, #tpu.memory_space<vmem>>, vector<1x512xf32>
    %4 = vector.broadcast %3 : vector<1x512xf32> to vector<8x512xf32>
    %5 = arith.addf %2, %4 : vector<8x512xf32>
    %cst_5 = arith.constant 0.000000e+00 : f32
    %6 = vector.broadcast %cst_5 : f32 to vector<8x512xf32>
    %7 = arith.maximumf %5, %6 : vector<8x512xf32>
    %8 = arith.truncf %7 : vector<8x512xf32> to vector<8x512xbf16>
    %c0_6 = arith.constant 0 : index
    %c0_7 = arith.constant 0 : index
    %9 = vector.load %arg4[%c0_6, %c0_7] : memref<512x512xbf16, #tpu.memory_space<vmem>>, vector<512x512xbf16>
    %cst_8 = arith.constant dense<0.000000e+00> : vector<8x512xf32>
    %10 = tpu.matmul %8, %9, %cst_8 {dimension_numbers = #tpu.dot_dimension_numbers<[1], [0], [0], [1], [0, 0, 1, 1], [], []>} : vector<8x512xbf16>, vector<512x512xbf16>, vector<8x512xf32> -> vector<8x512xf32>
    %c0_9 = arith.constant 0 : index
    %c0_10 = arith.constant 0 : index
    %11 = vector.load %arg5[%c0_9, %c0_10] : memref<1x512xf32, #tpu.memory_space<vmem>>, vector<1x512xf32>
    %12 = vector.broadcast %11 : vector<1x512xf32> to vector<8x512xf32>
    %13 = arith.addf %10, %12 : vector<8x512xf32>
    %cst_11 = arith.constant 0.000000e+00 : f32
    %14 = vector.broadcast %cst_11 : f32 to vector<8x512xf32>
    %15 = arith.maximumf %13, %14 : vector<8x512xf32>
    %16 = arith.truncf %15 : vector<8x512xf32> to vector<8x512xbf16>
    %c0_12 = arith.constant 0 : index
    %c0_13 = arith.constant 0 : index
    %17 = vector.load %arg6[%c0_12, %c0_13] : memref<512x128xbf16, #tpu.memory_space<vmem>>, vector<512x128xbf16>
    %cst_14 = arith.constant dense<0.000000e+00> : vector<8x128xf32>
    %18 = tpu.matmul %16, %17, %cst_14 {dimension_numbers = #tpu.dot_dimension_numbers<[1], [0], [0], [1], [0, 0, 1, 1], [], []>} : vector<8x512xbf16>, vector<512x128xbf16>, vector<8x128xf32> -> vector<8x128xf32>
    %c0_15 = arith.constant 0 : index
    %c0_16 = arith.constant 0 : index
    %19 = vector.load %arg7[%c0_15, %c0_16] : memref<1x128xf32, #tpu.memory_space<vmem>>, vector<1x128xf32>
    %20 = vector.broadcast %19 : vector<1x128xf32> to vector<8x128xf32>
    %21 = arith.addf %18, %20 : vector<8x128xf32>
    %c0_17 = arith.constant 0 : index
    %c0_18 = arith.constant 0 : index
    %22 = vector.load %arg8[%c0_17, %c0_18] : memref<8x128xf32, #tpu.memory_space<vmem>>, vector<8x128xf32>
    tpu.vector_store %arg8[%c0_17, %c0_18], %21 {strides = array<i32>} : memref<8x128xf32, #tpu.memory_space<vmem>>, vector<8x128xf32>,
    return
  }
  func.func @transform_0(%arg0: i32) -> (i32, i32) {
    %c0_i32 = arith.constant 0 : i32
    %c0_i32_0 = arith.constant 0 : i32
    %c0_i32_1 = arith.constant 0 : i32
    return %c0_i32, %c0_i32_0 : i32, i32
  }
  func.func @transform_1(%arg0: i32) -> (i32, i32) {
    %c0_i32 = arith.constant 0 : i32
    %c0_i32_0 = arith.constant 0 : i32
    %c0_i32_1 = arith.constant 0 : i32
    return %c0_i32, %c0_i32_0 : i32, i32
  }
  func.func @transform_2(%arg0: i32) -> (i32, i32) {
    %c0_i32 = arith.constant 0 : i32
    %c0_i32_0 = arith.constant 0 : i32
    %c0_i32_1 = arith.constant 0 : i32
    return %c0_i32, %c0_i32_0 : i32, i32
  }
  func.func @transform_3(%arg0: i32) -> (i32, i32) {
    %c0_i32 = arith.constant 0 : i32
    %c0_i32_0 = arith.constant 0 : i32
    %c0_i32_1 = arith.constant 0 : i32
    return %c0_i32, %c0_i32_0 : i32, i32
  }
  func.func @transform_4(%arg0: i32) -> (i32, i32) {
    %c0_i32 = arith.constant 0 : i32
    %c0_i32_0 = arith.constant 0 : i32
    %c0_i32_1 = arith.constant 0 : i32
    return %c0_i32, %c0_i32_0 : i32, i32
  }
  func.func @transform_5(%arg0: i32) -> (i32, i32) {
    %c0_i32 = arith.constant 0 : i32
    %c0_i32_0 = arith.constant 0 : i32
    %c0_i32_1 = arith.constant 0 : i32
    return %c0_i32, %c0_i32_0 : i32, i32
  }
  func.func @transform_6(%arg0: i32) -> (i32, i32) {
    %c0_i32 = arith.constant 0 : i32
    %c0_i32_0 = arith.constant 0 : i32
    %c0_i32_1 = arith.constant 0 : i32
    return %c0_i32, %c0_i32_0 : i32, i32
  }
  func.func @transform_7(%arg0: i32) -> (i32, i32) {
    %c0_i32 = arith.constant 0 : i32
    %c0_i32_0 = arith.constant 0 : i32
    %c0_i32_1 = arith.constant 0 : i32
    return %c0_i32, %c0_i32_0 : i32, i32
  }
}

</mosaic_0001>

<bundles_post_ra>
// kernel: alexnet_forward.6
= control target key start
LH: loop header
LB: loop body
LE: loop exit
PB: predicated region body
PF: predicated region fallthrough
CT: control target
= control target key end

     0   :  { %s2395_s21 = smov 0   ;;  %s2836_s0 = inlined_call_operand.vmem [shape: bf16[512,32], index: 0, kind: input, shape index: {}]   ;;  %s2837_s1 = inlined_call_operand.vmem [shape: bf16[512,32], index: 1, kind: input, shape index: {}]   ;;  %s2838_s2 = inlined_call_operand.vmem [shape: bf16[512,32], index: 2, kind: input, shape index: {}]   ;;  %s2839_s3 = inlined_call_operand.vmem [shape: bf16[512,32], index: 3, kind: input, shape index: {}]   ;;  %s2840_s4 = inlined_call_operand.vmem [shape: bf16[32,128], index: 4, kind: input, shape index: {}]   ;;  %s2841_s5 = inlined_call_operand.vmem [shape: f32[1,128], index: 5, kind: input, shape index: {}]   ;;  %s2842_s6 = inlined_call_operand.vmem [shape: f32[512,128], index: 6, kind: output, shape index: {}]  }
   0x1 LB: > { %s1914_s22 = sadd.s32 4294967295, %s2358_s21   ;;  %p1918_p0 = scmp.ge.s32.totalorder %s2358_s21, 1  ;;  %s2358_s21 = sphi %s2395_s21, %s16_s21  }
   0x2   : > { %p246_p1 = scmp.lt.s32.totalorder %s2358_s21, 3 }
   0x4   : > { %p247_p2 = pnand %p1918_p0, %p246_p1 }
   0x6   : > { %250 = sbr.rel (%p247_p2) target bundleno = 348 (0x15c), region = 44 }
   0xb   : > { %v2286_v0 = vld [vmem:[%s2840_s4 + $0x8] sm:$0xff]   ;;  %s1919_s25 = sshll.u32 %s1914_s22, 5  ;;  %v2287_v1 = vld [vmem:[%s2840_s4] sm:$0xff]   ;;  %vm450_vm0 = vcmask 261120  }
   0xc   : > { %p292_p3 = scmp.lt.s32.totalorder %s1919_s25, 63  ;;  %2134 = vmatprep.subr.bf16.mxu0 %v2286_v0  ;;  %2170 = vmatprep.subr.bf16.mxu1 %v2286_v0 }
   0xd   : > { %2135 = vmatpush3.bf16.msra.mxu0 %v2286_v0  ;;  %2171 = vmatpush3.bf16.msra.mxu1 %v2286_v0 }
   0xe   : > { %s2868_s25 = smov (!%p292_p3, %s1919_s25), 63  ;;  %2136 = vmatprep.subr.bf16.mxu0 %v2287_v1  ;;  %2172 = vmatprep.subr.bf16.mxu1 %v2287_v1 }
   0xf   : > { %s2412_s28 = sshll.u32 %s2868_s25, 2  ;;  %s1928_s19 = sshll.u32 %s2868_s25, 3 }
  0x10   : > { %s2418_s7 = scalar_lea.vmem %s2836_s0, %s2412_s28  ;;  %s2424_s10 = scalar_lea.vmem %s2837_s1, %s2412_s28 }
  0x11   : > { %2137 = vmatpush3.bf16.msra.mxu0 %v2287_v1  ;;  %2173 = vmatpush3.bf16.msra.mxu1 %v2287_v1  ;;  %v2288_v2 = vld [vmem:[%s2418_s7] sm:$0xff]   ;;  %v2290_v4 = vld [vmem:[%s2418_s7 + $0x8] sm:$0xff]   ;;  %v2292_v6 = vld [vmem:[%s2418_s7 + $0x10] sm:$0xff]   ;;  %s2467_s13 = scalar_lea.vmem %s2838_s2, %s2412_s28  ;;  %s2474_s16 = scalar_lea.vmem %s2839_s3, %s2412_s28 }
  0x12   : > { %v2289_v3 = vld [vmem:[%s2424_s10] sm:$0xff]   ;;  %2206 = vmatprep.subr.bf16.mxu0 %v2286_v0  ;;  %2242 = vmatprep.subr.bf16.mxu1 %v2286_v0  ;;  %v2291_v5 = vld [vmem:[%s2424_s10 + $0x8] sm:$0xff]   ;;  %v2293_v7 = vld [vmem:[%s2424_s10 + $0x10] sm:$0xff]   ;;  %s2714_s23 = scalar_lea.vmem %s2842_s6, %s1928_s19 }
  0x13   : > { %2138 = vmatprep.mubr.msk.bf16.mxu0 %vm450_vm0, %v2288_v2  ;;  %2174 = vmatprep.mubr.msk.bf16.mxu1 %vm450_vm0, %v2289_v3  ;;  %v2294_v8 = vld [vmem:[%s2418_s7 + $0x18] sm:$0xff]   ;;  %v2296_v10 = vld [vmem:[%s2418_s7 + $0x20] sm:$0xff]   ;;  %v2298_v12 = vld [vmem:[%s2418_s7 + $0x28] sm:$0xff]  }
  0x14   : > { %2139 = vmatmul.mubr.msk.bf16.vlgmr.msra.gmra.mxu0 %vm450_vm0, %v2290_v4  ;;  %2175 = vmatmul.mubr.msk.bf16.vlgmr.msra.gmra.mxu1 %vm450_vm0, %v2291_v5  ;;  %v2295_v9 = vld [vmem:[%s2424_s10 + $0x18] sm:$0xff]   ;;  %v2297_v11 = vld [vmem:[%s2424_s10 + $0x20] sm:$0xff]   ;;  %v2299_v13 = vld [vmem:[%s2424_s10 + $0x28] sm:$0xff]  }
  0x15   : > { %2207 = vmatpush3.bf16.msra.mxu0 %v2286_v0  ;;  %2243 = vmatpush3.bf16.msra.mxu1 %v2286_v0  ;;  %v2300_v14 = vld [vmem:[%s2418_s7 + $0x30] sm:$0xff]   ;;  %v2302_v16 = vld [vmem:[%s2418_s7 + $0x38] sm:$0xff]   ;;  %v2304_v18 = vld [vmem:[%s2418_s7 + $0x40] sm:$0xff]  }
  0x16   : > { %2142 = vmatprep.mubr.msk.bf16.mxu0 %vm450_vm0, %v2292_v6  ;;  %2178 = vmatprep.mubr.msk.bf16.mxu1 %vm450_vm0, %v2293_v7  ;;  %v2301_v15 = vld [vmem:[%s2424_s10 + $0x30] sm:$0xff]   ;;  %v2303_v17 = vld [vmem:[%s2424_s10 + $0x38] sm:$0xff]   ;;  %v2305_v19 = vld [vmem:[%s2424_s10 + $0x40] sm:$0xff]  }
  0x17   : > { %2208 = vmatprep.subr.bf16.mxu0 %v2287_v1  ;;  %2244 = vmatprep.subr.bf16.mxu1 %v2287_v1  ;;  %v2306_v20 = vld [vmem:[%s2418_s7 + $0x48] sm:$0xff]   ;;  %v2308_v22 = vld [vmem:[%s2418_s7 + $0x50] sm:$0xff]   ;;  %v2310_v24 = vld [vmem:[%s2418_s7 + $0x58] sm:$0xff]  }
  0x18   : > { %v2307_v21 = vld [vmem:[%s2424_s10 + $0x48] sm:$0xff]   ;;  %v2309_v23 = vld [vmem:[%s2424_s10 + $0x50] sm:$0xff]   ;;  %v2311_v25 = vld [vmem:[%s2424_s10 + $0x58] sm:$0xff]  }
  0x19   : > { %2209 = vmatpush3.bf16.msra.mxu0 %v2287_v1  ;;  %2245 = vmatpush3.bf16.msra.mxu1 %v2287_v1  ;;  %v2312_v26 = vld [vmem:[%s2418_s7 + $0x60] sm:$0xff]   ;;  %v2314_v28 = vld [vmem:[%s2418_s7 + $0x68] sm:$0xff]   ;;  %v2316_v30 = vld [vmem:[%s2418_s7 + $0x70] sm:$0xff]  }
  0x1a   : > { %v2313_v27 = vld [vmem:[%s2424_s10 + $0x60] sm:$0xff]   ;;  %v2315_v29 = vld [vmem:[%s2424_s10 + $0x68] sm:$0xff]   ;;  %v2317_v31 = vld [vmem:[%s2424_s10 + $0x70] sm:$0xff]  }
  0x1b   : > { %v2318_v32 = vld [vmem:[%s2418_s7 + $0x78] sm:$0xff]   ;;  %v2320_v34 = vld [vmem:[%s2467_s13] sm:$0xff]   ;;  %v2322_v36 = vld [vmem:[%s2467_s13 + $0x8] sm:$0xff]  }
  0x1c   : > { %2143 = vmatmul.mubr.msk.bf16.gmra.mxu0 %vm450_vm0, %v2294_v8  ;;  %2179 = vmatmul.mubr.msk.bf16.gmra.mxu1 %vm450_vm0, %v2295_v9  ;;  %v2319_v33 = vld [vmem:[%s2424_s10 + $0x78] sm:$0xff]   ;;  %v2321_v35 = vld [vmem:[%s2474_s16] sm:$0xff]   ;;  %v2323_v37 = vld [vmem:[%s2474_s16 + $0x8] sm:$0xff]  }
  0x1d   : > { %2146 = vmatprep.mubr.msk.bf16.mxu0 %vm450_vm0, %v2296_v10  ;;  %2182 = vmatprep.mubr.msk.bf16.mxu1 %vm450_vm0, %v2297_v11  ;;  %v2324_v38 = vld [vmem:[%s2467_s13 + $0x10] sm:$0xff]   ;;  %v2326_v40 = vld [vmem:[%s2467_s13 + $0x18] sm:$0xff]   ;;  %v2328_v42 = vld [vmem:[%s2467_s13 + $0x20] sm:$0xff]  }
  0x1e   : > { %v2325_v39 = vld [vmem:[%s2474_s16 + $0x10] sm:$0xff]   ;;  %v2327_v41 = vld [vmem:[%s2474_s16 + $0x18] sm:$0xff]   ;;  %v2329_v43 = vld [vmem:[%s2474_s16 + $0x20] sm:$0xff]  }
  0x1f   : > { %v2330_v44 = vld [vmem:[%s2467_s13 + $0x28] sm:$0xff]   ;;  %v2332_v46 = vld [vmem:[%s2467_s13 + $0x30] sm:$0xff]   ;;  %v2334_v48 = vld [vmem:[%s2467_s13 + $0x38] sm:$0xff]  }
  0x20   : > { %v2331_v45 = vld [vmem:[%s2474_s16 + $0x28] sm:$0xff]   ;;  %v2333_v47 = vld [vmem:[%s2474_s16 + $0x30] sm:$0xff]   ;;  %v2335_v49 = vld [vmem:[%s2474_s16 + $0x38] sm:$0xff]  }
  0x21   : > { %v2336_v50 = vld [vmem:[%s2467_s13 + $0x40] sm:$0xff]   ;;  %v2338_v52 = vld [vmem:[%s2467_s13 + $0x48] sm:$0xff]   ;;  %v2340_v54 = vld [vmem:[%s2467_s13 + $0x50] sm:$0xff]  }
  0x22   : > { %v2337_v51 = vld [vmem:[%s2474_s16 + $0x40] sm:$0xff]   ;;  %v2339_v53 = vld [vmem:[%s2474_s16 + $0x48] sm:$0xff]   ;;  %v2341_v55 = vld [vmem:[%s2474_s16 + $0x50] sm:$0xff]  }
  0x23   : > { %v2342_v56 = vld [vmem:[%s2467_s13 + $0x58] sm:$0xff]   ;;  %v2344_v58 = vld [vmem:[%s2467_s13 + $0x60] sm:$0xff]   ;;  %v2346_v60 = vld [vmem:[%s2467_s13 + $0x68] sm:$0xff]  }
  0x24   : > { %2147 = vmatmul.mubr.msk.bf16.gmra.mxu0 %vm450_vm0, %v2298_v12  ;;  %2183 = vmatmul.mubr.msk.bf16.gmra.mxu1 %vm450_vm0, %v2299_v13  ;;  %v2343_v57 = vld [vmem:[%s2474_s16 + $0x58] sm:$0xff]   ;;  %v2345_v59 = vld [vmem:[%s2474_s16 + $0x60] sm:$0xff]   ;;  %v2347_v61 = vld [vmem:[%s2474_s16 + $0x68] sm:$0xff]  }
  0x25   : > { %2150 = vmatprep.mubr.msk.bf16.mxu0 %vm450_vm0, %v2300_v14  ;;  %2186 = vmatprep.mubr.msk.bf16.mxu1 %vm450_vm0, %v2301_v15  ;;  %v2348_v62 = vld [vmem:[%s2467_s13 + $0x70] sm:$0xff]   ;;  %v2350_v0 = vld [vmem:[%s2467_s13 + $0x78] sm:$0xff]  }
  0x26   : > { %v2349_v63 = vld [vmem:[%s2474_s16 + $0x70] sm:$0xff]   ;;  %v2351_v1 = vld [vmem:[%s2474_s16 + $0x78] sm:$0xff]  }
  0x2c   : > { %2151 = vmatmul.mubr.msk.bf16.gmra.mxu0 %vm450_vm0, %v2302_v16  ;;  %2187 = vmatmul.mubr.msk.bf16.gmra.mxu1 %vm450_vm0, %v2303_v17 }
  0x2d   : > { %2154 = vmatprep.mubr.msk.bf16.mxu0 %vm450_vm0, %v2304_v18  ;;  %2190 = vmatprep.mubr.msk.bf16.mxu1 %vm450_vm0, %v2305_v19 }
  0x34   : > { %2155 = vmatmul.mubr.msk.bf16.gmra.mxu0 %vm450_vm0, %v2306_v20  ;;  %2191 = vmatmul.mubr.msk.bf16.gmra.mxu1 %vm450_vm0, %v2307_v21 }
  0x35   : > { %2158 = vmatprep.mubr.msk.bf16.mxu0 %vm450_vm0, %v2308_v22  ;;  %2194 = vmatprep.mubr.msk.bf16.mxu1 %vm450_vm0, %v2309_v23 }
  0x3c   : > { %2159 = vmatmul.mubr.msk.bf16.gmra.mxu0 %vm450_vm0, %v2310_v24  ;;  %2195 = vmatmul.mubr.msk.bf16.gmra.mxu1 %vm450_vm0, %v2311_v25 }
  0x3d   : > { %2162 = vmatprep.mubr.msk.bf16.mxu0 %vm450_vm0, %v2312_v26  ;;  %2198 = vmatprep.mubr.msk.bf16.mxu1 %vm450_vm0, %v2313_v27 }
  0x44   : > { %2163 = vmatmul.mubr.msk.bf16.gmra.mxu0 %vm450_vm0, %v2314_v28  ;;  %2199 = vmatmul.mubr.msk.bf16.gmra.mxu1 %vm450_vm0, %v2315_v29 }
  0x45   : > { %2166 = vmatprep.mubr.msk.bf16.mxu0 %vm450_vm0, %v2316_v30  ;;  %2202 = vmatprep.mubr.msk.bf16.mxu1 %vm450_vm0, %v2317_v31 }
  0x4c   : > { %2167 = vmatmul.mubr.msk.bf16.gmra.mxu0 %vm450_vm0, %v2318_v32  ;;  %2203 = vmatmul.mubr.msk.bf16.gmra.mxu1 %vm450_vm0, %v2319_v33 }
  0x4d   : > { %2210 = vmatprep.mubr.msk.bf16.mxu0 %vm450_vm0, %v2320_v34  ;;  %2246 = vmatprep.mubr.msk.bf16.mxu1 %vm450_vm0, %v2321_v35 }
  0x54   : > { %2211 = vmatmul.mubr.msk.bf16.vlgmr.msra.gmra.mxu0 %vm450_vm0, %v2322_v36  ;;  %2247 = vmatmul.mubr.msk.bf16.vlgmr.msra.gmra.mxu1 %vm450_vm0, %v2323_v37 }
  0x55   : > { %2214 = vmatprep.mubr.msk.bf16.mxu0 %vm450_vm0, %v2324_v38  ;;  %2250 = vmatprep.mubr.msk.bf16.mxu1 %vm450_vm0, %v2325_v39 }
  0x5c   : > { %2215 = vmatmul.mubr.msk.bf16.gmra.mxu0 %vm450_vm0, %v2326_v40  ;;  %2251 = vmatmul.mubr.msk.bf16.gmra.mxu1 %vm450_vm0, %v2327_v41 }
  0x5d   : > { %2218 = vmatprep.mubr.msk.bf16.mxu0 %vm450_vm0, %v2328_v42  ;;  %2254 = vmatprep.mubr.msk.bf16.mxu1 %vm450_vm0, %v2329_v43 }
  0x64   : > { %2219 = vmatmul.mubr.msk.bf16.gmra.mxu0 %vm450_vm0, %v2330_v44  ;;  %2255 = vmatmul.mubr.msk.bf16.gmra.mxu1 %vm450_vm0, %v2331_v45 }
  0x65   : > { %2222 = vmatprep.mubr.msk.bf16.mxu0 %vm450_vm0, %v2332_v46  ;;  %2258 = vmatprep.mubr.msk.bf16.mxu1 %vm450_vm0, %v2333_v47 }
  0x6c   : > { %2223 = vmatmul.mubr.msk.bf16.gmra.mxu0 %vm450_vm0, %v2334_v48  ;;  %2259 = vmatmul.mubr.msk.bf16.gmra.mxu1 %vm450_vm0, %v2335_v49 }
  0x6d   : > { %2226 = vmatprep.mubr.msk.bf16.mxu0 %vm450_vm0, %v2336_v50  ;;  %2262 = vmatprep.mubr.msk.bf16.mxu1 %vm450_vm0, %v2337_v51 }
  0x74   : > { %2227 = vmatmul.mubr.msk.bf16.gmra.mxu0 %vm450_vm0, %v2338_v52  ;;  %2263 = vmatmul.mubr.msk.bf16.gmra.mxu1 %vm450_vm0, %v2339_v53 }
  0x75   : > { %2230 = vmatprep.mubr.msk.bf16.mxu0 %vm450_vm0, %v2340_v54  ;;  %2266 = vmatprep.mubr.msk.bf16.mxu1 %vm450_vm0, %v2341_v55 }
  0x7c   : > { %2231 = vmatmul.mubr.msk.bf16.gmra.mxu0 %vm450_vm0, %v2342_v56  ;;  %2267 = vmatmul.mubr.msk.bf16.gmra.mxu1 %vm450_vm0, %v2343_v57 }
  0x7d   : > { %2234 = vmatprep.mubr.msk.bf16.mxu0 %vm450_vm0, %v2344_v58  ;;  %2270 = vmatprep.mubr.msk.bf16.mxu1 %vm450_vm0, %v2345_v59 }
  0x84   : > { %2235 = vmatmul.mubr.msk.bf16.gmra.mxu0 %vm450_vm0, %v2346_v60  ;;  %2271 = vmatmul.mubr.msk.bf16.gmra.mxu1 %vm450_vm0, %v2347_v61 }
  0x85   : > { %2238 = vmatprep.mubr.msk.bf16.mxu0 %vm450_vm0, %v2348_v62  ;;  %2274 = vmatprep.mubr.msk.bf16.mxu1 %vm450_vm0, %v2349_v63 }
  0x8c   : > { %2239 = vmatmul.mubr.msk.bf16.gmra.mxu0 %vm450_vm0, %v2350_v0  ;;  %2275 = vmatmul.mubr.msk.bf16.gmra.mxu1 %vm450_vm0, %v2351_v1 }
  0xd4   : > { %v2566_v2 = vpop.f32.mrf.mxu0  ;;  %v2568_v3 = vpop.f32.mrf.mxu1 }
  0xd5   : > { %v983_v1 = vmax.f32 %v2566_v2, %v2568_v3 }
  0xd6   : > { %v2570_v4 = vpop.f32.mrf.mxu0  ;;  %v2572_v5 = vpop.f32.mrf.mxu1 }
  0xd8   : > { %v2574_v6 = vpop.f32.mrf.mxu0  ;;  %v2576_v7 = vpop.f32.mrf.mxu1 }
  0xda   : > { %v2578_v8 = vpop.f32.mrf.mxu0  ;;  %v2580_v9 = vpop.f32.mrf.mxu1 }
  0xdc   : > { %v2582_v10 = vpop.f32.mrf.mxu0  ;;  %v2584_v11 = vpop.f32.mrf.mxu1 }
  0xde   : > { %v2586_v12 = vpop.f32.mrf.mxu0  ;;  %v2588_v13 = vpop.f32.mrf.mxu1 }
  0xe0   : > { %v2590_v14 = vpop.f32.mrf.mxu0  ;;  %v2592_v15 = vpop.f32.mrf.mxu1 }
  0xe2   : > { %v2594_v16 = vpop.f32.mrf.mxu0  ;;  %v2596_v17 = vpop.f32.mrf.mxu1 }
  0xe4   : > { %v2598_v18 = vpop.f32.mrf.mxu0  ;;  %v2600_v19 = vpop.f32.mrf.mxu1 }
  0xe6   : > { %v2602_v20 = vpop.f32.mrf.mxu0  ;;  %v2604_v21 = vpop.f32.mrf.mxu1 }
  0xe8   : > { %v2606_v22 = vpop.f32.mrf.mxu0  ;;  %v2608_v23 = vpop.f32.mrf.mxu1 }
  0xea   : > { %v2610_v24 = vpop.f32.mrf.mxu0  ;;  %v2612_v25 = vpop.f32.mrf.mxu1 }
  0xec   : > { %v2614_v26 = vpop.f32.mrf.mxu0  ;;  %v2616_v27 = vpop.f32.mrf.mxu1 }
  0xee   : > { %v2618_v28 = vpop.f32.mrf.mxu0  ;;  %v2620_v29 = vpop.f32.mrf.mxu1 }
  0xf0   : > { %v2622_v30 = vpop.f32.mrf.mxu0  ;;  %v2624_v31 = vpop.f32.mrf.mxu1 }
  0xf2   : > { %v2626_v32 = vpop.f32.mrf.mxu0  ;;  %v2628_v33 = vpop.f32.mrf.mxu1 }
  0xf4   : > { %v2630_v34 = vpop.f32.mrf.mxu0  ;;  %v2632_v35 = vpop.f32.mrf.mxu1 }
  0xf6   : > { %v2634_v36 = vpop.f32.mrf.mxu0  ;;  %v2636_v37 = vpop.f32.mrf.mxu1 }
  0xf8   : > { %v2638_v38 = vpop.f32.mrf.mxu0  ;;  %v2640_v39 = vpop.f32.mrf.mxu1 }
  0xfa   : > { %v2642_v40 = vpop.f32.mrf.mxu0  ;;  %v2644_v41 = vpop.f32.mrf.mxu1 }
  0xfc   : > { %v2646_v42 = vpop.f32.mrf.mxu0  ;;  %v2648_v43 = vpop.f32.mrf.mxu1 }
  0xfe   : > { %v2650_v44 = vpop.f32.mrf.mxu0  ;;  %v2652_v45 = vpop.f32.mrf.mxu1 }
 0x100   : > { %v2654_v46 = vpop.f32.mrf.mxu0  ;;  %v2656_v47 = vpop.f32.mrf.mxu1 }
 0x102   : > { %v2658_v48 = vpop.f32.mrf.mxu0  ;;  %v2660_v49 = vpop.f32.mrf.mxu1 }
 0x104   : > { %v2662_v50 = vpop.f32.mrf.mxu0  ;;  %v2664_v51 = vpop.f32.mrf.mxu1 }
 0x106   : > { %v2666_v52 = vpop.f32.mrf.mxu0  ;;  %v2668_v53 = vpop.f32.mrf.mxu1 }
 0x108   : > { %v2670_v54 = vpop.f32.mrf.mxu0  ;;  %v2672_v55 = vpop.f32.mrf.mxu1 }
 0x109   : > { %2843 = vst [vmem:[#allocation2_spill] sm:$0xff] %v2670_v54  ;;  %2844 = vst [vmem:[#allocation3_spill] sm:$0xff] %v2672_v55  ;;  %v987_v55 = vmax.f32 %v2582_v10, %v2584_v11 }
 0x10a   : > { %v2674_v56 = vpop.f32.mrf.mxu0  ;;  %v2676_v57 = vpop.f32.mrf.mxu1 }
 0x10b   : > { %2845 = vst [vmem:[#allocation4_spill] sm:$0xff] %v2674_v56  ;;  %2846 = vst [vmem:[#allocation5_spill] sm:$0xff] %v2676_v57 }
 0x10c   : > { %v2678_v58 = vpop.f32.mrf.mxu0  ;;  %v2680_v59 = vpop.f32.mrf.mxu1 }
 0x10d   : > { %2847 = vst [vmem:[#allocation6_spill] sm:$0xff] %v2678_v58  ;;  %2848 = vst [vmem:[#allocation7_spill] sm:$0xff] %v2680_v59  ;;  %v981_v58 = vmax.f32 %v2570_v4, %v2572_v5 }
 0x10e   : > { %v2682_v60 = vpop.f32.mrf.mxu0  ;;  %v2684_v61 = vpop.f32.mrf.mxu1 }
 0x10f   : > { %2849 = vst [vmem:[#allocation8_spill] sm:$0xff] %v2682_v60  ;;  %2850 = vst [vmem:[#allocation9_spill] sm:$0xff] %v2684_v61  ;;  %v2701_v60 = vld [vmem:[%s2841_s5] ss:$0 sm:$0xff]  ;;  %v982_v61 = vmax.f32 %v2578_v8, %v2580_v9 }
 0x110   : > { %v2686_v62 = vpop.f32.mrf.mxu0  ;;  %v2688_v63 = vpop.f32.mrf.mxu1 }
 0x111   : > { %2851 = vst [vmem:[#allocation10_spill] sm:$0xff] %v2686_v62  ;;  %2852 = vst [vmem:[#allocation11_spill] sm:$0xff] %v2688_v63 }
 0x112   : > { %v2690_v0 = vpop.f32.mrf.mxu0  ;;  %v2694_v56 = vpop.f32.mrf.mxu1 }
 0x113   : > { %2853 = vst [vmem:[#allocation12_spill] sm:$0xff] %v2690_v0  ;;  %2854 = vst [vmem:[#allocation13_spill] sm:$0xff] %v2694_v56  ;;  %v984_v0 = vmax.f32 %v2574_v6, %v2576_v7 }
 0x114   : > { %v2212_v57 = vpop.f32.mrf.mxu0  ;;  %v2248_v54 = vpop.f32.mrf.mxu1 }
 0x115   : > { %v1336_v59 = vmax.f32 %v983_v1, %v2212_v57 }
 0x116   : > { %v1207_v62 = vpop.f32.mrf.mxu0  ;;  %v1560_v3 = vpop.f32.mrf.mxu1 }
 0x117   : > { %v1689_v63 = vmax.f32 %v1336_v59, %v2248_v54  ;;  %v1334_v2 = vmax.f32 %v981_v58, %v1207_v62 }
 0x118   : > { %v2213_v56 = vpop.f32.mrf.mxu0  ;;  %v2249_v1 = vpop.f32.mrf.mxu1 }
 0x119   : > { %v1728_v4 = vadd.f32 %v2701_v60, %v1689_v63  ;;  %v1687_v5 = vmax.f32 %v1334_v2, %v1560_v3  ;;  %v1337_v57 = vmax.f32 %v984_v0, %v2213_v56  ;;  %v985_v56 = vmax.f32 %v2586_v12, %v2588_v13 }
 0x11a   : > { %v1210_v6 = vpop.f32.mrf.mxu0  ;;  %v1563_v58 = vpop.f32.mrf.mxu1  ;;  %v988_v2 = vmax.f32 %v2590_v14, %v2592_v15 }
 0x11b   : > { %v1760_v7 = vmax.f32 %v1728_v4, 0.0  ;;  %v1726_v54 = vadd.f32 %v2701_v60, %v1687_v5  ;;  %v1690_v8 = vmax.f32 %v1337_v57, %v2249_v1  ;;  %v1335_v9 = vmax.f32 %v982_v61, %v1210_v6 }
 0x11c   : > { %v2216_v59 = vpop.f32.mrf.mxu0  ;;  %v2252_v0 = vpop.f32.mrf.mxu1  ;;  %v986_v57 = vmax.f32 %v2594_v16, %v2596_v17 }
 0x11d   : > { %1792 = vst [vmem:[%s2714_s23 + $0x10] sm:$0xff] %v1760_v7  ;;  %v1758_v10 = vmax.f32 %v1726_v54, 0.0  ;;  %v1729_v11 = vadd.f32 %v2701_v60, %v1690_v8  ;;  %v1688_v62 = vmax.f32 %v1335_v9, %v1563_v58  ;;  %v1340_v63 = vmax.f32 %v987_v55, %v2216_v59 }
 0x11e   : > { %v1223_v3 = vpop.f32.mrf.mxu0  ;;  %v1576_v13 = vpop.f32.mrf.mxu1  ;;  %v991_v54 = vmax.f32 %v2598_v18, %v2600_v19  ;;  %v989_v59 = vmax.f32 %v2602_v20, %v2604_v21 }
 0x11f   : > { %1790 = vst [vmem:[%s2714_s23] sm:$0xff] %v1758_v10  ;;  %v1761_v61 = vmax.f32 %v1729_v11, 0.0  ;;  %v1727_v4 = vadd.f32 %v2701_v60, %v1688_v62  ;;  %v1693_v5 = vmax.f32 %v1340_v63, %v2252_v0  ;;  %v1338_v12 = vmax.f32 %v985_v56, %v1223_v3 }
 0x120   : > { %v2217_v1 = vpop.f32.mrf.mxu0  ;;  %v2253_v15 = vpop.f32.mrf.mxu1  ;;  %v992_v0 = vmax.f32 %v2606_v22, %v2608_v23 }
 0x121   : > { %1793 = vst [vmem:[%s2714_s23 + $0x18] sm:$0xff] %v1761_v61  ;;  %v1759_v55 = vmax.f32 %v1727_v4, 0.0  ;;  %v1732_v6 = vadd.f32 %v2701_v60, %v1693_v5  ;;  %v1691_v7 = vmax.f32 %v1338_v12, %v1576_v13  ;;  %v1341_v14 = vmax.f32 %v988_v2, %v2217_v1 }
 0x122   : > { %v1226_v8 = vpop.f32.mrf.mxu0  ;;  %v1579_v17 = vpop.f32.mrf.mxu1  ;;  %v990_v5 = vmax.f32 %v2610_v24, %v2612_v25 }
 0x123   : > { %1791 = vst [vmem:[%s2714_s23 + $0x8] sm:$0xff] %v1759_v55  ;;  %v1764_v9 = vmax.f32 %v1732_v6, 0.0  ;;  %v1730_v58 = vadd.f32 %v2701_v60, %v1691_v7  ;;  %v1694_v56 = vmax.f32 %v1341_v14, %v2253_v15  ;;  %v1339_v16 = vmax.f32 %v986_v57, %v1226_v8 }
 0x124   : > { %v2220_v10 = vpop.f32.mrf.mxu0  ;;  %v2256_v19 = vpop.f32.mrf.mxu1  ;;  %v995_v55 = vmax.f32 %v2614_v26, %v2616_v27 }
 0x125   : > { %1796 = vst [vmem:[%s2714_s23 + $0x30] sm:$0xff] %v1764_v9  ;;  %v1762_v11 = vmax.f32 %v1730_v58, 0.0  ;;  %v1733_v62 = vadd.f32 %v2701_v60, %v1694_v56  ;;  %v1692_v63 = vmax.f32 %v1339_v16, %v1579_v17  ;;  %v1344_v18 = vmax.f32 %v991_v54, %v2220_v10 }
 0x126   : > { %v1239_v2 = vpop.f32.mrf.mxu0  ;;  %v1592_v21 = vpop.f32.mrf.mxu1  ;;  %v993_v54 = vmax.f32 %v2618_v28, %v2620_v29  ;;  %v996_v16 = vmax.f32 %v2622_v30, %v2624_v31 }
 0x127   : > { %1794 = vst [vmem:[%s2714_s23 + $0x20] sm:$0xff] %v1762_v11  ;;  %v1765_v3 = vmax.f32 %v1733_v62, 0.0  ;;  %v1731_v61 = vadd.f32 %v2701_v60, %v1692_v63  ;;  %v1697_v4 = vmax.f32 %v1344_v18, %v2256_v19  ;;  %v1342_v20 = vmax.f32 %v989_v59, %v1239_v2 }
 0x128   : > { %v2221_v12 = vpop.f32.mrf.mxu0  ;;  %v2257_v23 = vpop.f32.mrf.mxu1  ;;  %v994_v62 = vmax.f32 %v2626_v32, %v2628_v33  ;;  %v999_v2 = vmax.f32 %v2630_v34, %v2632_v35 }
 0x129   : > { %1797 = vst [vmem:[%s2714_s23 + $0x38] sm:$0xff] %v1765_v3  ;;  %v1763_v13 = vmax.f32 %v1731_v61, 0.0  ;;  %v1736_v57 = vadd.f32 %v2701_v60, %v1697_v4  ;;  %v1695_v1 = vmax.f32 %v1342_v20, %v1592_v21  ;;  %v1345_v22 = vmax.f32 %v992_v0, %v2221_v12 }
 0x12a   : > { %v1242_v6 = vpop.f32.mrf.mxu0  ;;  %v1595_v25 = vpop.f32.mrf.mxu1  ;;  %v997_v21 = vmax.f32 %v2634_v36, %v2636_v37 }
 0x12b   : > { %1795 = vst [vmem:[%s2714_s23 + $0x28] sm:$0xff] %v1763_v13  ;;  %v1768_v7 = vmax.f32 %v1736_v57, 0.0  ;;  %v1734_v14 = vadd.f32 %v2701_v60, %v1695_v1  ;;  %v1698_v15 = vmax.f32 %v1345_v22, %v2257_v23  ;;  %v1343_v24 = vmax.f32 %v990_v5, %v1242_v6 }
 0x12c   : > { %v2224_v8 = vpop.f32.mrf.mxu0  ;;  %v2260_v27 = vpop.f32.mrf.mxu1  ;;  %v1000_v1 = vmax.f32 %v2638_v38, %v2640_v39 }
 0x12d   : > { %1800 = vst [vmem:[%s2714_s23 + $0x50] sm:$0xff] %v1768_v7  ;;  %v1766_v9 = vmax.f32 %v1734_v14, 0.0  ;;  %v1737_v58 = vadd.f32 %v2701_v60, %v1698_v15  ;;  %v1696_v56 = vmax.f32 %v1343_v24, %v1595_v25  ;;  %v1348_v26 = vmax.f32 %v995_v55, %v2224_v8 }
 0x12e   : > { %v1255_v17 = vpop.f32.mrf.mxu0  ;;  %v1608_v29 = vpop.f32.mrf.mxu1  ;;  %v998_v7 = vmax.f32 %v2642_v40, %v2644_v41 }
 0x12f   : > { %1798 = vst [vmem:[%s2714_s23 + $0x40] sm:$0xff] %v1766_v9  ;;  %v1769_v59 = vmax.f32 %v1737_v58, 0.0  ;;  %v1735_v10 = vadd.f32 %v2701_v60, %v1696_v56  ;;  %v1701_v11 = vmax.f32 %v1348_v26, %v2260_v27  ;;  %v1346_v28 = vmax.f32 %v993_v54, %v1255_v17 }
 0x130   : > { %v2225_v63 = vpop.f32.mrf.mxu0  ;;  %v2261_v31 = vpop.f32.mrf.mxu1  ;;  %v1003_v54 = vmax.f32 %v2646_v42, %v2648_v43  ;;  %v1001_v26 = vmax.f32 %v2650_v44, %v2652_v45 }
 0x131   : > { %1801 = vst [vmem:[%s2714_s23 + $0x58] sm:$0xff] %v1769_v59  ;;  %v1767_v18 = vmax.f32 %v1735_v10, 0.0  ;;  %v1740_v19 = vadd.f32 %v2701_v60, %v1701_v11  ;;  %v1699_v0 = vmax.f32 %v1346_v28, %v1608_v29  ;;  %v1349_v30 = vmax.f32 %v996_v16, %v2225_v63 }
 0x132   : > { %v1258_v3 = vpop.f32.mrf.mxu0  ;;  %v1611_v33 = vpop.f32.mrf.mxu1  ;;  %v1004_v10 = vmax.f32 %v2654_v46, %v2656_v47  ;;  %v1002_v63 = vmax.f32 %v2658_v48, %v2660_v49 }
 0x133   : > { %1799 = vst [vmem:[%s2714_s23 + $0x48] sm:$0xff] %v1767_v18  ;;  %v1772_v61 = vmax.f32 %v1740_v19, 0.0  ;;  %v1738_v4 = vadd.f32 %v2701_v60, %v1699_v0  ;;  %v1702_v20 = vmax.f32 %v1349_v30, %v2261_v31  ;;  %v1347_v32 = vmax.f32 %v994_v62, %v1258_v3 }
 0x134   : > { %v2228_v5 = vpop.f32.mrf.mxu0  ;;  %v2264_v35 = vpop.f32.mrf.mxu1  ;;  %v1007_v31 = vmax.f32 %v2662_v50, %v2664_v51 }
 0x135   : > { %1804 = vst [vmem:[%s2714_s23 + $0x70] sm:$0xff] %v1772_v61  ;;  %v1770_v12 = vmax.f32 %v1738_v4, 0.0  ;;  %v1741_v13 = vadd.f32 %v2701_v60, %v1702_v20  ;;  %v1700_v57 = vmax.f32 %v1347_v32, %v1611_v33  ;;  %v1352_v34 = vmax.f32 %v999_v2, %v2228_v5 }
 0x136   : > { %v1271_v22 = vpop.f32.mrf.mxu0  ;;  %v1624_v37 = vpop.f32.mrf.mxu1  ;;  %v1005_v20 = vmax.f32 %v2666_v52, %v2668_v53 }
 0x137   : > { %1802 = vst [vmem:[%s2714_s23 + $0x60] sm:$0xff] %v1770_v12  ;;  %v1773_v23 = vmax.f32 %v1741_v13, 0.0  ;;  %v1739_v55 = vadd.f32 %v2701_v60, %v1700_v57  ;;  %v1705_v6 = vmax.f32 %v1352_v34, %v2264_v35  ;;  %v1350_v36 = vmax.f32 %v997_v21, %v1271_v22  ;;  %v2855_v12 = vld [vmem:[#allocation3_spill] sm:$0xff]  ;;  %v2856_v13 = vld [vmem:[#allocation2_spill] sm:$0xff] }
 0x138   : > { %v2229_v14 = vpop.f32.mrf.mxu0  ;;  %v2265_v39 = vpop.f32.mrf.mxu1  ;;  %v1008_v57 = vmax.f32 %v2856_v13, %v2855_v12 }
 0x139   : > { %1805 = vst [vmem:[%s2714_s23 + $0x78] sm:$0xff] %v1773_v23  ;;  %v1771_v15 = vmax.f32 %v1739_v55, 0.0  ;;  %v1744_v24 = vadd.f32 %v2701_v60, %v1705_v6  ;;  %v1703_v25 = vmax.f32 %v1350_v36, %v1624_v37  ;;  %v1353_v38 = vmax.f32 %v1000_v1, %v2229_v14  ;;  %v2857_v23 = vld [vmem:[#allocation5_spill] sm:$0xff]  ;;  %v2858_v55 = vld [vmem:[#allocation4_spill] sm:$0xff] }
 0x13a   : > { %v1274_v8 = vpop.f32.mrf.mxu0  ;;  %v1627_v41 = vpop.f32.mrf.mxu1  ;;  %v1006_v6 = vmax.f32 %v2858_v55, %v2857_v23 }
 0x13b   : > { %1803 = vst [vmem:[%s2714_s23 + $0x68] sm:$0xff] %v1771_v15  ;;  %v1776_v9 = vmax.f32 %v1744_v24, 0.0  ;;  %v1742_v58 = vadd.f32 %v2701_v60, %v1703_v25  ;;  %v1706_v56 = vmax.f32 %v1353_v38, %v2265_v39  ;;  %v1351_v40 = vmax.f32 %v998_v7, %v1274_v8  ;;  %v2859_v25 = vld [vmem:[#allocation7_spill] sm:$0xff]  ;;  %v2860_v38 = vld [vmem:[#allocation6_spill] sm:$0xff] }
 0x13c   : > { %v2232_v27 = vpop.f32.mrf.mxu0  ;;  %v2268_v43 = vpop.f32.mrf.mxu1  ;;  %v1011_v39 = vmax.f32 %v2860_v38, %v2859_v25 }
 0x13d   : > { %1808 = vst [vmem:[%s2714_s23 + $0x90] sm:$0xff] %v1776_v9  ;;  %v1774_v16 = vmax.f32 %v1742_v58, 0.0  ;;  %v1745_v17 = vadd.f32 %v2701_v60, %v1706_v56  ;;  %v1704_v59 = vmax.f32 %v1351_v40, %v1627_v41  ;;  %v1356_v42 = vmax.f32 %v1003_v54, %v2232_v27  ;;  %v2861_v41 = vld [vmem:[#allocation9_spill] sm:$0xff] }
 0x13e   : > { %v1287_v11 = vpop.f32.mrf.mxu0  ;;  %v1640_v45 = vpop.f32.mrf.mxu1 }
 0x13f   : > { %1806 = vst [vmem:[%s2714_s23 + $0x80] sm:$0xff] %v1774_v16  ;;  %v1777_v28 = vmax.f32 %v1745_v17, 0.0  ;;  %v1743_v29 = vadd.f32 %v2701_v60, %v1704_v59  ;;  %v1709_v62 = vmax.f32 %v1356_v42, %v2268_v43  ;;  %v1354_v44 = vmax.f32 %v1001_v26, %v1287_v11  ;;  %v2862_v26 = vld [vmem:[#allocation8_spill] sm:$0xff]  ;;  %v2863_v11 = vld [vmem:[#allocation11_spill] sm:$0xff] }
 0x140   : > { %v2233_v18 = vpop.f32.mrf.mxu0  ;;  %v2269_v47 = vpop.f32.mrf.mxu1  ;;  %v1009_v27 = vmax.f32 %v2862_v26, %v2861_v41 }
 0x141   : > { %1809 = vst [vmem:[%s2714_s23 + $0x98] sm:$0xff] %v1777_v28  ;;  %v1775_v19 = vmax.f32 %v1743_v29, 0.0  ;;  %v1748_v0 = vadd.f32 %v2701_v60, %v1709_v62  ;;  %v1707_v30 = vmax.f32 %v1354_v44, %v1640_v45  ;;  %v1357_v46 = vmax.f32 %v1004_v10, %v2233_v18  ;;  %v2864_v28 = vld [vmem:[#allocation10_spill] sm:$0xff] }
 0x142   : > { %v1290_v2 = vpop.f32.mrf.mxu0  ;;  %v1643_v49 = vpop.f32.mrf.mxu1  ;;  %v1012_v29 = vmax.f32 %v2864_v28, %v2863_v11 }
 0x143   : > { %1807 = vst [vmem:[%s2714_s23 + $0x88] sm:$0xff] %v1775_v19  ;;  %v1780_v3 = vmax.f32 %v1748_v0, 0.0  ;;  %v1746_v61 = vadd.f32 %v2701_v60, %v1707_v30  ;;  %v1710_v4 = vmax.f32 %v1357_v46, %v2269_v47  ;;  %v1355_v48 = vmax.f32 %v1002_v63, %v1290_v2  ;;  %v2865_v0 = vld [vmem:[#allocation13_spill] sm:$0xff]  ;;  %v2866_v30 = vld [vmem:[#allocation12_spill] sm:$0xff] }
 0x144   : > { %v2236_v32 = vpop.f32.mrf.mxu0  ;;  %v2272_v51 = vpop.f32.mrf.mxu1  ;;  %v1010_v46 = vmax.f32 %v2866_v30, %v2865_v0 }
 0x145   : > { %1812 = vst [vmem:[%s2714_s23 + $0xb0] sm:$0xff] %v1780_v3  ;;  %v1778_v33 = vmax.f32 %v1746_v61, 0.0  ;;  %v1749_v21 = vadd.f32 %v2701_v60, %v1710_v4  ;;  %v1708_v5 = vmax.f32 %v1355_v48, %v1643_v49  ;;  %v1360_v50 = vmax.f32 %v1007_v31, %v2236_v32 }
 0x146   : > { %v1303_v34 = vpop.f32.mrf.mxu0  ;;  %v1656_v53 = vpop.f32.mrf.mxu1 }
 0x147   : > { %1810 = vst [vmem:[%s2714_s23 + $0xa0] sm:$0xff] %v1778_v33  ;;  %v1781_v35 = vmax.f32 %v1749_v21, 0.0  ;;  %v1747_v1 = vadd.f32 %v2701_v60, %v1708_v5  ;;  %v1713_v22 = vmax.f32 %v1360_v50, %v2272_v51  ;;  %v1358_v52 = vmax.f32 %v1005_v20, %v1303_v34 }
 0x148   : > { %v2237_v36 = vpop.f32.mrf.mxu0  ;;  %v2273_v24 = vpop.f32.mrf.mxu1 }
 0x149   : > { %1813 = vst [vmem:[%s2714_s23 + $0xb8] sm:$0xff] %v1781_v35  ;;  %v1779_v37 = vmax.f32 %v1747_v1, 0.0  ;;  %v1752_v7 = vadd.f32 %v2701_v60, %v1713_v22  ;;  %v1711_v14 = vmax.f32 %v1358_v52, %v1656_v53  ;;  %v1361_v15 = vmax.f32 %v1008_v57, %v2237_v36 }
 0x14a   : > { %v1306_v54 = vpop.f32.mrf.mxu0  ;;  %v1659_v40 = vpop.f32.mrf.mxu1 }
 0x14b   : > { %1811 = vst [vmem:[%s2714_s23 + $0xa8] sm:$0xff] %v1779_v37  ;;  %v1784_v8 = vmax.f32 %v1752_v7, 0.0  ;;  %v1750_v9 = vadd.f32 %v2701_v60, %v1711_v14  ;;  %v1714_v58 = vmax.f32 %v1361_v15, %v2273_v24  ;;  %v1359_v56 = vmax.f32 %v1006_v6, %v1306_v54 }
 0x14c   : > { %v2240_v16 = vpop.f32.mrf.mxu0  ;;  %v2276_v10 = vpop.f32.mrf.mxu1 }
 0x14d   : > { %1816 = vst [vmem:[%s2714_s23 + $0xd0] sm:$0xff] %v1784_v8  ;;  %v1782_v17 = vmax.f32 %v1750_v9, 0.0  ;;  %v1753_v59 = vadd.f32 %v2701_v60, %v1714_v58  ;;  %v1712_v42 = vmax.f32 %v1359_v56, %v1659_v40  ;;  %v1364_v43 = vmax.f32 %v1011_v39, %v2240_v16 }
 0x14e   : > { %v1319_v62 = vpop.f32.mrf.mxu0  ;;  %v1672_v19 = vpop.f32.mrf.mxu1 }
 0x14f   : > { %1814 = vst [vmem:[%s2714_s23 + $0xc0] sm:$0xff] %v1782_v17  ;;  %v1785_v44 = vmax.f32 %v1753_v59, 0.0  ;;  %v1751_v45 = vadd.f32 %v2701_v60, %v1712_v42  ;;  %v1717_v63 = vmax.f32 %v1364_v43, %v2276_v10  ;;  %v1362_v18 = vmax.f32 %v1009_v27, %v1319_v62 }
 0x150   : > { %v2241_v47 = vpop.f32.mrf.mxu0  ;;  %v2277_v4 = vpop.f32.mrf.mxu1 }
 0x151   : > { %1817 = vst [vmem:[%s2714_s23 + $0xd8] sm:$0xff] %v1785_v44  ;;  %v1783_v31 = vmax.f32 %v1751_v45, 0.0  ;;  %v1756_v2 = vadd.f32 %v2701_v60, %v1717_v63  ;;  %v1715_v3 = vmax.f32 %v1362_v18, %v1672_v19  ;;  %v1365_v61 = vmax.f32 %v1012_v29, %v2241_v47 }
 0x152   : > { %v1322_v48 = vpop.f32.mrf.mxu0  ;;  %v1675_v21 = vpop.f32.mrf.mxu1 }
 0x153   : > { %1815 = vst [vmem:[%s2714_s23 + $0xc8] sm:$0xff] %v1783_v31  ;;  %v1788_v49 = vmax.f32 %v1756_v2, 0.0  ;;  %v1754_v20 = vadd.f32 %v2701_v60, %v1715_v3  ;;  %v1718_v32 = vmax.f32 %v1365_v61, %v2277_v4  ;;  %v1363_v33 = vmax.f32 %v1010_v46, %v1322_v48 }
 0x155   : > { %1820 = vst [vmem:[%s2714_s23 + $0xf0] sm:$0xff] %v1788_v49  ;;  %v1786_v5 = vmax.f32 %v1754_v20, 0.0  ;;  %v1757_v50 = vadd.f32 %v2701_v60, %v1718_v32  ;;  %v1716_v51 = vmax.f32 %v1363_v33, %v1675_v21 }
 0x157   : > { %1818 = vst [vmem:[%s2714_s23 + $0xe0] sm:$0xff] %v1786_v5  ;;  %v1789_v12 = vmax.f32 %v1757_v50, 0.0  ;;  %v1755_v13 = vadd.f32 %v2701_v60, %v1716_v51 }
 0x159   : > { %1821 = vst [vmem:[%s2714_s23 + $0xf8] sm:$0xff] %v1789_v12  ;;  %v1787_v57 = vmax.f32 %v1755_v13, 0.0 }
 0x15b   : > { %1819 = vst [vmem:[%s2714_s23 + $0xe8] sm:$0xff] %v1787_v57 }
 0x15c PF: > { %s16_s21 = sadd.s32 1, %s2358_s21  }
 0x15d   : > { %p13_p4 = scmp.ge.s32.totalorder %s16_s21, 4  }
 0x15f   :  { %15 = sbr.rel (!%p13_p4) target bundleno = 1 (0x1), region = 83 }

// kernel: alexnet_forward.7
= control target key start
LH: loop header
LB: loop body
LE: loop exit
PB: predicated region body
PF: predicated region fallthrough
CT: control target
= control target key end

     0   :  { %vm112_vm0 = vcmask 523264   ;;  %s1431_s4 = inlined_call_operand.vmem [shape: bf16[64,128], index: 4, kind: input, shape index: {}]   ;;  %s1432_s0 = inlined_call_operand.vmem [shape: bf16[128,64], index: 0, kind: input, shape index: {}]   ;;  %s1433_s1 = inlined_call_operand.vmem [shape: bf16[128,64], index: 1, kind: input, shape index: {}]   ;;  %s1434_s2 = inlined_call_operand.vmem [shape: bf16[128,64], index: 2, kind: input, shape index: {}]   ;;  %s1435_s3 = inlined_call_operand.vmem [shape: bf16[128,64], index: 3, kind: input, shape index: {}]   ;;  %s1436_s5 = inlined_call_operand.vmem [shape: f32[1,128], index: 5, kind: input, shape index: {}]   ;;  %s1437_s6 = inlined_call_operand.vmem [shape: f32[128,128], index: 6, kind: output, shape index: {}]  }
   0x1   :  { %v1085_v0 = vld [vmem:[%s1431_s4 + $0x18] sm:$0xff]   ;;  %v1086_v1 = vld [vmem:[%s1431_s4 + $0x10] sm:$0xff]   ;;  %v1087_v2 = vld [vmem:[%s1431_s4 + $0x8] sm:$0xff]  }
   0x2   :  { %989 = vmatprep.subr.bf16.mxu0 %v1085_v0  ;;  %1013 = vmatprep.subr.bf16.mxu1 %v1085_v0  ;;  %v1089_v3 = vld [vmem:[%s1432_s0] sm:$0xff]   ;;  %v1091_v6 = vld [vmem:[%s1432_s0 + $0x8] sm:$0xff]   ;;  %v1093_v8 = vld [vmem:[%s1432_s0 + $0x10] sm:$0xff]  }
   0x3   :  { %990 = vmatpush3.bf16.msra.mxu0 %v1085_v0  ;;  %1014 = vmatpush3.bf16.msra.mxu1 %v1085_v0  ;;  %v1090_v4 = vld [vmem:[%s1433_s1] sm:$0xff]   ;;  %v1092_v7 = vld [vmem:[%s1433_s1 + $0x8] sm:$0xff]   ;;  %v1094_v9 = vld [vmem:[%s1433_s1 + $0x10] sm:$0xff]  }
   0x4   :  { %991 = vmatprep.subr.bf16.mxu0 %v1086_v1  ;;  %1015 = vmatprep.subr.bf16.mxu1 %v1086_v1  ;;  %v1088_v5 = vld [vmem:[%s1431_s4] sm:$0xff]   ;;  %v1095_v10 = vld [vmem:[%s1432_s0 + $0x18] sm:$0xff]   ;;  %v1099_v14 = vld [vmem:[%s1432_s0 + $0x28] sm:$0xff]  }
   0x5   :  { %997 = vmatprep.mubr.msk.bf16.mxu0 %vm112_vm0, %v1089_v3  ;;  %1021 = vmatprep.mubr.msk.bf16.mxu1 %vm112_vm0, %v1090_v4  ;;  %v1096_v11 = vld [vmem:[%s1433_s1 + $0x18] sm:$0xff]   ;;  %v1097_v12 = vld [vmem:[%s1432_s0 + $0x20] sm:$0xff]   ;;  %v1100_v15 = vld [vmem:[%s1433_s1 + $0x28] sm:$0xff]  }
   0x6   :  { %v1098_v13 = vld [vmem:[%s1433_s1 + $0x20] sm:$0xff]   ;;  %v1101_v16 = vld [vmem:[%s1432_s0 + $0x30] sm:$0xff]   ;;  %v1103_v18 = vld [vmem:[%s1432_s0 + $0x38] sm:$0xff]  }
   0x7   :  { %992 = vmatpush3.bf16.msra.mxu0 %v1086_v1  ;;  %1016 = vmatpush3.bf16.msra.mxu1 %v1086_v1  ;;  %v1102_v17 = vld [vmem:[%s1433_s1 + $0x30] sm:$0xff]   ;;  %v1104_v19 = vld [vmem:[%s1433_s1 + $0x38] sm:$0xff]   ;;  %v1105_v20 = vld [vmem:[%s1434_s2] sm:$0xff]  }
   0x8   :  { %993 = vmatprep.subr.bf16.mxu0 %v1087_v2  ;;  %1017 = vmatprep.subr.bf16.mxu1 %v1087_v2  ;;  %v1106_v21 = vld [vmem:[%s1435_s3] sm:$0xff]   ;;  %v1107_v22 = vld [vmem:[%s1434_s2 + $0x8] sm:$0xff]   ;;  %v1109_v24 = vld [vmem:[%s1434_s2 + $0x10] sm:$0xff]  }
   0x9   :  { %v1108_v23 = vld [vmem:[%s1435_s3 + $0x8] sm:$0xff]   ;;  %v1110_v25 = vld [vmem:[%s1435_s3 + $0x10] sm:$0xff]   ;;  %v1111_v26 = vld [vmem:[%s1434_s2 + $0x18] sm:$0xff]  }
   0xa   :  { %v1112_v27 = vld [vmem:[%s1435_s3 + $0x18] sm:$0xff]   ;;  %v1113_v28 = vld [vmem:[%s1434_s2 + $0x20] sm:$0xff]   ;;  %v1115_v30 = vld [vmem:[%s1434_s2 + $0x28] sm:$0xff]  }
   0xb   :  { %994 = vmatpush3.bf16.msra.mxu0 %v1087_v2  ;;  %1018 = vmatpush3.bf16.msra.mxu1 %v1087_v2  ;;  %v1114_v29 = vld [vmem:[%s1435_s3 + $0x20] sm:$0xff]   ;;  %v1116_v31 = vld [vmem:[%s1435_s3 + $0x28] sm:$0xff]   ;;  %v1117_v32 = vld [vmem:[%s1434_s2 + $0x30] sm:$0xff]  }
   0xc   :  { %995 = vmatprep.subr.bf16.mxu0 %v1088_v5  ;;  %1019 = vmatprep.subr.bf16.mxu1 %v1088_v5  ;;  %v1118_v33 = vld [vmem:[%s1435_s3 + $0x30] sm:$0xff]   ;;  %v1119_v34 = vld [vmem:[%s1434_s2 + $0x38] sm:$0xff]  }
   0xd   :  { %v1120_v35 = vld [vmem:[%s1435_s3 + $0x38] sm:$0xff]  }
   0xf   :  { %996 = vmatpush3.bf16.msra.mxu0 %v1088_v5  ;;  %1020 = vmatpush3.bf16.msra.mxu1 %v1088_v5 }
  0x10   :  { %1037 = vmatprep.subr.bf16.mxu0 %v1085_v0  ;;  %1061 = vmatprep.subr.bf16.mxu1 %v1085_v0 }
  0x12   :  { %998 = vmatmul.mubr.msk.bf16.vlgmr.msra.gmra.mxu0 %vm112_vm0, %v1091_v6  ;;  %1022 = vmatmul.mubr.msk.bf16.vlgmr.msra.gmra.mxu1 %vm112_vm0, %v1092_v7 }
  0x13   :  { %1038 = vmatpush3.bf16.msra.mxu0 %v1085_v0  ;;  %1062 = vmatpush3.bf16.msra.mxu1 %v1085_v0 }
  0x14   :  { %1001 = vmatprep.mubr.msk.bf16.mxu0 %vm112_vm0, %v1093_v8  ;;  %1025 = vmatprep.mubr.msk.bf16.mxu1 %vm112_vm0, %v1094_v9  ;;  %v1343_v9 = vld [vmem:[%s1436_s5] ss:$0 sm:$0xff] }
  0x15   :  { %1039 = vmatprep.subr.bf16.mxu0 %v1086_v1  ;;  %1063 = vmatprep.subr.bf16.mxu1 %v1086_v1 }
  0x17   :  { %1040 = vmatpush3.bf16.msra.mxu0 %v1086_v1  ;;  %1064 = vmatpush3.bf16.msra.mxu1 %v1086_v1 }
  0x18   :  { %1041 = vmatprep.subr.bf16.mxu0 %v1087_v2  ;;  %1065 = vmatprep.subr.bf16.mxu1 %v1087_v2 }
  0x1a   :  { %1002 = vmatmul.mubr.msk.bf16.gmra.mxu0 %vm112_vm0, %v1095_v10  ;;  %1026 = vmatmul.mubr.msk.bf16.gmra.mxu1 %vm112_vm0, %v1096_v11 }
  0x1b   :  { %1005 = vmatprep.mubr.msk.bf16.mxu0 %vm112_vm0, %v1097_v12  ;;  %1029 = vmatprep.mubr.msk.bf16.mxu1 %vm112_vm0, %v1098_v13 }
  0x1c   :  { %1042 = vmatpush3.bf16.msra.mxu0 %v1087_v2  ;;  %1066 = vmatpush3.bf16.msra.mxu1 %v1087_v2 }
  0x1d   :  { %1043 = vmatprep.subr.bf16.mxu0 %v1088_v5  ;;  %1067 = vmatprep.subr.bf16.mxu1 %v1088_v5 }
  0x20   :  { %1044 = vmatpush3.bf16.msra.mxu0 %v1088_v5  ;;  %1068 = vmatpush3.bf16.msra.mxu1 %v1088_v5 }
  0x22   :  { %1006 = vmatmul.mubr.msk.bf16.gmra.mxu0 %vm112_vm0, %v1099_v14  ;;  %1030 = vmatmul.mubr.msk.bf16.gmra.mxu1 %vm112_vm0, %v1100_v15 }
  0x23   :  { %1009 = vmatprep.mubr.msk.bf16.mxu0 %vm112_vm0, %v1101_v16  ;;  %1033 = vmatprep.mubr.msk.bf16.mxu1 %vm112_vm0, %v1102_v17 }
  0x2a   :  { %1010 = vmatmul.mubr.msk.bf16.gmra.mxu0 %vm112_vm0, %v1103_v18  ;;  %1034 = vmatmul.mubr.msk.bf16.gmra.mxu1 %vm112_vm0, %v1104_v19 }
  0x2b   :  { %1045 = vmatprep.mubr.msk.bf16.mxu0 %vm112_vm0, %v1105_v20  ;;  %1069 = vmatprep.mubr.msk.bf16.mxu1 %vm112_vm0, %v1106_v21 }
  0x32   :  { %1046 = vmatmul.mubr.msk.bf16.vlgmr.msra.gmra.mxu0 %vm112_vm0, %v1107_v22  ;;  %1070 = vmatmul.mubr.msk.bf16.vlgmr.msra.gmra.mxu1 %vm112_vm0, %v1108_v23 }
  0x33   :  { %1049 = vmatprep.mubr.msk.bf16.mxu0 %vm112_vm0, %v1109_v24  ;;  %1073 = vmatprep.mubr.msk.bf16.mxu1 %vm112_vm0, %v1110_v25 }
  0x3a   :  { %1050 = vmatmul.mubr.msk.bf16.gmra.mxu0 %vm112_vm0, %v1111_v26  ;;  %1074 = vmatmul.mubr.msk.bf16.gmra.mxu1 %vm112_vm0, %v1112_v27 }
  0x3b   :  { %1053 = vmatprep.mubr.msk.bf16.mxu0 %vm112_vm0, %v1113_v28  ;;  %1077 = vmatprep.mubr.msk.bf16.mxu1 %vm112_vm0, %v1114_v29 }
  0x42   :  { %1054 = vmatmul.mubr.msk.bf16.gmra.mxu0 %vm112_vm0, %v1115_v30  ;;  %1078 = vmatmul.mubr.msk.bf16.gmra.mxu1 %vm112_vm0, %v1116_v31 }
  0x43   :  { %1057 = vmatprep.mubr.msk.bf16.mxu0 %vm112_vm0, %v1117_v32  ;;  %1081 = vmatprep.mubr.msk.bf16.mxu1 %vm112_vm0, %v1118_v33 }
  0x4a   :  { %1058 = vmatmul.mubr.msk.bf16.gmra.mxu0 %vm112_vm0, %v1119_v34  ;;  %1082 = vmatmul.mubr.msk.bf16.gmra.mxu1 %vm112_vm0, %v1120_v35 }
  0xd2   :  { %v999_v36 = vpop.f32.mrf.mxu0  ;;  %v1023_v37 = vpop.f32.mrf.mxu1 }
  0xd3   :  { %v413_v4 = vmax.f32 %v999_v36, %v1023_v37 }
  0xd4   :  { %v171_v38 = vpop.f32.mrf.mxu0  ;;  %v348_v39 = vpop.f32.mrf.mxu1 }
  0xd5   :  { %v411_v7 = vmax.f32 %v171_v38, %v348_v39 }
  0xd6   :  { %v1000_v40 = vpop.f32.mrf.mxu0  ;;  %v1024_v41 = vpop.f32.mrf.mxu1 }
  0xd7   :  { %v414_v12 = vmax.f32 %v1000_v40, %v1024_v41 }
  0xd8   :  { %v174_v42 = vpop.f32.mrf.mxu0  ;;  %v351_v43 = vpop.f32.mrf.mxu1 }
  0xd9   :  { %v412_v17 = vmax.f32 %v174_v42, %v351_v43 }
  0xda   :  { %v1003_v44 = vpop.f32.mrf.mxu0  ;;  %v1027_v45 = vpop.f32.mrf.mxu1 }
  0xdb   :  { %v417_v21 = vmax.f32 %v1003_v44, %v1027_v45 }
  0xdc   :  { %v1296_v46 = vpop.f32.mrf.mxu0  ;;  %v1298_v47 = vpop.f32.mrf.mxu1 }
  0xdd   :  { %v415_v28 = vmax.f32 %v1296_v46, %v1298_v47 }
  0xde   :  { %v1300_v48 = vpop.f32.mrf.mxu0  ;;  %v1302_v49 = vpop.f32.mrf.mxu1 }
  0xdf   :  { %v418_v35 = vmax.f32 %v1300_v48, %v1302_v49 }
  0xe0   :  { %v1304_v50 = vpop.f32.mrf.mxu0  ;;  %v1306_v51 = vpop.f32.mrf.mxu1 }
  0xe1   :  { %v416_v42 = vmax.f32 %v1304_v50, %v1306_v51 }
  0xe2   :  { %v1308_v52 = vpop.f32.mrf.mxu0  ;;  %v1310_v53 = vpop.f32.mrf.mxu1 }
  0xe3   :  { %v421_v49 = vmax.f32 %v1308_v52, %v1310_v53 }
  0xe4   :  { %v1312_v54 = vpop.f32.mrf.mxu0  ;;  %v1314_v55 = vpop.f32.mrf.mxu1 }
  0xe6   :  { %v1316_v56 = vpop.f32.mrf.mxu0  ;;  %v1318_v57 = vpop.f32.mrf.mxu1 }
  0xe8   :  { %v1320_v58 = vpop.f32.mrf.mxu0  ;;  %v1322_v59 = vpop.f32.mrf.mxu1 }
  0xea   :  { %v1324_v60 = vpop.f32.mrf.mxu0  ;;  %v1326_v61 = vpop.f32.mrf.mxu1 }
  0xec   :  { %v1328_v62 = vpop.f32.mrf.mxu0  ;;  %v1330_v63 = vpop.f32.mrf.mxu1 }
  0xee   :  { %v1332_v0 = vpop.f32.mrf.mxu0  ;;  %v1334_v1 = vpop.f32.mrf.mxu1 }
  0xf0   :  { %v1336_v2 = vpop.f32.mrf.mxu0  ;;  %v1338_v3 = vpop.f32.mrf.mxu1 }
  0xf2   :  { %v1047_v5 = vpop.f32.mrf.mxu0  ;;  %v1071_v6 = vpop.f32.mrf.mxu1 }
  0xf3   :  { %v606_v8 = vmax.f32 %v413_v4, %v1047_v5 }
  0xf4   :  { %v541_v10 = vpop.f32.mrf.mxu0  ;;  %v734_v11 = vpop.f32.mrf.mxu1 }
  0xf5   :  { %v799_v13 = vmax.f32 %v606_v8, %v1071_v6  ;;  %v604_v14 = vmax.f32 %v411_v7, %v541_v10  ;;  %v419_v8 = vmax.f32 %v1312_v54, %v1314_v55 }
  0xf6   :  { %v1048_v15 = vpop.f32.mrf.mxu0  ;;  %v1072_v16 = vpop.f32.mrf.mxu1 }
  0xf7   :  { %v822_v18 = vadd.f32 %v1343_v9, %v799_v13  ;;  %v797_v19 = vmax.f32 %v604_v14, %v734_v11  ;;  %v607_v20 = vmax.f32 %v414_v12, %v1048_v15  ;;  %v422_v14 = vmax.f32 %v1316_v56, %v1318_v57 }
  0xf8   :  { %v544_v22 = vpop.f32.mrf.mxu0  ;;  %v737_v23 = vpop.f32.mrf.mxu1 }
  0xf9   :  { %v838_v24 = vmax.f32 %v822_v18, 0.0  ;;  %v820_v25 = vadd.f32 %v1343_v9, %v797_v19  ;;  %v800_v26 = vmax.f32 %v607_v20, %v1072_v16  ;;  %v605_v27 = vmax.f32 %v412_v17, %v544_v22 }
  0xfa   :  { %v1051_v29 = vpop.f32.mrf.mxu0  ;;  %v1075_v30 = vpop.f32.mrf.mxu1  ;;  %v420_v19 = vmax.f32 %v1320_v58, %v1322_v59 }
  0xfb   :  { %854 = vst [vmem:[%s1437_s6 + $0x10] sm:$0xff] %v838_v24  ;;  %v836_v31 = vmax.f32 %v820_v25, 0.0  ;;  %v823_v32 = vadd.f32 %v1343_v9, %v800_v26  ;;  %v798_v33 = vmax.f32 %v605_v27, %v737_v23  ;;  %v610_v34 = vmax.f32 %v417_v21, %v1051_v29 }
  0xfc   :  { %v557_v36 = vpop.f32.mrf.mxu0  ;;  %v750_v37 = vpop.f32.mrf.mxu1  ;;  %v425_v24 = vmax.f32 %v1324_v60, %v1326_v61  ;;  %v423_v29 = vmax.f32 %v1328_v62, %v1330_v63 }
  0xfd   :  { %852 = vst [vmem:[%s1437_s6] sm:$0xff] %v836_v31  ;;  %v839_v38 = vmax.f32 %v823_v32, 0.0  ;;  %v821_v39 = vadd.f32 %v1343_v9, %v798_v33  ;;  %v803_v40 = vmax.f32 %v610_v34, %v1075_v30  ;;  %v608_v41 = vmax.f32 %v415_v28, %v557_v36 }
  0xfe   :  { %v1052_v43 = vpop.f32.mrf.mxu0  ;;  %v1076_v44 = vpop.f32.mrf.mxu1  ;;  %v426_v34 = vmax.f32 %v1332_v0, %v1334_v1 }
  0xff   :  { %855 = vst [vmem:[%s1437_s6 + $0x18] sm:$0xff] %v839_v38  ;;  %v837_v45 = vmax.f32 %v821_v39, 0.0  ;;  %v826_v46 = vadd.f32 %v1343_v9, %v803_v40  ;;  %v801_v47 = vmax.f32 %v608_v41, %v750_v37  ;;  %v611_v48 = vmax.f32 %v418_v35, %v1052_v43 }
 0x100   :  { %v560_v4 = vpop.f32.mrf.mxu0  ;;  %v753_v5 = vpop.f32.mrf.mxu1  ;;  %v424_v39 = vmax.f32 %v1336_v2, %v1338_v3 }
 0x101   :  { %853 = vst [vmem:[%s1437_s6 + $0x8] sm:$0xff] %v837_v45  ;;  %v842_v50 = vmax.f32 %v826_v46, 0.0  ;;  %v824_v51 = vadd.f32 %v1343_v9, %v801_v47  ;;  %v804_v6 = vmax.f32 %v611_v48, %v1076_v44  ;;  %v609_v7 = vmax.f32 %v416_v42, %v560_v4 }
 0x102   :  { %v1055_v10 = vpop.f32.mrf.mxu0  ;;  %v1079_v11 = vpop.f32.mrf.mxu1 }
 0x103   :  { %858 = vst [vmem:[%s1437_s6 + $0x30] sm:$0xff] %v842_v50  ;;  %v840_v52 = vmax.f32 %v824_v51, 0.0  ;;  %v827_v53 = vadd.f32 %v1343_v9, %v804_v6  ;;  %v802_v12 = vmax.f32 %v609_v7, %v753_v5  ;;  %v614_v13 = vmax.f32 %v421_v49, %v1055_v10 }
 0x104   :  { %v573_v15 = vpop.f32.mrf.mxu0  ;;  %v766_v16 = vpop.f32.mrf.mxu1 }
 0x105   :  { %856 = vst [vmem:[%s1437_s6 + $0x20] sm:$0xff] %v840_v52  ;;  %v843_v54 = vmax.f32 %v827_v53, 0.0  ;;  %v825_v55 = vadd.f32 %v1343_v9, %v802_v12  ;;  %v807_v17 = vmax.f32 %v614_v13, %v1079_v11  ;;  %v612_v18 = vmax.f32 %v419_v8, %v573_v15 }
 0x106   :  { %v1056_v20 = vpop.f32.mrf.mxu0  ;;  %v1080_v21 = vpop.f32.mrf.mxu1 }
 0x107   :  { %859 = vst [vmem:[%s1437_s6 + $0x38] sm:$0xff] %v843_v54  ;;  %v841_v56 = vmax.f32 %v825_v55, 0.0  ;;  %v830_v57 = vadd.f32 %v1343_v9, %v807_v17  ;;  %v805_v22 = vmax.f32 %v612_v18, %v766_v16  ;;  %v615_v23 = vmax.f32 %v422_v14, %v1056_v20 }
 0x108   :  { %v576_v25 = vpop.f32.mrf.mxu0  ;;  %v769_v26 = vpop.f32.mrf.mxu1 }
 0x109   :  { %857 = vst [vmem:[%s1437_s6 + $0x28] sm:$0xff] %v841_v56  ;;  %v846_v58 = vmax.f32 %v830_v57, 0.0  ;;  %v828_v59 = vadd.f32 %v1343_v9, %v805_v22  ;;  %v808_v27 = vmax.f32 %v615_v23, %v1080_v21  ;;  %v613_v28 = vmax.f32 %v420_v19, %v576_v25 }
 0x10a   :  { %v1059_v30 = vpop.f32.mrf.mxu0  ;;  %v1083_v31 = vpop.f32.mrf.mxu1 }
 0x10b   :  { %862 = vst [vmem:[%s1437_s6 + $0x50] sm:$0xff] %v846_v58  ;;  %v844_v60 = vmax.f32 %v828_v59, 0.0  ;;  %v831_v61 = vadd.f32 %v1343_v9, %v808_v27  ;;  %v806_v32 = vmax.f32 %v613_v28, %v769_v26  ;;  %v618_v33 = vmax.f32 %v425_v24, %v1059_v30 }
 0x10c   :  { %v589_v35 = vpop.f32.mrf.mxu0  ;;  %v782_v36 = vpop.f32.mrf.mxu1 }
 0x10d   :  { %860 = vst [vmem:[%s1437_s6 + $0x40] sm:$0xff] %v844_v60  ;;  %v847_v62 = vmax.f32 %v831_v61, 0.0  ;;  %v829_v63 = vadd.f32 %v1343_v9, %v806_v32  ;;  %v811_v37 = vmax.f32 %v618_v33, %v1083_v31  ;;  %v616_v38 = vmax.f32 %v423_v29, %v589_v35 }
 0x10e   :  { %v1060_v40 = vpop.f32.mrf.mxu0  ;;  %v1084_v41 = vpop.f32.mrf.mxu1 }
 0x10f   :  { %863 = vst [vmem:[%s1437_s6 + $0x58] sm:$0xff] %v847_v62  ;;  %v845_v0 = vmax.f32 %v829_v63, 0.0  ;;  %v834_v1 = vadd.f32 %v1343_v9, %v811_v37  ;;  %v809_v42 = vmax.f32 %v616_v38, %v782_v36  ;;  %v619_v43 = vmax.f32 %v426_v34, %v1060_v40 }
 0x110   :  { %v592_v44 = vpop.f32.mrf.mxu0  ;;  %v785_v47 = vpop.f32.mrf.mxu1 }
 0x111   :  { %861 = vst [vmem:[%s1437_s6 + $0x48] sm:$0xff] %v845_v0  ;;  %v850_v45 = vmax.f32 %v834_v1, 0.0  ;;  %v832_v46 = vadd.f32 %v1343_v9, %v809_v42  ;;  %v812_v2 = vmax.f32 %v619_v43, %v1084_v41  ;;  %v617_v3 = vmax.f32 %v424_v39, %v592_v44 }
 0x113   :  { %866 = vst [vmem:[%s1437_s6 + $0x70] sm:$0xff] %v850_v45  ;;  %v848_v48 = vmax.f32 %v832_v46, 0.0  ;;  %v835_v49 = vadd.f32 %v1343_v9, %v812_v2  ;;  %v810_v4 = vmax.f32 %v617_v3, %v785_v47 }
 0x115   :  { %864 = vst [vmem:[%s1437_s6 + $0x60] sm:$0xff] %v848_v48  ;;  %v851_v5 = vmax.f32 %v835_v49, 0.0  ;;  %v833_v50 = vadd.f32 %v1343_v9, %v810_v4 }
 0x117   :  { %867 = vst [vmem:[%s1437_s6 + $0x78] sm:$0xff] %v851_v5  ;;  %v849_v51 = vmax.f32 %v833_v50, 0.0 }
 0x119   :  { %865 = vst [vmem:[%s1437_s6 + $0x68] sm:$0xff] %v849_v51 }

// kernel: alexnet_forward.8
= control target key start
LH: loop header
LB: loop body
LE: loop exit
PB: predicated region body
PF: predicated region fallthrough
CT: control target
= control target key end

     0   :  { %v426_v0 = vmov 0   ;;  %vm182_vm0 = vcmask 130048   ;;  %s599_s1 = inlined_call_operand.vmem [shape: bf16[144,128], index: 1, kind: input, shape index: {}]   ;;  %s600_s0 = inlined_call_operand.vmem [shape: bf16[128,144], index: 0, kind: input, shape index: {}]   ;;  %s601_s2 = inlined_call_operand.vmem [shape: f32[1,128], index: 2, kind: input, shape index: {}]   ;;  %s602_s3 = inlined_call_operand.vmem [shape: f32[128,128], index: 3, kind: output, shape index: {}]  }
   0x1   :  { %207 = vmatprep.subr.bf16.mxu0 %v426_v0  ;;  %374 = vmatprep.subr.bf16.mxu1 %v426_v0  ;;  %v393_v1 = vld [vmem:[%s599_s1 + $0x38] sm:$0xff]   ;;  %v394_v2 = vld [vmem:[%s599_s1 + $0x30] sm:$0xff]   ;;  %v395_v3 = vld [vmem:[%s599_s1 + $0x28] sm:$0xff]  }
   0x2   :  { %208 = vmatpush1.bf16.msra.mxu0 %v393_v1  ;;  %383 = vmatpush1.bf16.msra.mxu1 %v393_v1  ;;  %v396_v4 = vld [vmem:[%s599_s1 + $0x20] sm:$0xff]   ;;  %v397_v7 = vld [vmem:[%s599_s1 + $0x18] sm:$0xff]   ;;  %v398_v8 = vld [vmem:[%s599_s1 + $0x10] sm:$0xff]  }
   0x3   :  { %209 = vmatprep.subr.bf16.mxu0 %v426_v0  ;;  %375 = vmatprep.subr.bf16.mxu1 %v426_v0  ;;  %v404_v5 = vld [vmem:[%s600_s0 + $0x4] ss:$8 sps:$4 sm:$0xff]   ;;  %v402_v12 = vld [vmem:[%s600_s0] ss:$8 sps:$4 sm:$0xff]   ;;  %v408_v14 = vld [vmem:[%s600_s0 + $0x14] ss:$8 sps:$4 sm:$0xff]  }
   0x4   :  { %v407_v6 = vld [vmem:[%s600_s0 + $0x44] ss:$8 sps:$4 sm:$0xff]   ;;  %366 = vmatprep.mubr.msk.bf16.mxu0 %vm182_vm0, %v404_v5  ;;  %v405_v13 = vld [vmem:[%s600_s0 + $0x40] ss:$8 sps:$4 sm:$0xff]   ;;  %v410_v15 = vld [vmem:[%s600_s0 + $0x54] ss:$8 sps:$4 sm:$0xff]  }
   0x5   :  { %370 = vmatprep.mubr.msk.bf16.mxu1 %vm182_vm0, %v407_v6  ;;  %v399_v9 = vld [vmem:[%s599_s1 + $0x8] sm:$0xff]   ;;  %v400_v10 = vld [vmem:[%s599_s1] sm:$0xff]   ;;  %v412_v16 = vld [vmem:[%s600_s0 + $0x10] ss:$8 sps:$4 sm:$0xff]  }
   0x6   :  { %210 = vmatpush1.bf16.msra.mxu0 %v394_v2  ;;  %384 = vmatpush1.bf16.msra.mxu1 %v394_v2  ;;  %v401_v11 = vld [vmem:[%s599_s1 + $0x40] sm:$0xff]   ;;  %v413_v17 = vld [vmem:[%s600_s0 + $0x50] ss:$8 sps:$4 sm:$0xff]   ;;  %v420_v22 = vld [vmem:[%s600_s0 + $0x34] ss:$8 sps:$4 sm:$0xff]  }
   0x7   :  { %211 = vmatprep.subr.bf16.mxu0 %v426_v0  ;;  %376 = vmatprep.subr.bf16.mxu1 %v426_v0  ;;  %v414_v18 = vld [vmem:[%s600_s0 + $0x24] ss:$8 sps:$4 sm:$0xff]   ;;  %v418_v20 = vld [vmem:[%s600_s0 + $0x20] ss:$8 sps:$4 sm:$0xff]   ;;  %v422_v23 = vld [vmem:[%s600_s0 + $0x74] ss:$8 sps:$4 sm:$0xff]  }
   0x8   :  { %v416_v19 = vld [vmem:[%s600_s0 + $0x64] ss:$8 sps:$4 sm:$0xff]   ;;  %v419_v21 = vld [vmem:[%s600_s0 + $0x60] ss:$8 sps:$4 sm:$0xff]   ;;  %v424_v24 = vld [vmem:[%s600_s0 + $0x30] ss:$8 sps:$4 sm:$0xff]  }
   0x9   :  { %v425_v25 = vld [vmem:[%s600_s0 + $0x70] ss:$8 sps:$4 sm:$0xff]   ;;  %v533_v26 = vld [vmem:[%s601_s2] ss:$0 sm:$0xff] }
   0xa   :  { %212 = vmatpush1.bf16.msra.mxu0 %v395_v3  ;;  %385 = vmatpush1.bf16.msra.mxu1 %v395_v3 }
   0xb   :  { %213 = vmatprep.subr.bf16.mxu0 %v426_v0  ;;  %377 = vmatprep.subr.bf16.mxu1 %v426_v0 }
   0xe   :  { %214 = vmatpush1.bf16.msra.mxu0 %v396_v4  ;;  %386 = vmatpush1.bf16.msra.mxu1 %v396_v4 }
   0xf   :  { %215 = vmatprep.subr.bf16.mxu0 %v426_v0  ;;  %378 = vmatprep.subr.bf16.mxu1 %v426_v0 }
  0x12   :  { %216 = vmatpush1.bf16.msra.mxu0 %v397_v7  ;;  %387 = vmatpush1.bf16.msra.mxu1 %v397_v7 }
  0x13   :  { %217 = vmatprep.subr.bf16.mxu0 %v426_v0  ;;  %379 = vmatprep.subr.bf16.mxu1 %v426_v0 }
  0x16   :  { %218 = vmatpush1.bf16.msra.mxu0 %v398_v8  ;;  %388 = vmatpush1.bf16.msra.mxu1 %v398_v8 }
  0x17   :  { %219 = vmatprep.subr.bf16.mxu0 %v426_v0  ;;  %380 = vmatprep.subr.bf16.mxu1 %v426_v0 }
  0x1a   :  { %220 = vmatpush1.bf16.msra.mxu0 %v399_v9  ;;  %389 = vmatpush1.bf16.msra.mxu1 %v399_v9 }
  0x1b   :  { %221 = vmatprep.subr.bf16.mxu0 %v426_v0  ;;  %381 = vmatprep.subr.bf16.mxu1 %v426_v0 }
  0x1e   :  { %222 = vmatpush1.bf16.msra.mxu0 %v400_v10  ;;  %390 = vmatpush1.bf16.msra.mxu1 %v400_v10 }
  0x1f   :  { %237 = vmatprep.subr.bf16.mxu0 %v426_v0  ;;  %382 = vmatprep.subr.bf16.mxu1 %v426_v0 }
  0x22   :  { %238 = vmatpush2.bf16.msra.mxu0 %v401_v11  ;;  %391 = vmatpush2.bf16.msra.mxu1 %v401_v11 }
  0x25   :  { %240 = vmatmul.mubr.bf16.vlgmr.msra.gmra.mxu0 %v402_v12  ;;  %272 = vmatmul.mubr.bf16.vlgmr.msra.gmra.mxu1 %v405_v13 }
  0x26   :  { %367 = vmatprep.mubr.msk.bf16.mxu0 %vm182_vm0, %v408_v14  ;;  %371 = vmatprep.mubr.msk.bf16.mxu1 %vm182_vm0, %v410_v15 }
  0x2d   :  { %248 = vmatmul.mubr.bf16.gmra.mxu0 %v412_v16  ;;  %280 = vmatmul.mubr.bf16.gmra.mxu1 %v413_v17 }
  0x2e   :  { %368 = vmatprep.mubr.msk.bf16.mxu0 %vm182_vm0, %v414_v18  ;;  %372 = vmatprep.mubr.msk.bf16.mxu1 %vm182_vm0, %v416_v19 }
  0x35   :  { %256 = vmatmul.mubr.bf16.gmra.mxu0 %v418_v20  ;;  %288 = vmatmul.mubr.bf16.gmra.mxu1 %v419_v21 }
  0x36   :  { %369 = vmatprep.mubr.msk.bf16.mxu0 %vm182_vm0, %v420_v22  ;;  %373 = vmatprep.mubr.msk.bf16.mxu1 %vm182_vm0, %v422_v23 }
  0x3d   :  { %264 = vmatmul.mubr.bf16.gmra.mxu0 %v424_v24  ;;  %296 = vmatmul.mubr.bf16.gmra.mxu1 %v425_v25 }
  0xe5   :  { %v241_v27 = vpop.f32.mrf.mxu0  ;;  %v273_v28 = vpop.f32.mrf.mxu1 }
  0xe6   :  { %v242_v29 = vadd.f32 %v533_v26, %v241_v27  ;;  %v274_v30 = vadd.f32 %v533_v26, %v273_v28 }
  0xe7   :  { %v243_v31 = vpop.f32.mrf.mxu0  ;;  %v275_v32 = vpop.f32.mrf.mxu1 }
  0xe8   :  { %v304_v33 = vmax.f32 %v242_v29, 0.0  ;;  %v312_v34 = vmax.f32 %v274_v30, 0.0 }
  0xe9   :  { %v244_v35 = vpop.f32.mrf.mxu0  ;;  %v276_v36 = vpop.f32.mrf.mxu1 }
  0xea   :  { %320 = vst [vmem:[%s602_s3] sm:$0xff] %v304_v33  ;;  %328 = vst [vmem:[%s602_s3 + $0x40] sm:$0xff] %v312_v34  ;;  %v245_v37 = vadd.f32 %v533_v26, %v244_v35  ;;  %v277_v38 = vadd.f32 %v533_v26, %v276_v36 }
  0xeb   :  { %v246_v39 = vpop.f32.mrf.mxu0  ;;  %v278_v40 = vpop.f32.mrf.mxu1 }
  0xec   :  { %v305_v41 = vmax.f32 %v245_v37, 0.0  ;;  %v313_v42 = vmax.f32 %v277_v38, 0.0 }
  0xed   :  { %v249_v43 = vpop.f32.mrf.mxu0  ;;  %v281_v44 = vpop.f32.mrf.mxu1 }
  0xee   :  { %321 = vst [vmem:[%s602_s3 + $0x8] sm:$0xff] %v305_v41  ;;  %329 = vst [vmem:[%s602_s3 + $0x48] sm:$0xff] %v313_v42  ;;  %v250_v45 = vadd.f32 %v533_v26, %v249_v43  ;;  %v282_v46 = vadd.f32 %v533_v26, %v281_v44 }
  0xef   :  { %v251_v47 = vpop.f32.mrf.mxu0  ;;  %v283_v48 = vpop.f32.mrf.mxu1 }
  0xf0   :  { %v306_v49 = vmax.f32 %v250_v45, 0.0  ;;  %v314_v50 = vmax.f32 %v282_v46, 0.0 }
  0xf1   :  { %v252_v51 = vpop.f32.mrf.mxu0  ;;  %v284_v52 = vpop.f32.mrf.mxu1 }
  0xf2   :  { %322 = vst [vmem:[%s602_s3 + $0x10] sm:$0xff] %v306_v49  ;;  %330 = vst [vmem:[%s602_s3 + $0x50] sm:$0xff] %v314_v50  ;;  %v253_v53 = vadd.f32 %v533_v26, %v252_v51  ;;  %v285_v54 = vadd.f32 %v533_v26, %v284_v52 }
  0xf3   :  { %v254_v55 = vpop.f32.mrf.mxu0  ;;  %v286_v56 = vpop.f32.mrf.mxu1 }
  0xf4   :  { %v307_v57 = vmax.f32 %v253_v53, 0.0  ;;  %v315_v58 = vmax.f32 %v285_v54, 0.0 }
  0xf5   :  { %v257_v59 = vpop.f32.mrf.mxu0  ;;  %v289_v60 = vpop.f32.mrf.mxu1 }
  0xf6   :  { %323 = vst [vmem:[%s602_s3 + $0x18] sm:$0xff] %v307_v57  ;;  %331 = vst [vmem:[%s602_s3 + $0x58] sm:$0xff] %v315_v58  ;;  %v258_v61 = vadd.f32 %v533_v26, %v257_v59  ;;  %v290_v62 = vadd.f32 %v533_v26, %v289_v60 }
  0xf7   :  { %v259_v63 = vpop.f32.mrf.mxu0  ;;  %v291_v0 = vpop.f32.mrf.mxu1 }
  0xf8   :  { %v308_v1 = vmax.f32 %v258_v61, 0.0  ;;  %v316_v2 = vmax.f32 %v290_v62, 0.0 }
  0xf9   :  { %v260_v3 = vpop.f32.mrf.mxu0  ;;  %v292_v4 = vpop.f32.mrf.mxu1 }
  0xfa   :  { %324 = vst [vmem:[%s602_s3 + $0x20] sm:$0xff] %v308_v1  ;;  %332 = vst [vmem:[%s602_s3 + $0x60] sm:$0xff] %v316_v2  ;;  %v261_v5 = vadd.f32 %v533_v26, %v260_v3  ;;  %v293_v6 = vadd.f32 %v533_v26, %v292_v4 }
  0xfb   :  { %v262_v7 = vpop.f32.mrf.mxu0  ;;  %v294_v8 = vpop.f32.mrf.mxu1 }
  0xfc   :  { %v309_v9 = vmax.f32 %v261_v5, 0.0  ;;  %v317_v10 = vmax.f32 %v293_v6, 0.0 }
  0xfd   :  { %v265_v11 = vpop.f32.mrf.mxu0  ;;  %v297_v12 = vpop.f32.mrf.mxu1 }
  0xfe   :  { %325 = vst [vmem:[%s602_s3 + $0x28] sm:$0xff] %v309_v9  ;;  %333 = vst [vmem:[%s602_s3 + $0x68] sm:$0xff] %v317_v10  ;;  %v266_v13 = vadd.f32 %v533_v26, %v265_v11  ;;  %v298_v14 = vadd.f32 %v533_v26, %v297_v12 }
  0xff   :  { %v267_v15 = vpop.f32.mrf.mxu0  ;;  %v299_v16 = vpop.f32.mrf.mxu1 }
 0x100   :  { %v310_v17 = vmax.f32 %v266_v13, 0.0  ;;  %v318_v18 = vmax.f32 %v298_v14, 0.0 }
 0x101   :  { %v268_v19 = vpop.f32.mrf.mxu0  ;;  %v300_v20 = vpop.f32.mrf.mxu1 }
 0x102   :  { %326 = vst [vmem:[%s602_s3 + $0x30] sm:$0xff] %v310_v17  ;;  %334 = vst [vmem:[%s602_s3 + $0x70] sm:$0xff] %v318_v18  ;;  %v269_v21 = vadd.f32 %v533_v26, %v268_v19  ;;  %v301_v22 = vadd.f32 %v533_v26, %v300_v20 }
 0x103   :  { %v270_v23 = vpop.f32.mrf.mxu0  ;;  %v302_v24 = vpop.f32.mrf.mxu1 }
 0x104   :  { %v311_v25 = vmax.f32 %v269_v21, 0.0  ;;  %v319_v27 = vmax.f32 %v301_v22, 0.0 }
 0x106   :  { %327 = vst [vmem:[%s602_s3 + $0x38] sm:$0xff] %v311_v25  ;;  %335 = vst [vmem:[%s602_s3 + $0x78] sm:$0xff] %v319_v27 }

// kernel: alexnet_forward.9
= control target key start
LH: loop header
LB: loop body
LE: loop exit
PB: predicated region body
PF: predicated region fallthrough
CT: control target
= control target key end

     0   :  { %vm318_vm0 = vcmask 261120   ;;  %s1031_s1 = inlined_call_operand.vmem [shape: bf16[288,128], index: 1, kind: input, shape index: {}]   ;;  %s1032_s0 = inlined_call_operand.vmem [shape: bf16[128,288], index: 0, kind: input, shape index: {}]   ;;  %s1033_s2 = inlined_call_operand.vmem [shape: f32[1,128], index: 2, kind: input, shape index: {}]   ;;  %s1034_s3 = inlined_call_operand.vmem [shape: f32[128,128], index: 3, kind: output, shape index: {}]  }
   0x1   :  { %v734_v0 = vld [vmem:[%s1031_s1 + $0x78] sm:$0xff]   ;;  %v736_v2 = vld [vmem:[%s1031_s1 + $0x70] sm:$0xff]   ;;  %v738_v4 = vld [vmem:[%s1031_s1 + $0x68] sm:$0xff]  }
   0x2   :  { %v735_v1 = vld [vmem:[%s1031_s1 + $0x38] sm:$0xff]   ;;  %624 = vmatprep.subr.bf16.mxu0 %v734_v0  ;;  %718 = vmatprep.subr.bf16.mxu1 %v734_v0  ;;  %v737_v3 = vld [vmem:[%s1031_s1 + $0x30] sm:$0xff]   ;;  %v739_v5 = vld [vmem:[%s1031_s1 + $0x28] sm:$0xff]  }
   0x3   :  { %625 = vmatpush3.bf16.msra.mxu0 %v735_v1  ;;  %726 = vmatpush3.bf16.msra.mxu1 %v735_v1  ;;  %v740_v6 = vld [vmem:[%s1031_s1 + $0x60] sm:$0xff]   ;;  %v742_v8 = vld [vmem:[%s1031_s1 + $0x58] sm:$0xff]   ;;  %v744_v10 = vld [vmem:[%s1031_s1 + $0x50] sm:$0xff]  }
   0x4   :  { %626 = vmatprep.subr.bf16.mxu0 %v736_v2  ;;  %719 = vmatprep.subr.bf16.mxu1 %v736_v2  ;;  %v741_v7 = vld [vmem:[%s1031_s1 + $0x20] sm:$0xff]   ;;  %v743_v9 = vld [vmem:[%s1031_s1 + $0x18] sm:$0xff]   ;;  %v745_v13 = vld [vmem:[%s1031_s1 + $0x10] sm:$0xff]  }
   0x5   :  { %v752_v11 = vld [vmem:[%s1032_s0 + $0x4] ss:$12 sps:$4 sm:$0xff]   ;;  %v755_v12 = vld [vmem:[%s1032_s0 + $0x94] ss:$12 sps:$4 sm:$0xff]   ;;  %v746_v14 = vld [vmem:[%s1031_s1 + $0x48] sm:$0xff]  }
   0x6   :  { %375 = vmatprep.mubr.bf16.mxu0 %v752_v11  ;;  %423 = vmatprep.mubr.bf16.mxu1 %v755_v12  ;;  %v747_v15 = vld [vmem:[%s1031_s1 + $0x8] sm:$0xff]   ;;  %v748_v16 = vld [vmem:[%s1031_s1 + $0x40] sm:$0xff]   ;;  %v753_v20 = vld [vmem:[%s1032_s0 + $0x90] ss:$12 sps:$4 sm:$0xff]  }
   0x7   :  { %627 = vmatpush3.bf16.msra.mxu0 %v737_v3  ;;  %727 = vmatpush3.bf16.msra.mxu1 %v737_v3  ;;  %v749_v17 = vld [vmem:[%s1031_s1] sm:$0xff]   ;;  %v756_v19 = vld [vmem:[%s1031_s1 + $0x88] sm:$0xff]   ;;  %v767_v28 = vld [vmem:[%s1032_s0 + $0x30] ss:$12 sps:$4 sm:$0xff]  }
   0x8   :  { %628 = vmatprep.subr.bf16.mxu0 %v738_v4  ;;  %720 = vmatprep.subr.bf16.mxu1 %v738_v4  ;;  %v750_v18 = vld [vmem:[%s1032_s0] ss:$12 sps:$4 sm:$0xff]   ;;  %v757_v21 = vld [vmem:[%s1032_s0 + $0x1c] ss:$12 sps:$4 sm:$0xff]   ;;  %v761_v24 = vld [vmem:[%s1032_s0 + $0x18] ss:$12 sps:$4 sm:$0xff]  }
   0x9   :  { %v759_v22 = vld [vmem:[%s1032_s0 + $0xac] ss:$12 sps:$4 sm:$0xff]   ;;  %v763_v23 = vld [vmem:[%s1031_s1 + $0x80] sm:$0xff]   ;;  %v762_v25 = vld [vmem:[%s1032_s0 + $0xa8] ss:$12 sps:$4 sm:$0xff]  }
   0xa   :  { %v764_v26 = vld [vmem:[%s1032_s0 + $0x34] ss:$12 sps:$4 sm:$0xff]   ;;  %v769_v30 = vld [vmem:[%s1032_s0 + $0x4c] ss:$12 sps:$4 sm:$0xff]   ;;  %v773_v33 = vld [vmem:[%s1032_s0 + $0x50] ss:$12 sps:$4 sm:$0xff]  }
   0xb   :  { %629 = vmatpush3.bf16.msra.mxu0 %v739_v5  ;;  %728 = vmatpush3.bf16.msra.mxu1 %v739_v5  ;;  %v766_v27 = vld [vmem:[%s1032_s0 + $0x8] ss:$12 sps:$4 sm:$0xff]   ;;  %v768_v29 = vld [vmem:[%s1032_s0 + $0x20] ss:$12 sps:$4 sm:$0xff]   ;;  %v771_v31 = vld [vmem:[%s1032_s0 + $0x38] ss:$12 sps:$4 sm:$0xff]  }
   0xc   :  { %630 = vmatprep.subr.bf16.mxu0 %v740_v6  ;;  %721 = vmatprep.subr.bf16.mxu1 %v740_v6  ;;  %v772_v32 = vld [vmem:[%s1032_s0 + $0x48] ss:$12 sps:$4 sm:$0xff]   ;;  %v774_v34 = vld [vmem:[%s1032_s0 + $0x64] ss:$12 sps:$4 sm:$0xff]   ;;  %v777_v36 = vld [vmem:[%s1032_s0 + $0x60] ss:$12 sps:$4 sm:$0xff]  }
   0xd   :  { %v776_v35 = vld [vmem:[%s1032_s0 + $0x68] ss:$12 sps:$4 sm:$0xff]   ;;  %v778_v37 = vld [vmem:[%s1032_s0 + $0x80] ss:$12 sps:$4 sm:$0xff]   ;;  %v781_v39 = vld [vmem:[%s1032_s0 + $0x98] ss:$12 sps:$4 sm:$0xff]  }
   0xe   :  { %v779_v38 = vld [vmem:[%s1032_s0 + $0x7c] ss:$12 sps:$4 sm:$0xff]   ;;  %v782_v40 = vld [vmem:[%s1032_s0 + $0x78] ss:$12 sps:$4 sm:$0xff]   ;;  %v957_v60 = vld [vmem:[%s1033_s2] ss:$0 sm:$0xff] }
   0xf   :  { %631 = vmatpush3.bf16.msra.mxu0 %v741_v7  ;;  %729 = vmatpush3.bf16.msra.mxu1 %v741_v7  ;;  %v783_v41 = vld [vmem:[%s1032_s0 + $0xb0] ss:$12 sps:$4 sm:$0xff]  }
  0x10   :  { %632 = vmatprep.subr.bf16.mxu0 %v742_v8  ;;  %722 = vmatprep.subr.bf16.mxu1 %v742_v8 }
  0x13   :  { %633 = vmatpush3.bf16.msra.mxu0 %v743_v9  ;;  %730 = vmatpush3.bf16.msra.mxu1 %v743_v9 }
  0x14   :  { %634 = vmatprep.subr.bf16.mxu0 %v744_v10  ;;  %723 = vmatprep.subr.bf16.mxu1 %v744_v10 }
  0x17   :  { %635 = vmatpush3.bf16.msra.mxu0 %v745_v13  ;;  %731 = vmatpush3.bf16.msra.mxu1 %v745_v13 }
  0x18   :  { %636 = vmatprep.subr.bf16.mxu0 %v746_v14  ;;  %724 = vmatprep.subr.bf16.mxu1 %v746_v14 }
  0x1b   :  { %637 = vmatpush3.bf16.msra.mxu0 %v747_v15  ;;  %732 = vmatpush3.bf16.msra.mxu1 %v747_v15 }
  0x1c   :  { %638 = vmatprep.subr.bf16.mxu0 %v748_v16  ;;  %725 = vmatprep.subr.bf16.mxu1 %v748_v16 }
  0x1f   :  { %639 = vmatpush3.bf16.msra.mxu0 %v749_v17  ;;  %733 = vmatpush3.bf16.msra.mxu1 %v749_v17 }
  0x20   :  { %698 = vmatprep.subr.bf16.mxu1 %v756_v19 }
  0x22   :  { %376 = vmatmul.mubr.bf16.vlgmr.msra.gmra.mxu0 %v750_v18  ;;  %424 = vmatmul.mubr.bf16.vlgmr.msra.gmra.mxu1 %v753_v20 }
  0x23   :  { %699 = vmatpush3.bf16.msra.mxu1 %v756_v19  ;;  %383 = vmatprep.mubr.bf16.mxu0 %v757_v21 }
  0x24   :  { %431 = vmatprep.mubr.bf16.mxu1 %v759_v22  ;;  %700 = vmatprep.subr.bf16.mxu1 %v763_v23 }
  0x27   :  { %701 = vmatpush3.bf16.msra.mxu1 %v763_v23 }
  0x2a   :  { %384 = vmatmul.mubr.bf16.gmra.mxu0 %v761_v24  ;;  %432 = vmatmul.mubr.bf16.gmra.mxu1 %v762_v25 }
  0x2b   :  { %391 = vmatprep.mubr.bf16.mxu0 %v764_v26  ;;  %702 = vmatprep.mubr.msk.bf16.mxu1 %vm318_vm0, %v766_v27 }
  0x32   :  { %392 = vmatmul.mubr.bf16.gmra.mxu0 %v767_v28  ;;  %703 = vmatmul.mubr.msk.bf16.vlgmr.msra.gmra.mxu1 %vm318_vm0, %v768_v29 }
  0x33   :  { %399 = vmatprep.mubr.bf16.mxu0 %v769_v30  ;;  %706 = vmatprep.mubr.msk.bf16.mxu1 %vm318_vm0, %v771_v31 }
  0x3a   :  { %400 = vmatmul.mubr.bf16.gmra.mxu0 %v772_v32  ;;  %707 = vmatmul.mubr.msk.bf16.gmra.mxu1 %vm318_vm0, %v773_v33 }
  0x3b   :  { %407 = vmatprep.mubr.bf16.mxu0 %v774_v34  ;;  %710 = vmatprep.mubr.msk.bf16.mxu1 %vm318_vm0, %v776_v35 }
  0x42   :  { %408 = vmatmul.mubr.bf16.gmra.mxu0 %v777_v36  ;;  %711 = vmatmul.mubr.msk.bf16.gmra.mxu1 %vm318_vm0, %v778_v37 }
  0x43   :  { %415 = vmatprep.mubr.bf16.mxu0 %v779_v38  ;;  %714 = vmatprep.mubr.msk.bf16.mxu1 %vm318_vm0, %v781_v39 }
  0x4a   :  { %416 = vmatmul.mubr.bf16.gmra.mxu0 %v782_v40  ;;  %715 = vmatmul.mubr.msk.bf16.gmra.mxu1 %vm318_vm0, %v783_v41 }
  0xe2   :  { %v640_v42 = vpop.f32.mrf.mxu0  ;;  %v938_v43 = vpop.f32.mrf.mxu1 }
  0xe4   :  { %v641_v44 = vpop.f32.mrf.mxu0  ;;  %v940_v45 = vpop.f32.mrf.mxu1 }
  0xe5   :  { %v642_v57 = vadd.f32 %v641_v44, %v640_v42 }
  0xe6   :  { %v643_v46 = vpop.f32.mrf.mxu0  ;;  %v942_v47 = vpop.f32.mrf.mxu1 }
  0xe7   :  { %v378_v3 = vadd.f32 %v642_v57, %v957_v60  ;;  %v678_v57 = vadd.f32 %v940_v45, %v938_v43 }
  0xe8   :  { %v644_v48 = vpop.f32.mrf.mxu0  ;;  %v944_v49 = vpop.f32.mrf.mxu1 }
  0xe9   :  { %v645_v1 = vadd.f32 %v644_v48, %v643_v46 }
  0xea   :  { %v646_v50 = vpop.f32.mrf.mxu0  ;;  %v946_v51 = vpop.f32.mrf.mxu1 }
  0xeb   :  { %v381_v14 = vadd.f32 %v645_v1, %v957_v60 }
  0xec   :  { %v647_v52 = vpop.f32.mrf.mxu0  ;;  %v948_v53 = vpop.f32.mrf.mxu1 }
  0xed   :  { %v648_v54 = vadd.f32 %v647_v52, %v646_v50  ;;  %v684_v48 = vadd.f32 %v948_v53, %v946_v51 }
  0xee   :  { %v649_v55 = vpop.f32.mrf.mxu0  ;;  %v950_v56 = vpop.f32.mrf.mxu1 }
  0xef   :  { %v386_v62 = vadd.f32 %v648_v54, %v957_v60  ;;  %v434_v1 = vadd.f32 %v684_v48, %v957_v60 }
  0xf0   :  { %v650_v58 = vpop.f32.mrf.mxu0  ;;  %v952_v59 = vpop.f32.mrf.mxu1 }
  0xf1   :  { %v651_v61 = vadd.f32 %v650_v58, %v649_v55  ;;  %v687_v51 = vadd.f32 %v952_v59, %v950_v56  ;;  %v426_v56 = vadd.f32 %v678_v57, %v957_v60 }
  0xf2   :  { %v652_v63 = vpop.f32.mrf.mxu0  ;;  %v704_v0 = vpop.f32.mrf.mxu1 }
  0xf3   :  { %v483_v2 = vadd.f32 %v704_v0, %v386_v62  ;;  %v389_v8 = vadd.f32 %v651_v61, %v957_v60 }
  0xf4   :  { %v653_v4 = vpop.f32.mrf.mxu0  ;;  %v474_v5 = vpop.f32.mrf.mxu1 }
  0xf5   :  { %v539_v6 = vmax.f32 %v483_v2, 0.0  ;;  %v475_v7 = vadd.f32 %v474_v5, %v378_v3  ;;  %v654_v11 = vadd.f32 %v653_v4, %v652_v63  ;;  %v681_v2 = vadd.f32 %v944_v49, %v942_v47 }
  0xf6   :  { %v655_v9 = vpop.f32.mrf.mxu0  ;;  %v705_v10 = vpop.f32.mrf.mxu1 }
  0xf7   :  { %555 = vst [vmem:[%s1034_s3 + $0x10] sm:$0xff] %v539_v6  ;;  %v537_v12 = vmax.f32 %v475_v7, 0.0  ;;  %v486_v13 = vadd.f32 %v705_v10, %v389_v8  ;;  %v394_v23 = vadd.f32 %v654_v11, %v957_v60  ;;  %v437_v7 = vadd.f32 %v687_v51, %v957_v60 }
  0xf8   :  { %v656_v15 = vpop.f32.mrf.mxu0  ;;  %v477_v16 = vpop.f32.mrf.mxu1 }
  0xf9   :  { %553 = vst [vmem:[%s1034_s3] sm:$0xff] %v537_v12  ;;  %v540_v17 = vmax.f32 %v486_v13, 0.0  ;;  %v478_v18 = vadd.f32 %v477_v16, %v381_v14  ;;  %v657_v21 = vadd.f32 %v656_v15, %v655_v9  ;;  %v429_v12 = vadd.f32 %v681_v2, %v957_v60 }
  0xfa   :  { %v658_v19 = vpop.f32.mrf.mxu0  ;;  %v708_v20 = vpop.f32.mrf.mxu1 }
  0xfb   :  { %556 = vst [vmem:[%s1034_s3 + $0x18] sm:$0xff] %v540_v17  ;;  %v538_v22 = vmax.f32 %v478_v18, 0.0  ;;  %v397_v32 = vadd.f32 %v657_v21, %v957_v60 }
  0xfc   :  { %v659_v24 = vpop.f32.mrf.mxu0  ;;  %v490_v25 = vpop.f32.mrf.mxu1 }
  0xfd   :  { %554 = vst [vmem:[%s1034_s3 + $0x8] sm:$0xff] %v538_v22  ;;  %v660_v26 = vadd.f32 %v659_v24, %v658_v19  ;;  %v491_v27 = vadd.f32 %v490_v25, %v394_v23 }
  0xfe   :  { %v661_v28 = vpop.f32.mrf.mxu0  ;;  %v709_v29 = vpop.f32.mrf.mxu1 }
  0xff   :  { %v402_v30 = vadd.f32 %v660_v26, %v957_v60  ;;  %v541_v31 = vmax.f32 %v491_v27, 0.0 }
 0x100   :  { %v662_v33 = vpop.f32.mrf.mxu0  ;;  %v493_v34 = vpop.f32.mrf.mxu1 }
 0x101   :  { %v499_v35 = vadd.f32 %v708_v20, %v402_v30  ;;  %557 = vst [vmem:[%s1034_s3 + $0x20] sm:$0xff] %v541_v31  ;;  %v663_v36 = vadd.f32 %v662_v33, %v661_v28  ;;  %v494_v37 = vadd.f32 %v493_v34, %v397_v32 }
 0x102   :  { %v664_v38 = vpop.f32.mrf.mxu0  ;;  %v712_v39 = vpop.f32.mrf.mxu1 }
 0x103   :  { %v543_v40 = vmax.f32 %v499_v35, 0.0  ;;  %v405_v41 = vadd.f32 %v663_v36, %v957_v60  ;;  %v542_v42 = vmax.f32 %v494_v37, 0.0 }
 0x104   :  { %v665_v44 = vpop.f32.mrf.mxu0  ;;  %v506_v46 = vpop.f32.mrf.mxu1 }
 0x105   :  { %559 = vst [vmem:[%s1034_s3 + $0x30] sm:$0xff] %v543_v40  ;;  %v502_v50 = vadd.f32 %v709_v29, %v405_v41  ;;  %558 = vst [vmem:[%s1034_s3 + $0x28] sm:$0xff] %v542_v42  ;;  %v666_v52 = vadd.f32 %v665_v44, %v664_v38 }
 0x106   :  { %v667_v54 = vpop.f32.mrf.mxu0  ;;  %v713_v55 = vpop.f32.mrf.mxu1 }
 0x107   :  { %v544_v58 = vmax.f32 %v502_v50, 0.0  ;;  %v410_v61 = vadd.f32 %v666_v52, %v957_v60 }
 0x108   :  { %v668_v53 = vpop.f32.mrf.mxu0  ;;  %v509_v62 = vpop.f32.mrf.mxu1 }
 0x109   :  { %560 = vst [vmem:[%s1034_s3 + $0x38] sm:$0xff] %v544_v58  ;;  %v507_v63 = vadd.f32 %v506_v46, %v410_v61  ;;  %v669_v0 = vadd.f32 %v668_v53, %v667_v54 }
 0x10a   :  { %v670_v43 = vpop.f32.mrf.mxu0  ;;  %v716_v45 = vpop.f32.mrf.mxu1 }
 0x10b   :  { %v545_v3 = vmax.f32 %v507_v63, 0.0  ;;  %v413_v4 = vadd.f32 %v669_v0, %v957_v60  ;;  %v531_v5 = vadd.f32 %v716_v45, %v434_v1 }
 0x10c   :  { %v671_v59 = vpop.f32.mrf.mxu0  ;;  %v522_v6 = vpop.f32.mrf.mxu1 }
 0x10d   :  { %561 = vst [vmem:[%s1034_s3 + $0x40] sm:$0xff] %v545_v3  ;;  %v510_v8 = vadd.f32 %v509_v62, %v413_v4  ;;  %v551_v9 = vmax.f32 %v531_v5, 0.0  ;;  %v672_v10 = vadd.f32 %v671_v59, %v670_v43  ;;  %v523_v47 = vadd.f32 %v522_v6, %v426_v56 }
 0x10e   :  { %v673_v49 = vpop.f32.mrf.mxu0  ;;  %v717_v11 = vpop.f32.mrf.mxu1 }
 0x10f   :  { %v546_v13 = vmax.f32 %v510_v8, 0.0  ;;  %567 = vst [vmem:[%s1034_s3 + $0x70] sm:$0xff] %v551_v9  ;;  %v418_v14 = vadd.f32 %v672_v10, %v957_v60  ;;  %v549_v15 = vmax.f32 %v523_v47, 0.0  ;;  %v534_v16 = vadd.f32 %v717_v11, %v437_v7 }
 0x110   :  { %v674_v17 = vpop.f32.mrf.mxu0  ;;  %v525_v18 = vpop.f32.mrf.mxu1 }
 0x111   :  { %562 = vst [vmem:[%s1034_s3 + $0x48] sm:$0xff] %v546_v13  ;;  %v515_v19 = vadd.f32 %v712_v39, %v418_v14  ;;  %565 = vst [vmem:[%s1034_s3 + $0x60] sm:$0xff] %v549_v15  ;;  %v552_v20 = vmax.f32 %v534_v16, 0.0  ;;  %v675_v21 = vadd.f32 %v674_v17, %v673_v49  ;;  %v526_v22 = vadd.f32 %v525_v18, %v429_v12 }
 0x113   :  { %v547_v23 = vmax.f32 %v515_v19, 0.0  ;;  %568 = vst [vmem:[%s1034_s3 + $0x78] sm:$0xff] %v552_v20  ;;  %v421_v24 = vadd.f32 %v675_v21, %v957_v60  ;;  %v550_v25 = vmax.f32 %v526_v22, 0.0 }
 0x115   :  { %563 = vst [vmem:[%s1034_s3 + $0x50] sm:$0xff] %v547_v23  ;;  %v518_v26 = vadd.f32 %v713_v55, %v421_v24  ;;  %566 = vst [vmem:[%s1034_s3 + $0x68] sm:$0xff] %v550_v25 }
 0x117   :  { %v548_v27 = vmax.f32 %v518_v26, 0.0 }
 0x119   :  { %564 = vst [vmem:[%s1034_s3 + $0x58] sm:$0xff] %v548_v27 }

// kernel: alexnet_forward.10
= control target key start
LH: loop header
LB: loop body
LE: loop exit
PB: predicated region body
PF: predicated region fallthrough
CT: control target
= control target key end

     0   :  { %vm206_vm0 = vcmask 261120   ;;  %s1339_s4 = inlined_call_operand.vmem [shape: bf16[288,128], index: 4, kind: input, shape index: {}]   ;;  %s1340_s0 = inlined_call_operand.vmem [shape: bf16[32,288], index: 0, kind: input, shape index: {}]   ;;  %s1341_s1 = inlined_call_operand.vmem [shape: bf16[32,288], index: 1, kind: input, shape index: {}]   ;;  %s1342_s2 = inlined_call_operand.vmem [shape: bf16[32,288], index: 2, kind: input, shape index: {}]   ;;  %s1343_s3 = inlined_call_operand.vmem [shape: bf16[32,288], index: 3, kind: input, shape index: {}]   ;;  %s1344_s5 = inlined_call_operand.vmem [shape: f32[1,128], index: 5, kind: input, shape index: {}]   ;;  %s1345_s6 = inlined_call_operand.vmem [shape: f32[32,128], index: 6, kind: output, shape index: {}]  }
   0x1   :  { %v1071_v0 = vld [vmem:[%s1339_s4 + $0x78] sm:$0xff]   ;;  %v1076_v1 = vld [vmem:[%s1339_s4 + $0x88] sm:$0xff]   ;;  %v1088_v3 = vld [vmem:[%s1339_s4 + $0x70] sm:$0xff]  }
   0x2   :  { %823 = vmatprep.subr.bf16.mxu0 %v1071_v0  ;;  %v1082_v2 = vld [vmem:[%s1339_s4 + $0x38] sm:$0xff]   ;;  %951 = vmatprep.subr.bf16.mxu1 %v1076_v1  ;;  %v1095_v4 = vld [vmem:[%s1339_s4 + $0x80] sm:$0xff]   ;;  %v1101_v5 = vld [vmem:[%s1339_s4 + $0x30] sm:$0xff]  }
   0x3   :  { %824 = vmatpush3.bf16.msra.mxu0 %v1082_v2  ;;  %952 = vmatpush3.bf16.msra.mxu1 %v1076_v1  ;;  %v1107_v6 = vld [vmem:[%s1339_s4 + $0x68] sm:$0xff]   ;;  %v1128_v10 = vld [vmem:[%s1339_s4 + $0x60] sm:$0xff]   ;;  %v1143_v12 = vld [vmem:[%s1339_s4 + $0x58] sm:$0xff]  }
   0x4   :  { %825 = vmatprep.subr.bf16.mxu0 %v1088_v3  ;;  %953 = vmatprep.subr.bf16.mxu1 %v1095_v4  ;;  %v990_v7 = vld [vmem:[%s1340_s0 + $0x8] ss:$12 sps:$4 sm:$0xff]   ;;  %v992_v9 = vld [vmem:[%s1340_s0 + $0x20] ss:$12 sps:$4 sm:$0xff]   ;;  %v1150_v13 = vld [vmem:[%s1339_s4 + $0x18] sm:$0xff]  }
   0x5   :  { %v1117_v8 = vld [vmem:[%s1339_s4 + $0x28] sm:$0xff]   ;;  %955 = vmatprep.mubr.msk.bf16.mxu1 %vm206_vm0, %v990_v7  ;;  %v1136_v11 = vld [vmem:[%s1339_s4 + $0x20] sm:$0xff]   ;;  %v1157_v14 = vld [vmem:[%s1339_s4 + $0x50] sm:$0xff]  }
   0x6   :  { %v1162_v15 = vld [vmem:[%s1339_s4 + $0x10] sm:$0xff]   ;;  %v1169_v16 = vld [vmem:[%s1339_s4 + $0x48] sm:$0xff]   ;;  %v1191_v20 = vld [vmem:[%s1339_s4 + $0x40] sm:$0xff]  }
   0x7   :  { %826 = vmatpush3.bf16.msra.mxu0 %v1101_v5  ;;  %954 = vmatpush3.bf16.msra.mxu1 %v1095_v4  ;;  %v1005_v17 = vld [vmem:[%s1340_s0 + $0x4] ss:$12 sps:$4 sm:$0xff]   ;;  %v1184_v19 = vld [vmem:[%s1339_s4 + $0x8] sm:$0xff]  }
   0x8   :  { %827 = vmatprep.subr.bf16.mxu0 %v1107_v6  ;;  %855 = vmatprep.subr.bf16.mxu1 %v1071_v0  ;;  %v1010_v18 = vld [vmem:[%s1341_s1 + $0x4] ss:$12 sps:$4 sm:$0xff]   ;;  %v1003_v22 = vld [vmem:[%s1340_s0] ss:$12 sps:$4 sm:$0xff]   ;;  %v1006_v23 = vld [vmem:[%s1340_s0 + $0x1c] ss:$12 sps:$4 sm:$0xff]  }
   0x9   :  { %245 = vmatprep.mubr.bf16.mxu0 %v1005_v17  ;;  %v1198_v21 = vld [vmem:[%s1339_s4] sm:$0xff]   ;;  %v1012_v26 = vld [vmem:[%s1341_s1 + $0x1c] ss:$12 sps:$4 sm:$0xff]  }
   0xa   :  { %956 = vmatmul.mubr.msk.bf16.vlgmr.msra.gmra.mxu1 %vm206_vm0, %v992_v9  ;;  %v1008_v24 = vld [vmem:[%s1341_s1] ss:$12 sps:$4 sm:$0xff]   ;;  %v1011_v25 = vld [vmem:[%s1340_s0 + $0x18] ss:$12 sps:$4 sm:$0xff]   ;;  %v1014_v27 = vld [vmem:[%s1341_s1 + $0x8] ss:$12 sps:$4 sm:$0xff]  }
   0xb   :  { %828 = vmatpush3.bf16.msra.mxu0 %v1117_v8  ;;  %856 = vmatpush3.bf16.msra.mxu1 %v1082_v2  ;;  %v1015_v28 = vld [vmem:[%s1341_s1 + $0x18] ss:$12 sps:$4 sm:$0xff]   ;;  %v1016_v29 = vld [vmem:[%s1341_s1 + $0x20] ss:$12 sps:$4 sm:$0xff]   ;;  %v1017_v30 = vld [vmem:[%s1342_s2 + $0x8] ss:$12 sps:$4 sm:$0xff]  }
   0xc   :  { %829 = vmatprep.subr.bf16.mxu0 %v1128_v10  ;;  %857 = vmatprep.subr.bf16.mxu1 %v1088_v3  ;;  %v1021_v31 = vld [vmem:[%s1342_s2 + $0x4] ss:$12 sps:$4 sm:$0xff]   ;;  %v1018_v32 = vld [vmem:[%s1342_s2 + $0x20] ss:$12 sps:$4 sm:$0xff]   ;;  %v1022_v35 = vld [vmem:[%s1342_s2 + $0x1c] ss:$12 sps:$4 sm:$0xff]  }
   0xd   :  { %387 = vmatprep.mubr.bf16.mxu1 %v1010_v18  ;;  %v1027_v33 = vld [vmem:[%s1343_s3 + $0x4] ss:$12 sps:$4 sm:$0xff]   ;;  %v1019_v34 = vld [vmem:[%s1342_s2] ss:$12 sps:$4 sm:$0xff]   ;;  %v1028_v37 = vld [vmem:[%s1343_s3 + $0x8] ss:$12 sps:$4 sm:$0xff]  }
   0xe   :  { %v1024_v36 = vld [vmem:[%s1342_s2 + $0x18] ss:$12 sps:$4 sm:$0xff]   ;;  %v1025_v38 = vld [vmem:[%s1343_s3] ss:$12 sps:$4 sm:$0xff]   ;;  %v1030_v40 = vld [vmem:[%s1343_s3 + $0x1c] ss:$12 sps:$4 sm:$0xff]  }
   0xf   :  { %830 = vmatpush3.bf16.msra.mxu0 %v1136_v11  ;;  %858 = vmatpush3.bf16.msra.mxu1 %v1101_v5  ;;  %v1029_v39 = vld [vmem:[%s1343_s3 + $0x20] ss:$12 sps:$4 sm:$0xff]   ;;  %v1032_v41 = vld [vmem:[%s1343_s3 + $0x18] ss:$12 sps:$4 sm:$0xff]  }
  0x10   :  { %831 = vmatprep.subr.bf16.mxu0 %v1143_v12  ;;  %859 = vmatprep.subr.bf16.mxu1 %v1107_v6 }
  0x13   :  { %832 = vmatpush3.bf16.msra.mxu0 %v1150_v13  ;;  %860 = vmatpush3.bf16.msra.mxu1 %v1117_v8 }
  0x14   :  { %833 = vmatprep.subr.bf16.mxu0 %v1157_v14  ;;  %861 = vmatprep.subr.bf16.mxu1 %v1128_v10 }
  0x17   :  { %834 = vmatpush3.bf16.msra.mxu0 %v1162_v15  ;;  %862 = vmatpush3.bf16.msra.mxu1 %v1136_v11 }
  0x18   :  { %835 = vmatprep.subr.bf16.mxu0 %v1169_v16  ;;  %863 = vmatprep.subr.bf16.mxu1 %v1143_v12 }
  0x1b   :  { %836 = vmatpush3.bf16.msra.mxu0 %v1184_v19  ;;  %864 = vmatpush3.bf16.msra.mxu1 %v1150_v13 }
  0x1c   :  { %837 = vmatprep.subr.bf16.mxu0 %v1191_v20  ;;  %865 = vmatprep.subr.bf16.mxu1 %v1157_v14 }
  0x1f   :  { %838 = vmatpush3.bf16.msra.mxu0 %v1198_v21  ;;  %866 = vmatpush3.bf16.msra.mxu1 %v1162_v15 }
  0x20   :  { %867 = vmatprep.subr.bf16.mxu1 %v1169_v16  ;;  %959 = vmatprep.subr.bf16.mxu0 %v1076_v1 }
  0x22   :  { %246 = vmatmul.mubr.bf16.vlgmr.msra.gmra.mxu0 %v1003_v22 }
  0x23   :  { %868 = vmatpush3.bf16.msra.mxu1 %v1184_v19  ;;  %960 = vmatpush3.bf16.msra.mxu0 %v1076_v1 }
  0x24   :  { %869 = vmatprep.subr.bf16.mxu1 %v1191_v20  ;;  %253 = vmatprep.mubr.bf16.mxu0 %v1006_v23 }
  0x25   :  { %961 = vmatprep.subr.bf16.mxu0 %v1095_v4 }
  0x27   :  { %870 = vmatpush3.bf16.msra.mxu1 %v1198_v21  ;;  %962 = vmatpush3.bf16.msra.mxu0 %v1095_v4 }
  0x28   :  { %887 = vmatprep.subr.bf16.mxu1 %v1071_v0  ;;  %967 = vmatprep.subr.bf16.mxu0 %v1076_v1 }
  0x2a   :  { %254 = vmatmul.mubr.bf16.gmra.mxu0 %v1011_v25  ;;  %388 = vmatmul.mubr.bf16.vlgmr.msra.gmra.mxu1 %v1008_v24 }
  0x2b   :  { %888 = vmatpush3.bf16.msra.mxu1 %v1082_v2  ;;  %395 = vmatprep.mubr.bf16.mxu1 %v1012_v26 }
  0x2c   :  { %889 = vmatprep.subr.bf16.mxu1 %v1088_v3  ;;  %963 = vmatprep.mubr.msk.bf16.mxu0 %vm206_vm0, %v1014_v27 }
  0x2f   :  { %890 = vmatpush3.bf16.msra.mxu1 %v1101_v5 }
  0x30   :  { %891 = vmatprep.subr.bf16.mxu1 %v1107_v6 }
  0x32   :  { %396 = vmatmul.mubr.bf16.gmra.mxu1 %v1015_v28  ;;  %964 = vmatmul.mubr.msk.bf16.vlgmr.msra.gmra.mxu0 %vm206_vm0, %v1016_v29 }
  0x33   :  { %968 = vmatpush3.bf16.msra.mxu0 %v1076_v1  ;;  %892 = vmatpush3.bf16.msra.mxu1 %v1117_v8 }
  0x34   :  { %969 = vmatprep.subr.bf16.mxu0 %v1095_v4  ;;  %893 = vmatprep.subr.bf16.mxu1 %v1128_v10 }
  0x35   :  { %971 = vmatprep.mubr.msk.bf16.mxu0 %vm206_vm0, %v1017_v30  ;;  %533 = vmatprep.mubr.bf16.mxu1 %v1021_v31 }
  0x37   :  { %970 = vmatpush3.bf16.msra.mxu0 %v1095_v4  ;;  %894 = vmatpush3.bf16.msra.mxu1 %v1136_v11 }
  0x38   :  { %919 = vmatprep.subr.bf16.mxu0 %v1071_v0  ;;  %895 = vmatprep.subr.bf16.mxu1 %v1143_v12 }
  0x3a   :  { %972 = vmatmul.mubr.msk.bf16.vlgmr.msra.gmra.mxu0 %vm206_vm0, %v1018_v32 }
  0x3b   :  { %920 = vmatpush3.bf16.msra.mxu0 %v1082_v2  ;;  %896 = vmatpush3.bf16.msra.mxu1 %v1150_v13 }
  0x3c   :  { %921 = vmatprep.subr.bf16.mxu0 %v1088_v3  ;;  %897 = vmatprep.subr.bf16.mxu1 %v1157_v14 }
  0x3d   :  { %679 = vmatprep.mubr.bf16.mxu0 %v1027_v33 }
  0x3f   :  { %922 = vmatpush3.bf16.msra.mxu0 %v1101_v5  ;;  %898 = vmatpush3.bf16.msra.mxu1 %v1162_v15 }
  0x40   :  { %923 = vmatprep.subr.bf16.mxu0 %v1107_v6  ;;  %899 = vmatprep.subr.bf16.mxu1 %v1169_v16 }
  0x43   :  { %924 = vmatpush3.bf16.msra.mxu0 %v1117_v8  ;;  %900 = vmatpush3.bf16.msra.mxu1 %v1184_v19 }
  0x44   :  { %925 = vmatprep.subr.bf16.mxu0 %v1128_v10  ;;  %901 = vmatprep.subr.bf16.mxu1 %v1191_v20 }
  0x47   :  { %926 = vmatpush3.bf16.msra.mxu0 %v1136_v11  ;;  %902 = vmatpush3.bf16.msra.mxu1 %v1198_v21 }
  0x48   :  { %927 = vmatprep.subr.bf16.mxu0 %v1143_v12  ;;  %975 = vmatprep.subr.bf16.mxu1 %v1076_v1 }
  0x4a   :  { %534 = vmatmul.mubr.bf16.vlgmr.msra.gmra.mxu1 %v1019_v34 }
  0x4b   :  { %928 = vmatpush3.bf16.msra.mxu0 %v1150_v13  ;;  %541 = vmatprep.mubr.bf16.mxu1 %v1022_v35 }
  0x4c   :  { %929 = vmatprep.subr.bf16.mxu0 %v1157_v14  ;;  %976 = vmatpush3.bf16.msra.mxu1 %v1076_v1 }
  0x4d   :  { %977 = vmatprep.subr.bf16.mxu1 %v1095_v4 }
  0x4f   :  { %930 = vmatpush3.bf16.msra.mxu0 %v1162_v15 }
  0x50   :  { %931 = vmatprep.subr.bf16.mxu0 %v1169_v16  ;;  %978 = vmatpush3.bf16.msra.mxu1 %v1095_v4 }
  0x52   :  { %542 = vmatmul.mubr.bf16.gmra.mxu1 %v1024_v36 }
  0x53   :  { %932 = vmatpush3.bf16.msra.mxu0 %v1184_v19  ;;  %979 = vmatprep.mubr.msk.bf16.mxu1 %vm206_vm0, %v1028_v37 }
  0x54   :  { %933 = vmatprep.subr.bf16.mxu0 %v1191_v20 }
  0x57   :  { %934 = vmatpush3.bf16.msra.mxu0 %v1198_v21 }
  0x5a   :  { %680 = vmatmul.mubr.bf16.vlgmr.msra.gmra.mxu0 %v1025_v38  ;;  %980 = vmatmul.mubr.msk.bf16.vlgmr.msra.gmra.mxu1 %vm206_vm0, %v1029_v39 }
  0x5b   :  { %687 = vmatprep.mubr.bf16.mxu0 %v1030_v40 }
  0x62   :  { %688 = vmatmul.mubr.bf16.gmra.mxu0 %v1032_v41  ;;  %v822_v41 = vld [vmem:[%s1344_s5] ss:$0 sm:$0xff] }
  0xca   :  { %v1318_v42 = vpop.f32.mrf.mxu1 }
  0xcc   :  { %v296_v43 = vpop.f32.mrf.mxu1 }
  0xce   :  { %v1320_v46 = vpop.f32.mrf.mxu1 }
  0xd0   :  { %v299_v49 = vpop.f32.mrf.mxu1 }
  0xe2   :  { %v839_v44 = vpop.f32.mrf.mxu0 }
  0xe4   :  { %v840_v45 = vpop.f32.mrf.mxu0 }
  0xe5   :  { %v841_v13 = vadd.f32 %v840_v45, %v839_v44 }
  0xe6   :  { %v842_v47 = vpop.f32.mrf.mxu0 }
  0xe7   :  { %v297_v23 = vadd.f32 %v841_v13, %v296_v43 }
  0xe8   :  { %v843_v48 = vpop.f32.mrf.mxu0 }
  0xe9   :  { %v844_v18 = vadd.f32 %v843_v48, %v842_v47 }
  0xea   :  { %v845_v50 = vpop.f32.mrf.mxu0  ;;  %v871_v51 = vpop.f32.mrf.mxu1 }
  0xeb   :  { %v300_v31 = vadd.f32 %v844_v18, %v299_v49 }
  0xec   :  { %v846_v52 = vpop.f32.mrf.mxu0  ;;  %v872_v53 = vpop.f32.mrf.mxu1 }
  0xed   :  { %v873_v11 = vadd.f32 %v872_v53, %v871_v51  ;;  %v847_v32 = vadd.f32 %v846_v52, %v845_v50 }
  0xee   :  { %v848_v54 = vpop.f32.mrf.mxu0  ;;  %v874_v55 = vpop.f32.mrf.mxu1 }
  0xef   :  { %v305_v49 = vadd.f32 %v1318_v42, %v847_v32 }
  0xf0   :  { %v849_v56 = vpop.f32.mrf.mxu0  ;;  %v875_v57 = vpop.f32.mrf.mxu1 }
  0xf1   :  { %v876_v19 = vadd.f32 %v875_v57, %v874_v55  ;;  %v850_v50 = vadd.f32 %v849_v56, %v848_v54 }
  0xf2   :  { %v877_v58 = vpop.f32.mrf.mxu1  ;;  %v965_v59 = vpop.f32.mrf.mxu0 }
  0xf4   :  { %v878_v60 = vpop.f32.mrf.mxu1  ;;  %v438_v61 = vpop.f32.mrf.mxu0 }
  0xf5   :  { %v439_v17 = vadd.f32 %v873_v11, %v438_v61  ;;  %v879_v25 = vadd.f32 %v878_v60, %v877_v58 }
  0xf6   :  { %v880_v62 = vpop.f32.mrf.mxu1  ;;  %v966_v63 = vpop.f32.mrf.mxu0 }
  0xf7   :  { %v453_v29 = vmax.f32 %v297_v23, %v439_v17  ;;  %v447_v39 = vadd.f32 %v965_v59, %v879_v25 }
  0xf8   :  { %v881_v0 = vpop.f32.mrf.mxu1  ;;  %v441_v1 = vpop.f32.mrf.mxu0 }
  0xf9   :  { %v442_v26 = vadd.f32 %v876_v19, %v441_v1  ;;  %v882_v45 = vadd.f32 %v881_v0, %v880_v62  ;;  %v455_v59 = vmax.f32 %v305_v49, %v447_v39 }
  0xfa   :  { %v973_v3 = vpop.f32.mrf.mxu0 }
  0xfb   :  { %v454_v40 = vmax.f32 %v300_v31, %v442_v26  ;;  %v450_v61 = vadd.f32 %v966_v63, %v882_v45 }
  0xfc   :  { %v584_v6 = vpop.f32.mrf.mxu0 }
  0xfe   :  { %v974_v9 = vpop.f32.mrf.mxu0 }
 0x100   :  { %v587_v15 = vpop.f32.mrf.mxu0 }
 0x10a   :  { %v903_v2 = vpop.f32.mrf.mxu1 }
 0x10c   :  { %v904_v4 = vpop.f32.mrf.mxu1 }
 0x10d   :  { %v905_v14 = vadd.f32 %v904_v4, %v903_v2 }
 0x10e   :  { %v906_v5 = vpop.f32.mrf.mxu1 }
 0x10f   :  { %v585_v24 = vadd.f32 %v905_v14, %v584_v6 }
 0x110   :  { %v907_v7 = vpop.f32.mrf.mxu1 }
 0x111   :  { %v908_v20 = vadd.f32 %v907_v7, %v906_v5  ;;  %v599_v37 = vmax.f32 %v453_v29, %v585_v24  ;;  %v308_v5 = vadd.f32 %v1320_v46, %v850_v50 }
 0x112   :  { %v909_v8 = vpop.f32.mrf.mxu1 }
 0x113   :  { %v588_v33 = vadd.f32 %v908_v20, %v587_v15 }
 0x114   :  { %v910_v10 = vpop.f32.mrf.mxu1 }
 0x115   :  { %v911_v36 = vadd.f32 %v910_v10, %v909_v8  ;;  %v600_v52 = vmax.f32 %v454_v40, %v588_v33 }
 0x116   :  { %v912_v12 = vpop.f32.mrf.mxu1 }
 0x117   :  { %v593_v53 = vadd.f32 %v973_v3, %v911_v36  ;;  %v456_v3 = vmax.f32 %v308_v5, %v450_v61 }
 0x118   :  { %v913_v16 = vpop.f32.mrf.mxu1 }
 0x119   :  { %v914_v55 = vadd.f32 %v913_v16, %v912_v12  ;;  %v601_v0 = vmax.f32 %v455_v59, %v593_v53 }
 0x11a   :  { %v935_v21 = vpop.f32.mrf.mxu0  ;;  %v981_v22 = vpop.f32.mrf.mxu1 }
 0x11b   :  { %v596_v6 = vadd.f32 %v974_v9, %v914_v55 }
 0x11c   :  { %v936_v27 = vpop.f32.mrf.mxu0  ;;  %v730_v28 = vpop.f32.mrf.mxu1 }
 0x11d   :  { %v937_v30 = vadd.f32 %v936_v27, %v935_v21  ;;  %v602_v63 = vmax.f32 %v456_v3, %v596_v6 }
 0x11e   :  { %v938_v34 = vpop.f32.mrf.mxu0  ;;  %v982_v35 = vpop.f32.mrf.mxu1 }
 0x11f   :  { %v731_v38 = vadd.f32 %v937_v30, %v730_v28 }
 0x120   :  { %v939_v43 = vpop.f32.mrf.mxu0  ;;  %v733_v44 = vpop.f32.mrf.mxu1 }
 0x121   :  { %v745_v47 = vmax.f32 %v599_v37, %v731_v38  ;;  %v940_v48 = vadd.f32 %v939_v43, %v938_v34 }
 0x122   :  { %v941_v51 = vpop.f32.mrf.mxu0 }
 0x123   :  { %v756_v57 = vadd.f32 %v822_v41, %v745_v47  ;;  %v734_v58 = vadd.f32 %v940_v48, %v733_v44 }
 0x124   :  { %v942_v60 = vpop.f32.mrf.mxu0 }
 0x125   :  { %v760_v1 = vmax.f32 %v756_v57, 0.0  ;;  %v746_v2 = vmax.f32 %v600_v52, %v734_v58  ;;  %v943_v4 = vadd.f32 %v942_v60, %v941_v51 }
 0x126   :  { %v944_v62 = vpop.f32.mrf.mxu0 }
 0x127   :  { %764 = vst [vmem:[%s1345_s6] sm:$0xff] %v760_v1  ;;  %v757_v42 = vadd.f32 %v822_v41, %v746_v2  ;;  %v739_v54 = vadd.f32 %v981_v22, %v943_v4 }
 0x128   :  { %v945_v56 = vpop.f32.mrf.mxu0 }
 0x129   :  { %v761_v7 = vmax.f32 %v757_v42, 0.0  ;;  %v747_v8 = vmax.f32 %v601_v0, %v739_v54  ;;  %v946_v10 = vadd.f32 %v945_v56, %v944_v62 }
 0x12b   :  { %765 = vst [vmem:[%s1345_s6 + $0x8] sm:$0xff] %v761_v7  ;;  %v758_v46 = vadd.f32 %v822_v41, %v747_v8  ;;  %v742_v11 = vadd.f32 %v982_v35, %v946_v10 }
 0x12d   :  { %v762_v12 = vmax.f32 %v758_v46, 0.0  ;;  %v748_v9 = vmax.f32 %v602_v63, %v742_v11 }
 0x12f   :  { %766 = vst [vmem:[%s1345_s6 + $0x10] sm:$0xff] %v762_v12  ;;  %v759_v13 = vadd.f32 %v822_v41, %v748_v9 }
 0x131   :  { %v763_v14 = vmax.f32 %v759_v13, 0.0 }
 0x133   :  { %767 = vst [vmem:[%s1345_s6 + $0x18] sm:$0xff] %v763_v14 }

// kernel: alexnet_forward.11
= control target key start
LH: loop header
LB: loop body
LE: loop exit
PB: predicated region body
PF: predicated region fallthrough
CT: control target
= control target key end

     0   :  { %s9169_s1 = inlined_call_operand.vmem [shape: bf16[2048,512], index: 1, kind: input, shape index: {}]   ;;  %s9170_s0 = inlined_call_operand.vmem [shape: bf16[8,2048], index: 0, kind: input, shape index: {}]   ;;  %s9171_s2 = inlined_call_operand.vmem [shape: f32[1,512], index: 2, kind: input, shape index: {}]   ;;  %s9172_s3 = inlined_call_operand.vmem [shape: bf16[512,512], index: 3, kind: input, shape index: {}]   ;;  %s9173_s5 = inlined_call_operand.vmem [shape: bf16[512,128], index: 5, kind: input, shape index: {}]   ;;  %s9174_s4 = inlined_call_operand.vmem [shape: f32[1,512], index: 4, kind: input, shape index: {}]   ;;  %s9175_s6 = inlined_call_operand.vmem [shape: f32[1,128], index: 6, kind: input, shape index: {}]   ;;  %s9176_s7 = inlined_call_operand.vmem [shape: f32[8,128], index: 7, kind: output, shape index: {}]  }
   0x1   :  { %v5892_v0 = vld [vmem:[%s9169_s1 + $0xe4] ss:$16 sps:$4 sm:$0xff]   ;;  %v5896_v2 = vld [vmem:[%s9169_s1 + $0xe0] ss:$16 sps:$4 sm:$0xff]   ;;  %v28_v48 = vld [vmem:[%s9170_s0 + $0x8] sm:$0xff] }
   0x2   :  { %v5894_v1 = vld [vmem:[%s9169_s1 + $0x2e4] ss:$16 sps:$4 sm:$0xff]   ;;  %3185 = vmatprep.subr.bf16.mxu0 %v5892_v0  ;;  %v5897_v3 = vld [vmem:[%s9169_s1 + $0x2e0] ss:$16 sps:$4 sm:$0xff]   ;;  %v7093_v51 = vcombine.high %v28_v48, %v28_v48 }
   0x3   :  { %3226 = vmatprep.subr.bf16.mxu1 %v5894_v1  ;;  %v5898_v4 = vld [vmem:[%s9169_s1 + $0xc4] ss:$16 sps:$4 sm:$0xff]   ;;  %3186 = vmatpush1.bf16.msra.mxu0 %v5896_v2  ;;  %v5902_v6 = vld [vmem:[%s9169_s1 + $0xc0] ss:$16 sps:$4 sm:$0xff]  }
   0x4   :  { %3227 = vmatpush1.bf16.msra.mxu1 %v5897_v3  ;;  %v5900_v5 = vld [vmem:[%s9169_s1 + $0x2c4] ss:$16 sps:$4 sm:$0xff]   ;;  %3187 = vmatprep.subr.bf16.mxu0 %v5898_v4  ;;  %v5903_v7 = vld [vmem:[%s9169_s1 + $0x2c0] ss:$16 sps:$4 sm:$0xff]  }
   0x5   :  { %3228 = vmatprep.subr.bf16.mxu1 %v5900_v5  ;;  %v5904_v8 = vld [vmem:[%s9169_s1 + $0xa4] ss:$16 sps:$4 sm:$0xff]   ;;  %v5908_v10 = vld [vmem:[%s9169_s1 + $0xa0] ss:$16 sps:$4 sm:$0xff]   ;;  %3258 = vmatprep.mubr.bf16.mxu1 %v7093_v51 }
   0x6   :  { %v5906_v9 = vld [vmem:[%s9169_s1 + $0x2a4] ss:$16 sps:$4 sm:$0xff]   ;;  %v5909_v11 = vld [vmem:[%s9169_s1 + $0x2a0] ss:$16 sps:$4 sm:$0xff]  }
   0x7   :  { %3188 = vmatpush1.bf16.msra.mxu0 %v5902_v6  ;;  %v5910_v12 = vld [vmem:[%s9169_s1 + $0x84] ss:$16 sps:$4 sm:$0xff]   ;;  %v5914_v14 = vld [vmem:[%s9169_s1 + $0x80] ss:$16 sps:$4 sm:$0xff]  }
   0x8   :  { %3229 = vmatpush1.bf16.msra.mxu1 %v5903_v7  ;;  %3189 = vmatprep.subr.bf16.mxu0 %v5904_v8  ;;  %v5912_v13 = vld [vmem:[%s9169_s1 + $0x284] ss:$16 sps:$4 sm:$0xff]   ;;  %v5915_v15 = vld [vmem:[%s9169_s1 + $0x280] ss:$16 sps:$4 sm:$0xff]   ;;  %v7153_v7 = vcombine.low %v28_v48, %v28_v48 }
   0x9   :  { %3230 = vmatprep.subr.bf16.mxu1 %v5906_v9  ;;  %v5916_v16 = vld [vmem:[%s9169_s1 + $0x64] ss:$16 sps:$4 sm:$0xff]   ;;  %v5920_v18 = vld [vmem:[%s9169_s1 + $0x60] ss:$16 sps:$4 sm:$0xff]  }
   0xa   :  { %v5918_v17 = vld [vmem:[%s9169_s1 + $0x264] ss:$16 sps:$4 sm:$0xff]   ;;  %v5921_v19 = vld [vmem:[%s9169_s1 + $0x260] ss:$16 sps:$4 sm:$0xff]  }
   0xb   :  { %3190 = vmatpush1.bf16.msra.mxu0 %v5908_v10  ;;  %v5922_v20 = vld [vmem:[%s9169_s1 + $0x44] ss:$16 sps:$4 sm:$0xff]   ;;  %v5926_v22 = vld [vmem:[%s9169_s1 + $0x40] ss:$16 sps:$4 sm:$0xff]  }
   0xc   :  { %3231 = vmatpush1.bf16.msra.mxu1 %v5909_v11  ;;  %3191 = vmatprep.subr.bf16.mxu0 %v5910_v12  ;;  %v5924_v21 = vld [vmem:[%s9169_s1 + $0x244] ss:$16 sps:$4 sm:$0xff]   ;;  %v5927_v23 = vld [vmem:[%s9169_s1 + $0x240] ss:$16 sps:$4 sm:$0xff]  }
   0xd   :  { %3232 = vmatprep.subr.bf16.mxu1 %v5912_v13  ;;  %v5928_v24 = vld [vmem:[%s9169_s1 + $0x24] ss:$16 sps:$4 sm:$0xff]   ;;  %v5932_v26 = vld [vmem:[%s9169_s1 + $0x20] ss:$16 sps:$4 sm:$0xff]  }
   0xe   :  { %v5930_v25 = vld [vmem:[%s9169_s1 + $0x224] ss:$16 sps:$4 sm:$0xff]   ;;  %v5933_v27 = vld [vmem:[%s9169_s1 + $0x220] ss:$16 sps:$4 sm:$0xff]  }
   0xf   :  { %3192 = vmatpush1.bf16.msra.mxu0 %v5914_v14  ;;  %v5934_v28 = vld [vmem:[%s9169_s1 + $0x4] ss:$16 sps:$4 sm:$0xff]   ;;  %v5938_v30 = vld [vmem:[%s9169_s1] ss:$16 sps:$4 sm:$0xff]  }
  0x10   :  { %3233 = vmatpush1.bf16.msra.mxu1 %v5915_v15  ;;  %3193 = vmatprep.subr.bf16.mxu0 %v5916_v16  ;;  %v5936_v29 = vld [vmem:[%s9169_s1 + $0x204] ss:$16 sps:$4 sm:$0xff]   ;;  %v5939_v31 = vld [vmem:[%s9169_s1 + $0x200] ss:$16 sps:$4 sm:$0xff]  }
  0x11   :  { %3234 = vmatprep.subr.bf16.mxu1 %v5918_v17  ;;  %v5940_v32 = vld [vmem:[%s9169_s1 + $0x1e4] ss:$16 sps:$4 sm:$0xff]   ;;  %v5944_v34 = vld [vmem:[%s9169_s1 + $0x1e0] ss:$16 sps:$4 sm:$0xff]  }
  0x12   :  { %v5942_v33 = vld [vmem:[%s9169_s1 + $0x3e4] ss:$16 sps:$4 sm:$0xff]   ;;  %v5945_v35 = vld [vmem:[%s9169_s1 + $0x3e0] ss:$16 sps:$4 sm:$0xff]  }
  0x13   :  { %3194 = vmatpush1.bf16.msra.mxu0 %v5920_v18  ;;  %v5946_v36 = vld [vmem:[%s9169_s1 + $0x1c4] ss:$16 sps:$4 sm:$0xff]   ;;  %v5950_v38 = vld [vmem:[%s9169_s1 + $0x1c0] ss:$16 sps:$4 sm:$0xff]  }
  0x14   :  { %3235 = vmatpush1.bf16.msra.mxu1 %v5921_v19  ;;  %3195 = vmatprep.subr.bf16.mxu0 %v5922_v20  ;;  %v5948_v37 = vld [vmem:[%s9169_s1 + $0x3c4] ss:$16 sps:$4 sm:$0xff]   ;;  %v5951_v39 = vld [vmem:[%s9169_s1 + $0x3c0] ss:$16 sps:$4 sm:$0xff]  }
  0x15   :  { %3236 = vmatprep.subr.bf16.mxu1 %v5924_v21  ;;  %v5952_v40 = vld [vmem:[%s9169_s1 + $0x1a4] ss:$16 sps:$4 sm:$0xff]   ;;  %v5956_v42 = vld [vmem:[%s9169_s1 + $0x1a0] ss:$16 sps:$4 sm:$0xff]  }
  0x16   :  { %v5954_v41 = vld [vmem:[%s9169_s1 + $0x3a4] ss:$16 sps:$4 sm:$0xff]   ;;  %v5957_v43 = vld [vmem:[%s9169_s1 + $0x3a0] ss:$16 sps:$4 sm:$0xff]  }
  0x17   :  { %3196 = vmatpush1.bf16.msra.mxu0 %v5926_v22  ;;  %v5958_v44 = vld [vmem:[%s9169_s1 + $0x184] ss:$16 sps:$4 sm:$0xff]   ;;  %v5962_v49 = vld [vmem:[%s9169_s1 + $0x180] ss:$16 sps:$4 sm:$0xff]  }
  0x18   :  { %3237 = vmatpush1.bf16.msra.mxu1 %v5927_v23  ;;  %3197 = vmatprep.subr.bf16.mxu0 %v5928_v24  ;;  %v5960_v45 = vld [vmem:[%s9169_s1 + $0x384] ss:$16 sps:$4 sm:$0xff]   ;;  %v5963_v50 = vld [vmem:[%s9169_s1 + $0x380] ss:$16 sps:$4 sm:$0xff]  }
  0x19   :  { %3238 = vmatprep.subr.bf16.mxu1 %v5930_v25  ;;  %v27_v46 = vld [vmem:[%s9170_s0] sm:$0xff] }
  0x1a   :  { %v7082_v47 = vcombine.high %v27_v46, %v27_v46  ;;  %v5964_v52 = vld [vmem:[%s9169_s1 + $0x164] ss:$16 sps:$4 sm:$0xff]   ;;  %v5968_v54 = vld [vmem:[%s9169_s1 + $0x160] ss:$16 sps:$4 sm:$0xff]   ;;  %v7151_v6 = vcombine.low %v27_v46, %v27_v46 }
  0x1b   :  { %3198 = vmatpush1.bf16.msra.mxu0 %v5932_v26  ;;  %v5966_v53 = vld [vmem:[%s9169_s1 + $0x364] ss:$16 sps:$4 sm:$0xff]   ;;  %v5969_v55 = vld [vmem:[%s9169_s1 + $0x360] ss:$16 sps:$4 sm:$0xff]  }
  0x1c   :  { %3239 = vmatpush1.bf16.msra.mxu1 %v5933_v27  ;;  %3199 = vmatprep.subr.bf16.mxu0 %v5934_v28  ;;  %v5970_v56 = vld [vmem:[%s9169_s1 + $0x144] ss:$16 sps:$4 sm:$0xff]   ;;  %v5974_v58 = vld [vmem:[%s9169_s1 + $0x140] ss:$16 sps:$4 sm:$0xff]  }
  0x1d   :  { %3240 = vmatprep.subr.bf16.mxu1 %v5936_v29  ;;  %3217 = vmatprep.mubr.bf16.mxu0 %v7082_v47  ;;  %v5972_v57 = vld [vmem:[%s9169_s1 + $0x344] ss:$16 sps:$4 sm:$0xff]   ;;  %v5975_v59 = vld [vmem:[%s9169_s1 + $0x340] ss:$16 sps:$4 sm:$0xff]  }
  0x1e   :  { %v5976_v60 = vld [vmem:[%s9169_s1 + $0x124] ss:$16 sps:$4 sm:$0xff]   ;;  %v5980_v62 = vld [vmem:[%s9169_s1 + $0x120] ss:$16 sps:$4 sm:$0xff]  }
  0x1f   :  { %3200 = vmatpush1.bf16.msra.mxu0 %v5938_v30  ;;  %v5978_v61 = vld [vmem:[%s9169_s1 + $0x324] ss:$16 sps:$4 sm:$0xff]   ;;  %v5981_v63 = vld [vmem:[%s9169_s1 + $0x320] ss:$16 sps:$4 sm:$0xff]  }
  0x20   :  { %3241 = vmatpush1.bf16.msra.mxu1 %v5939_v31  ;;  %3201 = vmatprep.subr.bf16.mxu0 %v5940_v32  ;;  %v5982_v0 = vld [vmem:[%s9169_s1 + $0x104] ss:$16 sps:$4 sm:$0xff]   ;;  %v5986_v2 = vld [vmem:[%s9169_s1 + $0x100] ss:$16 sps:$4 sm:$0xff]  }
  0x21   :  { %3242 = vmatprep.subr.bf16.mxu1 %v5942_v33  ;;  %v5984_v1 = vld [vmem:[%s9169_s1 + $0x304] ss:$16 sps:$4 sm:$0xff]   ;;  %v5987_v3 = vld [vmem:[%s9169_s1 + $0x300] ss:$16 sps:$4 sm:$0xff]   ;;  %v7237_v33 = vld [vmem:[%s9170_s0 + $0x18] sm:$0xff] }
  0x22   :  { %v5994_v4 = vld [vmem:[%s9169_s1 + $0x4e4] ss:$16 sps:$4 sm:$0xff]   ;;  %v5992_v8 = vld [vmem:[%s9169_s1 + $0x4e0] ss:$16 sps:$4 sm:$0xff]  }
  0x23   :  { %3202 = vmatpush2.bf16.msra.mxu0 %v5944_v34  ;;  %v5997_v5 = vld [vmem:[%s9169_s1 + $0x6e4] ss:$16 sps:$4 sm:$0xff]   ;;  %v5995_v9 = vld [vmem:[%s9169_s1 + $0x6e0] ss:$16 sps:$4 sm:$0xff]  }
  0x24   :  { %3243 = vmatpush2.bf16.msra.mxu1 %v5945_v35  ;;  %3203 = vmatprep.subr.bf16.mxu0 %v5946_v36  ;;  %v6000_v10 = vld [vmem:[%s9169_s1 + $0x4c4] ss:$16 sps:$4 sm:$0xff]   ;;  %v5998_v12 = vld [vmem:[%s9169_s1 + $0x4c0] ss:$16 sps:$4 sm:$0xff]  }
  0x25   :  { %3244 = vmatprep.subr.bf16.mxu1 %v5948_v37  ;;  %v6003_v11 = vld [vmem:[%s9169_s1 + $0x6c4] ss:$16 sps:$4 sm:$0xff]   ;;  %v6001_v13 = vld [vmem:[%s9169_s1 + $0x6c0] ss:$16 sps:$4 sm:$0xff]   ;;  %v7251_v37 = vcombine.high %v7237_v33, %v7237_v33 }
  0x26   :  { %v6006_v14 = vld [vmem:[%s9169_s1 + $0x4a4] ss:$16 sps:$4 sm:$0xff]   ;;  %v6004_v16 = vld [vmem:[%s9169_s1 + $0x4a0] ss:$16 sps:$4 sm:$0xff]  }
  0x27   :  { %3204 = vmatpush2.bf16.msra.mxu0 %v5950_v38  ;;  %v6009_v15 = vld [vmem:[%s9169_s1 + $0x6a4] ss:$16 sps:$4 sm:$0xff]   ;;  %v6007_v17 = vld [vmem:[%s9169_s1 + $0x6a0] ss:$16 sps:$4 sm:$0xff]  }
  0x28   :  { %3245 = vmatpush2.bf16.msra.mxu1 %v5951_v39  ;;  %3205 = vmatprep.subr.bf16.mxu0 %v5952_v40  ;;  %v6012_v18 = vld [vmem:[%s9169_s1 + $0x484] ss:$16 sps:$4 sm:$0xff]   ;;  %v6010_v20 = vld [vmem:[%s9169_s1 + $0x480] ss:$16 sps:$4 sm:$0xff]  }
  0x29   :  { %3246 = vmatprep.subr.bf16.mxu1 %v5954_v41  ;;  %v6015_v19 = vld [vmem:[%s9169_s1 + $0x684] ss:$16 sps:$4 sm:$0xff]   ;;  %v6013_v21 = vld [vmem:[%s9169_s1 + $0x680] ss:$16 sps:$4 sm:$0xff]  }
  0x2a   :  { %v6018_v22 = vld [vmem:[%s9169_s1 + $0x464] ss:$16 sps:$4 sm:$0xff]   ;;  %v6016_v24 = vld [vmem:[%s9169_s1 + $0x460] ss:$16 sps:$4 sm:$0xff]  }
  0x2b   :  { %3206 = vmatpush2.bf16.msra.mxu0 %v5956_v42  ;;  %v6021_v23 = vld [vmem:[%s9169_s1 + $0x664] ss:$16 sps:$4 sm:$0xff]   ;;  %v6019_v25 = vld [vmem:[%s9169_s1 + $0x660] ss:$16 sps:$4 sm:$0xff]  }
  0x2c   :  { %3247 = vmatpush2.bf16.msra.mxu1 %v5957_v43  ;;  %3207 = vmatprep.subr.bf16.mxu0 %v5958_v44  ;;  %v6024_v26 = vld [vmem:[%s9169_s1 + $0x444] ss:$16 sps:$4 sm:$0xff]   ;;  %v6022_v28 = vld [vmem:[%s9169_s1 + $0x440] ss:$16 sps:$4 sm:$0xff]  }
  0x2d   :  { %3248 = vmatprep.subr.bf16.mxu1 %v5960_v45  ;;  %v6027_v27 = vld [vmem:[%s9169_s1 + $0x644] ss:$16 sps:$4 sm:$0xff]   ;;  %v6025_v29 = vld [vmem:[%s9169_s1 + $0x640] ss:$16 sps:$4 sm:$0xff]  }
  0x2e   :  { %v6030_v30 = vld [vmem:[%s9169_s1 + $0x424] ss:$16 sps:$4 sm:$0xff]   ;;  %v6028_v34 = vld [vmem:[%s9169_s1 + $0x420] ss:$16 sps:$4 sm:$0xff]  }
  0x2f   :  { %3208 = vmatpush2.bf16.msra.mxu0 %v5962_v49  ;;  %v6033_v31 = vld [vmem:[%s9169_s1 + $0x624] ss:$16 sps:$4 sm:$0xff]   ;;  %v6031_v35 = vld [vmem:[%s9169_s1 + $0x620] ss:$16 sps:$4 sm:$0xff]  }
  0x30   :  { %3249 = vmatpush2.bf16.msra.mxu1 %v5963_v50  ;;  %3209 = vmatprep.subr.bf16.mxu0 %v5964_v52  ;;  %v7232_v32 = vld [vmem:[%s9170_s0 + $0x10] sm:$0xff] }
  0x31   :  { %3250 = vmatprep.subr.bf16.mxu1 %v5966_v53  ;;  %v7247_v36 = vcombine.high %v7232_v32, %v7232_v32  ;;  %v6036_v38 = vld [vmem:[%s9169_s1 + $0x404] ss:$16 sps:$4 sm:$0xff]   ;;  %v6034_v40 = vld [vmem:[%s9169_s1 + $0x400] ss:$16 sps:$4 sm:$0xff]  }
  0x32   :  { %v6039_v39 = vld [vmem:[%s9169_s1 + $0x604] ss:$16 sps:$4 sm:$0xff]   ;;  %v6037_v41 = vld [vmem:[%s9169_s1 + $0x600] ss:$16 sps:$4 sm:$0xff]  }
  0x33   :  { %3210 = vmatpush2.bf16.msra.mxu0 %v5968_v54  ;;  %v6042_v42 = vld [vmem:[%s9169_s1 + $0x5e4] ss:$16 sps:$4 sm:$0xff]   ;;  %v6040_v44 = vld [vmem:[%s9169_s1 + $0x5e0] ss:$16 sps:$4 sm:$0xff]  }
  0x34   :  { %3251 = vmatpush2.bf16.msra.mxu1 %v5969_v55  ;;  %3211 = vmatprep.subr.bf16.mxu0 %v5970_v56  ;;  %v6045_v43 = vld [vmem:[%s9169_s1 + $0x7e4] ss:$16 sps:$4 sm:$0xff]   ;;  %v6043_v45 = vld [vmem:[%s9169_s1 + $0x7e0] ss:$16 sps:$4 sm:$0xff]  }
  0x35   :  { %3252 = vmatprep.subr.bf16.mxu1 %v5972_v57  ;;  %v6048_v46 = vld [vmem:[%s9169_s1 + $0x5c4] ss:$16 sps:$4 sm:$0xff]   ;;  %v6046_v49 = vld [vmem:[%s9169_s1 + $0x5c0] ss:$16 sps:$4 sm:$0xff]  }
  0x36   :  { %v6051_v48 = vld [vmem:[%s9169_s1 + $0x7c4] ss:$16 sps:$4 sm:$0xff]   ;;  %v6049_v50 = vld [vmem:[%s9169_s1 + $0x7c0] ss:$16 sps:$4 sm:$0xff]  }
  0x37   :  { %3212 = vmatpush2.bf16.msra.mxu0 %v5974_v58  ;;  %v6054_v52 = vld [vmem:[%s9169_s1 + $0x5a4] ss:$16 sps:$4 sm:$0xff]   ;;  %v6052_v54 = vld [vmem:[%s9169_s1 + $0x5a0] ss:$16 sps:$4 sm:$0xff]  }
  0x38   :  { %3253 = vmatpush2.bf16.msra.mxu1 %v5975_v59  ;;  %3213 = vmatprep.subr.bf16.mxu0 %v5976_v60  ;;  %v6057_v53 = vld [vmem:[%s9169_s1 + $0x7a4] ss:$16 sps:$4 sm:$0xff]   ;;  %v6055_v55 = vld [vmem:[%s9169_s1 + $0x7a0] ss:$16 sps:$4 sm:$0xff]  }
  0x39   :  { %3254 = vmatprep.subr.bf16.mxu1 %v5978_v61  ;;  %v6060_v56 = vld [vmem:[%s9169_s1 + $0x584] ss:$16 sps:$4 sm:$0xff]   ;;  %v6058_v58 = vld [vmem:[%s9169_s1 + $0x580] ss:$16 sps:$4 sm:$0xff]  }
  0x3a   :  { %v6063_v57 = vld [vmem:[%s9169_s1 + $0x784] ss:$16 sps:$4 sm:$0xff]   ;;  %v6061_v59 = vld [vmem:[%s9169_s1 + $0x780] ss:$16 sps:$4 sm:$0xff]  }
  0x3b   :  { %3214 = vmatpush2.bf16.msra.mxu0 %v5980_v62  ;;  %v6066_v60 = vld [vmem:[%s9169_s1 + $0x564] ss:$16 sps:$4 sm:$0xff]   ;;  %v6064_v62 = vld [vmem:[%s9169_s1 + $0x560] ss:$16 sps:$4 sm:$0xff]  }
  0x3c   :  { %3255 = vmatpush2.bf16.msra.mxu1 %v5981_v63  ;;  %3215 = vmatprep.subr.bf16.mxu0 %v5982_v0  ;;  %v6069_v61 = vld [vmem:[%s9169_s1 + $0x764] ss:$16 sps:$4 sm:$0xff]   ;;  %v6067_v63 = vld [vmem:[%s9169_s1 + $0x760] ss:$16 sps:$4 sm:$0xff]  }
  0x3d   :  { %3256 = vmatprep.subr.bf16.mxu1 %v5984_v1  ;;  %v6072_v0 = vld [vmem:[%s9169_s1 + $0x544] ss:$16 sps:$4 sm:$0xff]  }
  0x3e   :  { %v6075_v1 = vld [vmem:[%s9169_s1 + $0x744] ss:$16 sps:$4 sm:$0xff]  }
  0x3f   :  { %3216 = vmatpush2.bf16.msra.mxu0 %v5986_v2  ;;  %v6070_v2 = vld [vmem:[%s9169_s1 + $0x540] ss:$16 sps:$4 sm:$0xff]  }
  0x40   :  { %3257 = vmatpush2.bf16.msra.mxu1 %v5987_v3  ;;  %3267 = vmatprep.subr.bf16.mxu0 %v5994_v4  ;;  %v6073_v3 = vld [vmem:[%s9169_s1 + $0x740] ss:$16 sps:$4 sm:$0xff]   ;;  %v6078_v4 = vld [vmem:[%s9169_s1 + $0x524] ss:$16 sps:$4 sm:$0xff]  }
  0x41   :  { %3308 = vmatprep.subr.bf16.mxu1 %v5997_v5  ;;  %v6081_v5 = vld [vmem:[%s9169_s1 + $0x724] ss:$16 sps:$4 sm:$0xff]  }
  0x42   :  { %3218 = vmatmul.mubr.bf16.vlgmr.msra.gmra.mxu0 %v7151_v6 }
  0x43   :  { %3259 = vmatmul.mubr.bf16.vlgmr.msra.gmra.mxu1 %v7153_v7  ;;  %3268 = vmatpush1.bf16.msra.mxu0 %v5992_v8  ;;  %v6076_v8 = vld [vmem:[%s9169_s1 + $0x520] ss:$16 sps:$4 sm:$0xff]  }
  0x44   :  { %3309 = vmatpush1.bf16.msra.mxu1 %v5995_v9  ;;  %3269 = vmatprep.subr.bf16.mxu0 %v6000_v10  ;;  %v6079_v9 = vld [vmem:[%s9169_s1 + $0x720] ss:$16 sps:$4 sm:$0xff]   ;;  %v6084_v10 = vld [vmem:[%s9169_s1 + $0x504] ss:$16 sps:$4 sm:$0xff]  }
  0x45   :  { %3310 = vmatprep.subr.bf16.mxu1 %v6003_v11  ;;  %3299 = vmatprep.mubr.bf16.mxu0 %v7247_v36  ;;  %v6087_v11 = vld [vmem:[%s9169_s1 + $0x704] ss:$16 sps:$4 sm:$0xff]  }
  0x46   :  { %3340 = vmatprep.mubr.bf16.mxu1 %v7251_v37 }
  0x47   :  { %3270 = vmatpush1.bf16.msra.mxu0 %v5998_v12  ;;  %v6082_v12 = vld [vmem:[%s9169_s1 + $0x500] ss:$16 sps:$4 sm:$0xff]  }
  0x48   :  { %3311 = vmatpush1.bf16.msra.mxu1 %v6001_v13  ;;  %3271 = vmatprep.subr.bf16.mxu0 %v6006_v14  ;;  %v6085_v13 = vld [vmem:[%s9169_s1 + $0x700] ss:$16 sps:$4 sm:$0xff]   ;;  %v6094_v14 = vld [vmem:[%s9169_s1 + $0x8e4] ss:$16 sps:$4 sm:$0xff]  }
  0x49   :  { %3312 = vmatprep.subr.bf16.mxu1 %v6009_v15  ;;  %v6097_v15 = vld [vmem:[%s9169_s1 + $0xae4] ss:$16 sps:$4 sm:$0xff]  }
  0x4b   :  { %3272 = vmatpush1.bf16.msra.mxu0 %v6004_v16  ;;  %v7371_v16 = vcombine.low %v7232_v32, %v7232_v32  ;;  %v6112_v32 = vld [vmem:[%s9169_s1 + $0x884] ss:$16 sps:$4 sm:$0xff]  }
  0x4c   :  { %3313 = vmatpush1.bf16.msra.mxu1 %v6007_v17  ;;  %3273 = vmatprep.subr.bf16.mxu0 %v6012_v18  ;;  %v7375_v17 = vcombine.low %v7237_v33, %v7237_v33  ;;  %v6092_v18 = vld [vmem:[%s9169_s1 + $0x8e0] ss:$16 sps:$4 sm:$0xff]   ;;  %v6115_v33 = vld [vmem:[%s9169_s1 + $0xa84] ss:$16 sps:$4 sm:$0xff]  }
  0x4d   :  { %3314 = vmatprep.subr.bf16.mxu1 %v6015_v19  ;;  %v6095_v19 = vld [vmem:[%s9169_s1 + $0xae0] ss:$16 sps:$4 sm:$0xff]  }
  0x4f   :  { %3274 = vmatpush1.bf16.msra.mxu0 %v6010_v20  ;;  %v6100_v20 = vld [vmem:[%s9169_s1 + $0x8c4] ss:$16 sps:$4 sm:$0xff]  }
  0x50   :  { %3315 = vmatpush1.bf16.msra.mxu1 %v6013_v21  ;;  %3275 = vmatprep.subr.bf16.mxu0 %v6018_v22  ;;  %v6103_v21 = vld [vmem:[%s9169_s1 + $0xac4] ss:$16 sps:$4 sm:$0xff]  }
  0x51   :  { %3316 = vmatprep.subr.bf16.mxu1 %v6021_v23  ;;  %v7392_v22 = vld [vmem:[%s9170_s0 + $0x20] sm:$0xff]  ;;  %v7397_v23 = vld [vmem:[%s9170_s0 + $0x28] sm:$0xff] }
  0x53   :  { %3276 = vmatpush1.bf16.msra.mxu0 %v6016_v24  ;;  %v7401_v24 = vcombine.high %v7392_v22, %v7392_v22 }
  0x54   :  { %3317 = vmatpush1.bf16.msra.mxu1 %v6019_v25  ;;  %3277 = vmatprep.subr.bf16.mxu0 %v6024_v26  ;;  %v7405_v25 = vcombine.high %v7397_v23, %v7397_v23  ;;  %v6098_v26 = vld [vmem:[%s9169_s1 + $0x8c0] ss:$16 sps:$4 sm:$0xff]  }
  0x55   :  { %3318 = vmatprep.subr.bf16.mxu1 %v6027_v27  ;;  %v6101_v27 = vld [vmem:[%s9169_s1 + $0xac0] ss:$16 sps:$4 sm:$0xff]  }
  0x57   :  { %3278 = vmatpush1.bf16.msra.mxu0 %v6022_v28  ;;  %v6106_v28 = vld [vmem:[%s9169_s1 + $0x8a4] ss:$16 sps:$4 sm:$0xff]  }
  0x58   :  { %3319 = vmatpush1.bf16.msra.mxu1 %v6025_v29  ;;  %3279 = vmatprep.subr.bf16.mxu0 %v6030_v30  ;;  %v6109_v29 = vld [vmem:[%s9169_s1 + $0xaa4] ss:$16 sps:$4 sm:$0xff]   ;;  %v6104_v30 = vld [vmem:[%s9169_s1 + $0x8a0] ss:$16 sps:$4 sm:$0xff]  }
  0x59   :  { %3320 = vmatprep.subr.bf16.mxu1 %v6033_v31  ;;  %v6107_v31 = vld [vmem:[%s9169_s1 + $0xaa0] ss:$16 sps:$4 sm:$0xff]  }
  0x5b   :  { %3280 = vmatpush1.bf16.msra.mxu0 %v6028_v34  ;;  %v6110_v34 = vld [vmem:[%s9169_s1 + $0x880] ss:$16 sps:$4 sm:$0xff]  }
  0x5c   :  { %3321 = vmatpush1.bf16.msra.mxu1 %v6031_v35  ;;  %3281 = vmatprep.subr.bf16.mxu0 %v6036_v38  ;;  %v6113_v35 = vld [vmem:[%s9169_s1 + $0xa80] ss:$16 sps:$4 sm:$0xff]   ;;  %v6118_v38 = vld [vmem:[%s9169_s1 + $0x864] ss:$16 sps:$4 sm:$0xff]  }
  0x5d   :  { %3322 = vmatprep.subr.bf16.mxu1 %v6039_v39  ;;  %v6121_v39 = vld [vmem:[%s9169_s1 + $0xa64] ss:$16 sps:$4 sm:$0xff]  }
  0x5f   :  { %3282 = vmatpush1.bf16.msra.mxu0 %v6034_v40  ;;  %v6116_v40 = vld [vmem:[%s9169_s1 + $0x860] ss:$16 sps:$4 sm:$0xff]  }
  0x60   :  { %3323 = vmatpush1.bf16.msra.mxu1 %v6037_v41  ;;  %3283 = vmatprep.subr.bf16.mxu0 %v6042_v42  ;;  %v6119_v41 = vld [vmem:[%s9169_s1 + $0xa60] ss:$16 sps:$4 sm:$0xff]   ;;  %v6124_v42 = vld [vmem:[%s9169_s1 + $0x844] ss:$16 sps:$4 sm:$0xff]  }
  0x61   :  { %3324 = vmatprep.subr.bf16.mxu1 %v6045_v43  ;;  %v6127_v43 = vld [vmem:[%s9169_s1 + $0xa44] ss:$16 sps:$4 sm:$0xff]  }
  0x63   :  { %3284 = vmatpush2.bf16.msra.mxu0 %v6040_v44  ;;  %v6122_v44 = vld [vmem:[%s9169_s1 + $0x840] ss:$16 sps:$4 sm:$0xff]  }
  0x64   :  { %3325 = vmatpush2.bf16.msra.mxu1 %v6043_v45  ;;  %3285 = vmatprep.subr.bf16.mxu0 %v6048_v46  ;;  %v6125_v45 = vld [vmem:[%s9169_s1 + $0xa40] ss:$16 sps:$4 sm:$0xff]   ;;  %v6130_v46 = vld [vmem:[%s9169_s1 + $0x824] ss:$16 sps:$4 sm:$0xff]  }
  0x65   :  { %3326 = vmatprep.subr.bf16.mxu1 %v6051_v48  ;;  %v6133_v48 = vld [vmem:[%s9169_s1 + $0xa24] ss:$16 sps:$4 sm:$0xff]  }
  0x67   :  { %3286 = vmatpush2.bf16.msra.mxu0 %v6046_v49  ;;  %v6128_v49 = vld [vmem:[%s9169_s1 + $0x820] ss:$16 sps:$4 sm:$0xff]  }
  0x68   :  { %3327 = vmatpush2.bf16.msra.mxu1 %v6049_v50  ;;  %3287 = vmatprep.subr.bf16.mxu0 %v6054_v52  ;;  %v6131_v50 = vld [vmem:[%s9169_s1 + $0xa20] ss:$16 sps:$4 sm:$0xff]   ;;  %v6136_v52 = vld [vmem:[%s9169_s1 + $0x804] ss:$16 sps:$4 sm:$0xff]  }
  0x69   :  { %3328 = vmatprep.subr.bf16.mxu1 %v6057_v53  ;;  %v6139_v53 = vld [vmem:[%s9169_s1 + $0xa04] ss:$16 sps:$4 sm:$0xff]  }
  0x6b   :  { %3288 = vmatpush2.bf16.msra.mxu0 %v6052_v54  ;;  %v6134_v54 = vld [vmem:[%s9169_s1 + $0x800] ss:$16 sps:$4 sm:$0xff]  }
  0x6c   :  { %3329 = vmatpush2.bf16.msra.mxu1 %v6055_v55  ;;  %3289 = vmatprep.subr.bf16.mxu0 %v6060_v56  ;;  %v6137_v55 = vld [vmem:[%s9169_s1 + $0xa00] ss:$16 sps:$4 sm:$0xff]   ;;  %v6142_v56 = vld [vmem:[%s9169_s1 + $0x9e4] ss:$16 sps:$4 sm:$0xff]  }
  0x6d   :  { %3330 = vmatprep.subr.bf16.mxu1 %v6063_v57  ;;  %v6145_v57 = vld [vmem:[%s9169_s1 + $0xbe4] ss:$16 sps:$4 sm:$0xff]  }
  0x6f   :  { %3290 = vmatpush2.bf16.msra.mxu0 %v6058_v58  ;;  %v6140_v58 = vld [vmem:[%s9169_s1 + $0x9e0] ss:$16 sps:$4 sm:$0xff]  }
  0x70   :  { %3331 = vmatpush2.bf16.msra.mxu1 %v6061_v59  ;;  %3291 = vmatprep.subr.bf16.mxu0 %v6066_v60  ;;  %v6143_v59 = vld [vmem:[%s9169_s1 + $0xbe0] ss:$16 sps:$4 sm:$0xff]   ;;  %v6148_v60 = vld [vmem:[%s9169_s1 + $0x9c4] ss:$16 sps:$4 sm:$0xff]  }
  0x71   :  { %3332 = vmatprep.subr.bf16.mxu1 %v6069_v61  ;;  %v6151_v61 = vld [vmem:[%s9169_s1 + $0xbc4] ss:$16 sps:$4 sm:$0xff]  }
  0x73   :  { %3292 = vmatpush2.bf16.msra.mxu0 %v6064_v62  ;;  %v6146_v62 = vld [vmem:[%s9169_s1 + $0x9c0] ss:$16 sps:$4 sm:$0xff]  }
  0x74   :  { %3333 = vmatpush2.bf16.msra.mxu1 %v6067_v63  ;;  %3293 = vmatprep.subr.bf16.mxu0 %v6072_v0  ;;  %v6149_v63 = vld [vmem:[%s9169_s1 + $0xbc0] ss:$16 sps:$4 sm:$0xff]   ;;  %v6154_v0 = vld [vmem:[%s9169_s1 + $0x9a4] ss:$16 sps:$4 sm:$0xff]  }
  0x75   :  { %3334 = vmatprep.subr.bf16.mxu1 %v6075_v1  ;;  %v6157_v1 = vld [vmem:[%s9169_s1 + $0xba4] ss:$16 sps:$4 sm:$0xff]  }
  0x77   :  { %3294 = vmatpush2.bf16.msra.mxu0 %v6070_v2  ;;  %v6152_v2 = vld [vmem:[%s9169_s1 + $0x9a0] ss:$16 sps:$4 sm:$0xff]  }
  0x78   :  { %3335 = vmatpush2.bf16.msra.mxu1 %v6073_v3  ;;  %3295 = vmatprep.subr.bf16.mxu0 %v6078_v4  ;;  %v6155_v3 = vld [vmem:[%s9169_s1 + $0xba0] ss:$16 sps:$4 sm:$0xff]   ;;  %v6160_v4 = vld [vmem:[%s9169_s1 + $0x984] ss:$16 sps:$4 sm:$0xff]  }
  0x79   :  { %3336 = vmatprep.subr.bf16.mxu1 %v6081_v5  ;;  %v6163_v5 = vld [vmem:[%s9169_s1 + $0xb84] ss:$16 sps:$4 sm:$0xff]  }
  0x7b   :  { %3296 = vmatpush2.bf16.msra.mxu0 %v6076_v8  ;;  %v6158_v8 = vld [vmem:[%s9169_s1 + $0x980] ss:$16 sps:$4 sm:$0xff]  }
  0x7c   :  { %3337 = vmatpush2.bf16.msra.mxu1 %v6079_v9  ;;  %3297 = vmatprep.subr.bf16.mxu0 %v6084_v10  ;;  %v6161_v9 = vld [vmem:[%s9169_s1 + $0xb80] ss:$16 sps:$4 sm:$0xff]   ;;  %v6166_v10 = vld [vmem:[%s9169_s1 + $0x964] ss:$16 sps:$4 sm:$0xff]  }
  0x7d   :  { %3338 = vmatprep.subr.bf16.mxu1 %v6087_v11  ;;  %v6169_v11 = vld [vmem:[%s9169_s1 + $0xb64] ss:$16 sps:$4 sm:$0xff]  }
  0x7f   :  { %3298 = vmatpush2.bf16.msra.mxu0 %v6082_v12  ;;  %v6164_v12 = vld [vmem:[%s9169_s1 + $0x960] ss:$16 sps:$4 sm:$0xff]  }
  0x80   :  { %3339 = vmatpush2.bf16.msra.mxu1 %v6085_v13  ;;  %3349 = vmatprep.subr.bf16.mxu0 %v6094_v14  ;;  %v6167_v13 = vld [vmem:[%s9169_s1 + $0xb60] ss:$16 sps:$4 sm:$0xff]   ;;  %v6172_v14 = vld [vmem:[%s9169_s1 + $0x944] ss:$16 sps:$4 sm:$0xff]  }
  0x81   :  { %3390 = vmatprep.subr.bf16.mxu1 %v6097_v15  ;;  %v6175_v15 = vld [vmem:[%s9169_s1 + $0xb44] ss:$16 sps:$4 sm:$0xff]  }
  0x82   :  { %3300 = vmatmul.mubr.bf16.vlgmr.msra.gmra.mxu0 %v7371_v16 }
  0x83   :  { %3341 = vmatmul.mubr.bf16.vlgmr.msra.gmra.mxu1 %v7375_v17  ;;  %3350 = vmatpush1.bf16.msra.mxu0 %v6092_v18  ;;  %v6170_v18 = vld [vmem:[%s9169_s1 + $0x940] ss:$16 sps:$4 sm:$0xff]  }
  0x84   :  { %3391 = vmatpush1.bf16.msra.mxu1 %v6095_v19  ;;  %3351 = vmatprep.subr.bf16.mxu0 %v6100_v20  ;;  %v6173_v19 = vld [vmem:[%s9169_s1 + $0xb40] ss:$16 sps:$4 sm:$0xff]   ;;  %v6178_v20 = vld [vmem:[%s9169_s1 + $0x924] ss:$16 sps:$4 sm:$0xff]  }
  0x85   :  { %3392 = vmatprep.subr.bf16.mxu1 %v6103_v21  ;;  %3381 = vmatprep.mubr.bf16.mxu0 %v7401_v24  ;;  %v6181_v21 = vld [vmem:[%s9169_s1 + $0xb24] ss:$16 sps:$4 sm:$0xff]  }
  0x86   :  { %3422 = vmatprep.mubr.bf16.mxu1 %v7405_v25 }
  0x87   :  { %3352 = vmatpush1.bf16.msra.mxu0 %v6098_v26  ;;  %v6176_v26 = vld [vmem:[%s9169_s1 + $0x920] ss:$16 sps:$4 sm:$0xff]  }
  0x88   :  { %3393 = vmatpush1.bf16.msra.mxu1 %v6101_v27  ;;  %3353 = vmatprep.subr.bf16.mxu0 %v6106_v28  ;;  %v6179_v27 = vld [vmem:[%s9169_s1 + $0xb20] ss:$16 sps:$4 sm:$0xff]   ;;  %v6184_v28 = vld [vmem:[%s9169_s1 + $0x904] ss:$16 sps:$4 sm:$0xff]  }
  0x89   :  { %3394 = vmatprep.subr.bf16.mxu1 %v6109_v29  ;;  %v6187_v29 = vld [vmem:[%s9169_s1 + $0xb04] ss:$16 sps:$4 sm:$0xff]  }
  0x8b   :  { %3354 = vmatpush1.bf16.msra.mxu0 %v6104_v30  ;;  %v6182_v30 = vld [vmem:[%s9169_s1 + $0x900] ss:$16 sps:$4 sm:$0xff]  }
  0x8c   :  { %3395 = vmatpush1.bf16.msra.mxu1 %v6107_v31  ;;  %3355 = vmatprep.subr.bf16.mxu0 %v6112_v32  ;;  %v6185_v31 = vld [vmem:[%s9169_s1 + $0xb00] ss:$16 sps:$4 sm:$0xff]   ;;  %v6194_v32 = vld [vmem:[%s9169_s1 + $0xce4] ss:$16 sps:$4 sm:$0xff]  }
  0x8d   :  { %3396 = vmatprep.subr.bf16.mxu1 %v6115_v33  ;;  %v6197_v33 = vld [vmem:[%s9169_s1 + $0xee4] ss:$16 sps:$4 sm:$0xff]  }
  0x8f   :  { %3356 = vmatpush1.bf16.msra.mxu0 %v6110_v34  ;;  %v6192_v34 = vld [vmem:[%s9169_s1 + $0xce0] ss:$16 sps:$4 sm:$0xff]  }
  0x90   :  { %3397 = vmatpush1.bf16.msra.mxu1 %v6113_v35  ;;  %3357 = vmatprep.subr.bf16.mxu0 %v6118_v38  ;;  %v7597_v35 = vld [vmem:[%s9170_s0 + $0x30] sm:$0xff]  ;;  %v7601_v38 = vcombine.low %v7392_v22, %v7392_v22 }
  0x91   :  { %3398 = vmatprep.subr.bf16.mxu1 %v6121_v39  ;;  %v7605_v39 = vcombine.low %v7397_v23, %v7397_v23  ;;  %v6200_v22 = vld [vmem:[%s9169_s1 + $0xcc4] ss:$16 sps:$4 sm:$0xff]  }
  0x92   :  { %v6203_v23 = vld [vmem:[%s9169_s1 + $0xec4] ss:$16 sps:$4 sm:$0xff]  }
  0x93   :  { %3358 = vmatpush1.bf16.msra.mxu0 %v6116_v40  ;;  %v7610_v40 = vld [vmem:[%s9170_s0 + $0x38] sm:$0xff] }
  0x94   :  { %3399 = vmatpush1.bf16.msra.mxu1 %v6119_v41  ;;  %3359 = vmatprep.subr.bf16.mxu0 %v6124_v42  ;;  %v6195_v41 = vld [vmem:[%s9169_s1 + $0xee0] ss:$16 sps:$4 sm:$0xff]   ;;  %v7623_v42 = vcombine.high %v7597_v35, %v7597_v35 }
  0x95   :  { %3400 = vmatprep.subr.bf16.mxu1 %v6127_v43  ;;  %v7627_v43 = vcombine.high %v7610_v40, %v7610_v40 }
  0x97   :  { %3360 = vmatpush1.bf16.msra.mxu0 %v6122_v44  ;;  %v6198_v44 = vld [vmem:[%s9169_s1 + $0xcc0] ss:$16 sps:$4 sm:$0xff]  }
  0x98   :  { %3401 = vmatpush1.bf16.msra.mxu1 %v6125_v45  ;;  %3361 = vmatprep.subr.bf16.mxu0 %v6130_v46  ;;  %v6201_v45 = vld [vmem:[%s9169_s1 + $0xec0] ss:$16 sps:$4 sm:$0xff]   ;;  %v6206_v46 = vld [vmem:[%s9169_s1 + $0xca4] ss:$16 sps:$4 sm:$0xff]  }
  0x99   :  { %3402 = vmatprep.subr.bf16.mxu1 %v6133_v48  ;;  %v6209_v48 = vld [vmem:[%s9169_s1 + $0xea4] ss:$16 sps:$4 sm:$0xff]  }
  0x9b   :  { %3362 = vmatpush1.bf16.msra.mxu0 %v6128_v49  ;;  %v6204_v49 = vld [vmem:[%s9169_s1 + $0xca0] ss:$16 sps:$4 sm:$0xff]  }
  0x9c   :  { %3403 = vmatpush1.bf16.msra.mxu1 %v6131_v50  ;;  %3363 = vmatprep.subr.bf16.mxu0 %v6136_v52  ;;  %v6207_v50 = vld [vmem:[%s9169_s1 + $0xea0] ss:$16 sps:$4 sm:$0xff]   ;;  %v6212_v52 = vld [vmem:[%s9169_s1 + $0xc84] ss:$16 sps:$4 sm:$0xff]  }
  0x9d   :  { %3404 = vmatprep.subr.bf16.mxu1 %v6139_v53  ;;  %v6215_v53 = vld [vmem:[%s9169_s1 + $0xe84] ss:$16 sps:$4 sm:$0xff]  }
  0x9f   :  { %3364 = vmatpush1.bf16.msra.mxu0 %v6134_v54  ;;  %v6210_v54 = vld [vmem:[%s9169_s1 + $0xc80] ss:$16 sps:$4 sm:$0xff]  }
  0xa0   :  { %3405 = vmatpush1.bf16.msra.mxu1 %v6137_v55  ;;  %3365 = vmatprep.subr.bf16.mxu0 %v6142_v56  ;;  %v6213_v55 = vld [vmem:[%s9169_s1 + $0xe80] ss:$16 sps:$4 sm:$0xff]   ;;  %v6218_v56 = vld [vmem:[%s9169_s1 + $0xc64] ss:$16 sps:$4 sm:$0xff]  }
  0xa1   :  { %3406 = vmatprep.subr.bf16.mxu1 %v6145_v57  ;;  %v6221_v57 = vld [vmem:[%s9169_s1 + $0xe64] ss:$16 sps:$4 sm:$0xff]  }
  0xa3   :  { %3366 = vmatpush2.bf16.msra.mxu0 %v6140_v58  ;;  %v6216_v58 = vld [vmem:[%s9169_s1 + $0xc60] ss:$16 sps:$4 sm:$0xff]  }
  0xa4   :  { %3407 = vmatpush2.bf16.msra.mxu1 %v6143_v59  ;;  %3367 = vmatprep.subr.bf16.mxu0 %v6148_v60  ;;  %v6219_v59 = vld [vmem:[%s9169_s1 + $0xe60] ss:$16 sps:$4 sm:$0xff]   ;;  %v6224_v60 = vld [vmem:[%s9169_s1 + $0xc44] ss:$16 sps:$4 sm:$0xff]  }
  0xa5   :  { %3408 = vmatprep.subr.bf16.mxu1 %v6151_v61  ;;  %v6227_v61 = vld [vmem:[%s9169_s1 + $0xe44] ss:$16 sps:$4 sm:$0xff]  }
  0xa7   :  { %3368 = vmatpush2.bf16.msra.mxu0 %v6146_v62  ;;  %v6222_v62 = vld [vmem:[%s9169_s1 + $0xc40] ss:$16 sps:$4 sm:$0xff]  }
  0xa8   :  { %3409 = vmatpush2.bf16.msra.mxu1 %v6149_v63  ;;  %3369 = vmatprep.subr.bf16.mxu0 %v6154_v0  ;;  %v6225_v63 = vld [vmem:[%s9169_s1 + $0xe40] ss:$16 sps:$4 sm:$0xff]   ;;  %v6230_v0 = vld [vmem:[%s9169_s1 + $0xc24] ss:$16 sps:$4 sm:$0xff]  }
  0xa9   :  { %3410 = vmatprep.subr.bf16.mxu1 %v6157_v1  ;;  %v6233_v1 = vld [vmem:[%s9169_s1 + $0xe24] ss:$16 sps:$4 sm:$0xff]  }
  0xab   :  { %3370 = vmatpush2.bf16.msra.mxu0 %v6152_v2  ;;  %v6228_v2 = vld [vmem:[%s9169_s1 + $0xc20] ss:$16 sps:$4 sm:$0xff]  }
  0xac   :  { %3411 = vmatpush2.bf16.msra.mxu1 %v6155_v3  ;;  %3371 = vmatprep.subr.bf16.mxu0 %v6160_v4  ;;  %v6231_v3 = vld [vmem:[%s9169_s1 + $0xe20] ss:$16 sps:$4 sm:$0xff]   ;;  %v6236_v4 = vld [vmem:[%s9169_s1 + $0xc04] ss:$16 sps:$4 sm:$0xff]  }
  0xad   :  { %3412 = vmatprep.subr.bf16.mxu1 %v6163_v5  ;;  %v6239_v5 = vld [vmem:[%s9169_s1 + $0xe04] ss:$16 sps:$4 sm:$0xff]  }
  0xaf   :  { %3372 = vmatpush2.bf16.msra.mxu0 %v6158_v8  ;;  %v6234_v8 = vld [vmem:[%s9169_s1 + $0xc00] ss:$16 sps:$4 sm:$0xff]  }
  0xb0   :  { %3413 = vmatpush2.bf16.msra.mxu1 %v6161_v9  ;;  %3373 = vmatprep.subr.bf16.mxu0 %v6166_v10  ;;  %v6237_v9 = vld [vmem:[%s9169_s1 + $0xe00] ss:$16 sps:$4 sm:$0xff]   ;;  %v6242_v10 = vld [vmem:[%s9169_s1 + $0xde4] ss:$16 sps:$4 sm:$0xff]  }
  0xb1   :  { %3414 = vmatprep.subr.bf16.mxu1 %v6169_v11  ;;  %v6245_v11 = vld [vmem:[%s9169_s1 + $0xfe4] ss:$16 sps:$4 sm:$0xff]  }
  0xb3   :  { %3374 = vmatpush2.bf16.msra.mxu0 %v6164_v12  ;;  %v6240_v12 = vld [vmem:[%s9169_s1 + $0xde0] ss:$16 sps:$4 sm:$0xff]  }
  0xb4   :  { %3415 = vmatpush2.bf16.msra.mxu1 %v6167_v13  ;;  %3375 = vmatprep.subr.bf16.mxu0 %v6172_v14  ;;  %v6243_v13 = vld [vmem:[%s9169_s1 + $0xfe0] ss:$16 sps:$4 sm:$0xff]   ;;  %v6248_v14 = vld [vmem:[%s9169_s1 + $0xdc4] ss:$16 sps:$4 sm:$0xff]  }
  0xb5   :  { %3416 = vmatprep.subr.bf16.mxu1 %v6175_v15  ;;  %v6251_v15 = vld [vmem:[%s9169_s1 + $0xfc4] ss:$16 sps:$4 sm:$0xff]  }
  0xb7   :  { %3376 = vmatpush2.bf16.msra.mxu0 %v6170_v18  ;;  %v6246_v18 = vld [vmem:[%s9169_s1 + $0xdc0] ss:$16 sps:$4 sm:$0xff]  }
  0xb8   :  { %3417 = vmatpush2.bf16.msra.mxu1 %v6173_v19  ;;  %3377 = vmatprep.subr.bf16.mxu0 %v6178_v20  ;;  %v6249_v19 = vld [vmem:[%s9169_s1 + $0xfc0] ss:$16 sps:$4 sm:$0xff]   ;;  %v6254_v20 = vld [vmem:[%s9169_s1 + $0xda4] ss:$16 sps:$4 sm:$0xff]  }
  0xb9   :  { %3418 = vmatprep.subr.bf16.mxu1 %v6181_v21  ;;  %v6257_v21 = vld [vmem:[%s9169_s1 + $0xfa4] ss:$16 sps:$4 sm:$0xff]  }
  0xbb   :  { %3378 = vmatpush2.bf16.msra.mxu0 %v6176_v26  ;;  %v6252_v26 = vld [vmem:[%s9169_s1 + $0xda0] ss:$16 sps:$4 sm:$0xff]  }
  0xbc   :  { %3419 = vmatpush2.bf16.msra.mxu1 %v6179_v27  ;;  %3379 = vmatprep.subr.bf16.mxu0 %v6184_v28  ;;  %v6255_v27 = vld [vmem:[%s9169_s1 + $0xfa0] ss:$16 sps:$4 sm:$0xff]   ;;  %v6260_v28 = vld [vmem:[%s9169_s1 + $0xd84] ss:$16 sps:$4 sm:$0xff]  }
  0xbd   :  { %3420 = vmatprep.subr.bf16.mxu1 %v6187_v29  ;;  %v6263_v29 = vld [vmem:[%s9169_s1 + $0xf84] ss:$16 sps:$4 sm:$0xff]  }
  0xbf   :  { %3380 = vmatpush2.bf16.msra.mxu0 %v6182_v30  ;;  %v6258_v30 = vld [vmem:[%s9169_s1 + $0xd80] ss:$16 sps:$4 sm:$0xff]  }
  0xc0   :  { %3421 = vmatpush2.bf16.msra.mxu1 %v6185_v31  ;;  %3431 = vmatprep.subr.bf16.mxu0 %v6194_v32  ;;  %v6261_v31 = vld [vmem:[%s9169_s1 + $0xf80] ss:$16 sps:$4 sm:$0xff]   ;;  %v6266_v32 = vld [vmem:[%s9169_s1 + $0xd64] ss:$16 sps:$4 sm:$0xff]  }
  0xc1   :  { %3472 = vmatprep.subr.bf16.mxu1 %v6197_v33  ;;  %v6269_v33 = vld [vmem:[%s9169_s1 + $0xf64] ss:$16 sps:$4 sm:$0xff]  }
  0xc2   :  { %3382 = vmatmul.mubr.bf16.vlgmr.msra.gmra.mxu0 %v7601_v38 }
  0xc3   :  { %3423 = vmatmul.mubr.bf16.vlgmr.msra.gmra.mxu1 %v7605_v39  ;;  %3432 = vmatpush1.bf16.msra.mxu0 %v6192_v34  ;;  %v6264_v34 = vld [vmem:[%s9169_s1 + $0xd60] ss:$16 sps:$4 sm:$0xff]  }
  0xc4   :  { %3473 = vmatpush1.bf16.msra.mxu1 %v6195_v41  ;;  %3433 = vmatprep.subr.bf16.mxu0 %v6200_v22  ;;  %v6267_v41 = vld [vmem:[%s9169_s1 + $0xf60] ss:$16 sps:$4 sm:$0xff]   ;;  %v6272_v22 = vld [vmem:[%s9169_s1 + $0xd44] ss:$16 sps:$4 sm:$0xff]  }
  0xc5   :  { %3474 = vmatprep.subr.bf16.mxu1 %v6203_v23  ;;  %3463 = vmatprep.mubr.bf16.mxu0 %v7623_v42  ;;  %v6275_v23 = vld [vmem:[%s9169_s1 + $0xf44] ss:$16 sps:$4 sm:$0xff]  }
  0xc6   :  { %3504 = vmatprep.mubr.bf16.mxu1 %v7627_v43 }
  0xc7   :  { %3434 = vmatpush1.bf16.msra.mxu0 %v6198_v44  ;;  %v6270_v44 = vld [vmem:[%s9169_s1 + $0xd40] ss:$16 sps:$4 sm:$0xff]  }
  0xc8   :  { %3475 = vmatpush1.bf16.msra.mxu1 %v6201_v45  ;;  %3435 = vmatprep.subr.bf16.mxu0 %v6206_v46  ;;  %v6273_v45 = vld [vmem:[%s9169_s1 + $0xf40] ss:$16 sps:$4 sm:$0xff]   ;;  %v549_v46 = vlaneseq }
  0xc9   :  { %3476 = vmatprep.subr.bf16.mxu1 %v6209_v48  ;;  %v6278_v48 = vld [vmem:[%s9169_s1 + $0xd24] ss:$16 sps:$4 sm:$0xff]  }
  0xcb   :  { %3436 = vmatpush1.bf16.msra.mxu0 %v6204_v49  ;;  %v6281_v49 = vld [vmem:[%s9169_s1 + $0xf24] ss:$16 sps:$4 sm:$0xff]  }
  0xcc   :  { %3477 = vmatpush1.bf16.msra.mxu1 %v6207_v50  ;;  %3437 = vmatprep.subr.bf16.mxu0 %v6212_v52  ;;  %v6276_v50 = vld [vmem:[%s9169_s1 + $0xd20] ss:$16 sps:$4 sm:$0xff]  }
  0xcd   :  { %3478 = vmatprep.subr.bf16.mxu1 %v6215_v53  ;;  %v6279_v52 = vld [vmem:[%s9169_s1 + $0xf20] ss:$16 sps:$4 sm:$0xff]   ;;  %v7795_v53 = vshrl.u32 %v549_v46, 7  ;;  %v6325_v46 = vld [vmem:[%s9169_s1 + $0x248] ss:$16 sps:$4 sm:$0xff]  }
  0xcf   :  { %3438 = vmatpush1.bf16.msra.mxu0 %v6210_v54  ;;  %v6284_v54 = vld [vmem:[%s9169_s1 + $0xd04] ss:$16 sps:$4 sm:$0xff]  }
  0xd0   :  { %3479 = vmatpush1.bf16.msra.mxu1 %v6213_v55  ;;  %3439 = vmatprep.subr.bf16.mxu0 %v6218_v56  ;;  %v6287_v55 = vld [vmem:[%s9169_s1 + $0xf04] ss:$16 sps:$4 sm:$0xff]   ;;  %v6282_v56 = vld [vmem:[%s9169_s1 + $0xd00] ss:$16 sps:$4 sm:$0xff]  }
  0xd1   :  { %3480 = vmatprep.subr.bf16.mxu1 %v6221_v57  ;;  %v6285_v57 = vld [vmem:[%s9169_s1 + $0xf00] ss:$16 sps:$4 sm:$0xff]  }
  0xd3   :  { %3440 = vmatpush1.bf16.msra.mxu0 %v6216_v58  ;;  %v547_v58 = vld [vmem:[%s9171_s2] sm:$0xf] }
  0xd4   :  { %3481 = vmatpush1.bf16.msra.mxu1 %v6219_v59  ;;  %3441 = vmatprep.subr.bf16.mxu0 %v6224_v60  ;;  %v551_v59 = vsub.s32 0, %v7795_v53  ;;  %v6294_v60 = vld [vmem:[%s9169_s1 + $0xec] ss:$16 sps:$4 sm:$0xff]  }
  0xd5   :  { %3482 = vmatprep.subr.bf16.mxu1 %v6227_v61  ;;  %v6297_v61 = vld [vmem:[%s9169_s1 + $0x2ec] ss:$16 sps:$4 sm:$0xff]  }
  0xd7   :  { %3442 = vmatpush1.bf16.msra.mxu0 %v6222_v62  ;;  %v555_v62 = vsub.s32 1, %v7795_v53 }
  0xd8   :  { %3483 = vmatpush1.bf16.msra.mxu1 %v6225_v63  ;;  %3443 = vmatprep.subr.bf16.mxu0 %v6230_v0  ;;  %v7822_v63 = vcombine.low %v7597_v35, %v7597_v35  ;;  %v7826_v0 = vcombine.low %v7610_v40, %v7610_v40  ;;  %v6300_v35 = vld [vmem:[%s9169_s1 + $0xcc] ss:$16 sps:$4 sm:$0xff]  }
  0xd9   :  { %3484 = vmatprep.subr.bf16.mxu1 %v6233_v1  ;;  %v6292_v1 = vld [vmem:[%s9169_s1 + $0xe8] ss:$16 sps:$4 sm:$0xff]   ;;  %v6303_v40 = vld [vmem:[%s9169_s1 + $0x2cc] ss:$16 sps:$4 sm:$0xff]  }
  0xdb   :  { %3444 = vmatpush1.bf16.msra.mxu0 %v6228_v2  ;;  %v552_v2 = vrot.slane %v547_v58, %v551_v59 }
  0xdc   :  { %3485 = vmatpush1.bf16.msra.mxu1 %v6231_v3  ;;  %3445 = vmatprep.subr.bf16.mxu0 %v6236_v4  ;;  %v6295_v3 = vld [vmem:[%s9169_s1 + $0x2e8] ss:$16 sps:$4 sm:$0xff]   ;;  %v556_v4 = vrot.slane %v547_v58, %v555_v62  ;;  %v6342_v58 = vld [vmem:[%s9169_s1 + $0x1ec] ss:$16 sps:$4 sm:$0xff]  }
  0xdd   :  { %3486 = vmatprep.subr.bf16.mxu1 %v6239_v5 }
  0xdf   :  { %3446 = vmatpush1.bf16.msra.mxu0 %v6234_v8 }
  0xe0   :  { %3487 = vmatpush1.bf16.msra.mxu1 %v6237_v9  ;;  %3447 = vmatprep.subr.bf16.mxu0 %v6242_v10  ;;  %v6298_v9 = vld [vmem:[%s9169_s1 + $0xc8] ss:$16 sps:$4 sm:$0xff]  }
  0xe1   :  { %3488 = vmatprep.subr.bf16.mxu1 %v6245_v11  ;;  %v6301_v11 = vld [vmem:[%s9169_s1 + $0x2c8] ss:$16 sps:$4 sm:$0xff]  }
  0xe3   :  { %3448 = vmatpush2.bf16.msra.mxu0 %v6240_v12 }
  0xe4   :  { %3489 = vmatpush2.bf16.msra.mxu1 %v6243_v13  ;;  %3449 = vmatprep.subr.bf16.mxu0 %v6248_v14  ;;  %v6306_v14 = vld [vmem:[%s9169_s1 + $0xac] ss:$16 sps:$4 sm:$0xff]  }
  0xe5   :  { %3490 = vmatprep.subr.bf16.mxu1 %v6251_v15  ;;  %v6309_v15 = vld [vmem:[%s9169_s1 + $0x2ac] ss:$16 sps:$4 sm:$0xff]  }
  0xe7   :  { %3450 = vmatpush2.bf16.msra.mxu0 %v6246_v18 }
  0xe8   :  { %3491 = vmatpush2.bf16.msra.mxu1 %v6249_v19  ;;  %3451 = vmatprep.subr.bf16.mxu0 %v6254_v20 }
  0xe9   :  { %3492 = vmatprep.subr.bf16.mxu1 %v6257_v21 }
  0xeb   :  { %3452 = vmatpush2.bf16.msra.mxu0 %v6252_v26  ;;  %v6304_v26 = vld [vmem:[%s9169_s1 + $0xa8] ss:$16 sps:$4 sm:$0xff]  }
  0xec   :  { %3493 = vmatpush2.bf16.msra.mxu1 %v6255_v27  ;;  %3453 = vmatprep.subr.bf16.mxu0 %v6260_v28  ;;  %v6307_v28 = vld [vmem:[%s9169_s1 + $0x2a8] ss:$16 sps:$4 sm:$0xff]  }
  0xed   :  { %3494 = vmatprep.subr.bf16.mxu1 %v6263_v29 }
  0xef   :  { %3454 = vmatpush2.bf16.msra.mxu0 %v6258_v30 }
  0xf0   :  { %3495 = vmatpush2.bf16.msra.mxu1 %v6261_v31  ;;  %3455 = vmatprep.subr.bf16.mxu0 %v6266_v32  ;;  %v6310_v31 = vld [vmem:[%s9169_s1 + $0x88] ss:$16 sps:$4 sm:$0xff]  }
  0xf1   :  { %3496 = vmatprep.subr.bf16.mxu1 %v6269_v33  ;;  %v6313_v32 = vld [vmem:[%s9169_s1 + $0x288] ss:$16 sps:$4 sm:$0xff]   ;;  %v6318_v33 = vld [vmem:[%s9169_s1 + $0x6c] ss:$16 sps:$4 sm:$0xff]  }
  0xf3   :  { %3456 = vmatpush2.bf16.msra.mxu0 %v6264_v34  ;;  %v6321_v34 = vld [vmem:[%s9169_s1 + $0x26c] ss:$16 sps:$4 sm:$0xff]  }
  0xf4   :  { %3497 = vmatpush2.bf16.msra.mxu1 %v6267_v41  ;;  %3457 = vmatprep.subr.bf16.mxu0 %v6272_v22  ;;  %v6316_v41 = vld [vmem:[%s9169_s1 + $0x68] ss:$16 sps:$4 sm:$0xff]  }
  0xf5   :  { %3498 = vmatprep.subr.bf16.mxu1 %v6275_v23  ;;  %v6319_v22 = vld [vmem:[%s9169_s1 + $0x268] ss:$16 sps:$4 sm:$0xff]   ;;  %v6324_v23 = vld [vmem:[%s9169_s1 + $0x4c] ss:$16 sps:$4 sm:$0xff]  }
  0xf7   :  { %3458 = vmatpush2.bf16.msra.mxu0 %v6270_v44  ;;  %v6327_v44 = vld [vmem:[%s9169_s1 + $0x24c] ss:$16 sps:$4 sm:$0xff]  }
  0xf8   :  { %3499 = vmatpush2.bf16.msra.mxu1 %v6273_v45  ;;  %3459 = vmatprep.subr.bf16.mxu0 %v6278_v48  ;;  %v6322_v45 = vld [vmem:[%s9169_s1 + $0x48] ss:$16 sps:$4 sm:$0xff]   ;;  %v6330_v48 = vld [vmem:[%s9169_s1 + $0x2c] ss:$16 sps:$4 sm:$0xff]  }
  0xf9   :  { %3500 = vmatprep.subr.bf16.mxu1 %v6281_v49  ;;  %v6333_v49 = vld [vmem:[%s9169_s1 + $0x22c] ss:$16 sps:$4 sm:$0xff]  }
  0xfb   :  { %3460 = vmatpush2.bf16.msra.mxu0 %v6276_v50  ;;  %v6328_v50 = vld [vmem:[%s9169_s1 + $0x28] ss:$16 sps:$4 sm:$0xff]  }
  0xfc   :  { %3501 = vmatpush2.bf16.msra.mxu1 %v6279_v52  ;;  %3461 = vmatprep.subr.bf16.mxu0 %v6284_v54  ;;  %v6331_v52 = vld [vmem:[%s9169_s1 + $0x228] ss:$16 sps:$4 sm:$0xff]   ;;  %v6336_v54 = vld [vmem:[%s9169_s1 + $0xc] ss:$16 sps:$4 sm:$0xff]  }
  0xfd   :  { %3502 = vmatprep.subr.bf16.mxu1 %v6287_v55  ;;  %v6339_v55 = vld [vmem:[%s9169_s1 + $0x20c] ss:$16 sps:$4 sm:$0xff]  }
  0xff   :  { %3462 = vmatpush2.bf16.msra.mxu0 %v6282_v56  ;;  %v6334_v56 = vld [vmem:[%s9169_s1 + $0x8] ss:$16 sps:$4 sm:$0xff]  }
 0x100   :  { %3503 = vmatpush2.bf16.msra.mxu1 %v6285_v57  ;;  %3513 = vmatprep.subr.bf16.mxu0 %v6294_v60  ;;  %v6337_v57 = vld [vmem:[%s9169_s1 + $0x208] ss:$16 sps:$4 sm:$0xff]   ;;  %v6345_v60 = vld [vmem:[%s9169_s1 + $0x3ec] ss:$16 sps:$4 sm:$0xff]  }
 0x101   :  { %3554 = vmatprep.subr.bf16.mxu1 %v6297_v61  ;;  %v6340_v61 = vld [vmem:[%s9169_s1 + $0x1e8] ss:$16 sps:$4 sm:$0xff]  }
 0x102   :  { %v3219_v5 = vpop.f32.mrf.mxu0  ;;  %3464 = vmatmul.mubr.bf16.vlgmr.msra.gmra.mxu0 %v7822_v63 }
 0x103   :  { %v3260_v8 = vpop.f32.mrf.mxu1  ;;  %3505 = vmatmul.mubr.bf16.vlgmr.msra.gmra.mxu1 %v7826_v0  ;;  %v3220_v10 = vadd.f32 %v3219_v5, %v552_v2  ;;  %3514 = vmatpush1.bf16.msra.mxu0 %v6292_v1  ;;  %v6343_v1 = vld [vmem:[%s9169_s1 + $0x3e8] ss:$16 sps:$4 sm:$0xff]   ;;  %v6348_v2 = vld [vmem:[%s9169_s1 + $0x1cc] ss:$16 sps:$4 sm:$0xff]  }
 0x104   :  { %3555 = vmatpush1.bf16.msra.mxu1 %v6295_v3  ;;  %v3221_v12 = vpop.f32.mrf.mxu0  ;;  %3515 = vmatprep.subr.bf16.mxu0 %v6300_v35  ;;  %v6351_v3 = vld [vmem:[%s9169_s1 + $0x3cc] ss:$16 sps:$4 sm:$0xff]   ;;  %v6346_v35 = vld [vmem:[%s9169_s1 + $0x1c8] ss:$16 sps:$4 sm:$0xff]  }
 0x105   :  { %v3262_v13 = vpop.f32.mrf.mxu1  ;;  %3556 = vmatprep.subr.bf16.mxu1 %v6303_v40  ;;  %v7858_v18 = vadd.f32 %v3260_v8, %v3220_v10  ;;  %v3222_v19 = vadd.f32 %v3221_v12, %v556_v4  ;;  %3545 = vmatprep.mubr.bf16.mxu0 %v7082_v47  ;;  %v6312_v47 = vld [vmem:[%s9169_s1 + $0x8c] ss:$16 sps:$4 sm:$0xff]   ;;  %v6349_v40 = vld [vmem:[%s9169_s1 + $0x3c8] ss:$16 sps:$4 sm:$0xff]  }
 0x106   :  { %3586 = vmatprep.mubr.bf16.mxu1 %v7093_v51  ;;  %v3223_v20 = vpop.f32.mrf.mxu0  ;;  %v6315_v51 = vld [vmem:[%s9169_s1 + $0x28c] ss:$16 sps:$4 sm:$0xff]   ;;  %v6352_v8 = vld [vmem:[%s9169_s1 + $0x1a8] ss:$16 sps:$4 sm:$0xff]  }
 0x107   :  { %v3264_v21 = vpop.f32.mrf.mxu1  ;;  %v7865_v27 = vadd.f32 %v3262_v13, %v3222_v19  ;;  %3516 = vmatpush1.bf16.msra.mxu0 %v6298_v9  ;;  %v6354_v4 = vld [vmem:[%s9169_s1 + $0x1ac] ss:$16 sps:$4 sm:$0xff]   ;;  %v6355_v9 = vld [vmem:[%s9169_s1 + $0x3a8] ss:$16 sps:$4 sm:$0xff]  }
 0x108   :  { %3557 = vmatpush1.bf16.msra.mxu1 %v6301_v11  ;;  %v3224_v29 = vpop.f32.mrf.mxu0  ;;  %3517 = vmatprep.subr.bf16.mxu0 %v6306_v14  ;;  %v6357_v5 = vld [vmem:[%s9169_s1 + $0x3ac] ss:$16 sps:$4 sm:$0xff]   ;;  %v6358_v12 = vld [vmem:[%s9169_s1 + $0x188] ss:$16 sps:$4 sm:$0xff]  }
 0x109   :  { %v3265_v30 = vpop.f32.mrf.mxu1  ;;  %3558 = vmatprep.subr.bf16.mxu1 %v6309_v15  ;;  %v6360_v10 = vld [vmem:[%s9169_s1 + $0x18c] ss:$16 sps:$4 sm:$0xff]   ;;  %v6361_v13 = vld [vmem:[%s9169_s1 + $0x388] ss:$16 sps:$4 sm:$0xff]  }
 0x10a   :  { %v6363_v11 = vld [vmem:[%s9169_s1 + $0x38c] ss:$16 sps:$4 sm:$0xff]   ;;  %v6364_v19 = vld [vmem:[%s9169_s1 + $0x168] ss:$16 sps:$4 sm:$0xff]  }
 0x10b   :  { %3518 = vmatpush1.bf16.msra.mxu0 %v6304_v26  ;;  %v6366_v14 = vld [vmem:[%s9169_s1 + $0x16c] ss:$16 sps:$4 sm:$0xff]   ;;  %v6367_v20 = vld [vmem:[%s9169_s1 + $0x368] ss:$16 sps:$4 sm:$0xff]  }
 0x10c   :  { %3559 = vmatpush1.bf16.msra.mxu1 %v6307_v28  ;;  %3519 = vmatprep.subr.bf16.mxu0 %v6312_v47  ;;  %v6369_v15 = vld [vmem:[%s9169_s1 + $0x36c] ss:$16 sps:$4 sm:$0xff]   ;;  %v6370_v28 = vld [vmem:[%s9169_s1 + $0x148] ss:$16 sps:$4 sm:$0xff]  }
 0x10d   :  { %3560 = vmatprep.subr.bf16.mxu1 %v6315_v51  ;;  %v6372_v21 = vld [vmem:[%s9169_s1 + $0x14c] ss:$16 sps:$4 sm:$0xff]   ;;  %v6373_v29 = vld [vmem:[%s9169_s1 + $0x348] ss:$16 sps:$4 sm:$0xff]  }
 0x10e   :  { %v6375_v26 = vld [vmem:[%s9169_s1 + $0x34c] ss:$16 sps:$4 sm:$0xff]   ;;  %v6376_v51 = vld [vmem:[%s9169_s1 + $0x128] ss:$16 sps:$4 sm:$0xff]  }
 0x10f   :  { %3520 = vmatpush1.bf16.msra.mxu0 %v6310_v31  ;;  %v6378_v30 = vld [vmem:[%s9169_s1 + $0x12c] ss:$16 sps:$4 sm:$0xff]   ;;  %v6379_v31 = vld [vmem:[%s9169_s1 + $0x328] ss:$16 sps:$4 sm:$0xff]  }
 0x110   :  { %3561 = vmatpush1.bf16.msra.mxu1 %v6313_v32  ;;  %3521 = vmatprep.subr.bf16.mxu0 %v6318_v33  ;;  %v6381_v47 = vld [vmem:[%s9169_s1 + $0x32c] ss:$16 sps:$4 sm:$0xff]  }
 0x111   :  { %3562 = vmatprep.subr.bf16.mxu1 %v6321_v34  ;;  %v6384_v32 = vld [vmem:[%s9169_s1 + $0x10c] ss:$16 sps:$4 sm:$0xff]   ;;  %v6382_v34 = vld [vmem:[%s9169_s1 + $0x108] ss:$16 sps:$4 sm:$0xff]  }
 0x112   :  { %v6387_v33 = vld [vmem:[%s9169_s1 + $0x30c] ss:$16 sps:$4 sm:$0xff]  }
 0x113   :  { %3522 = vmatpush1.bf16.msra.mxu0 %v6316_v41  ;;  %v6385_v41 = vld [vmem:[%s9169_s1 + $0x308] ss:$16 sps:$4 sm:$0xff]  }
 0x114   :  { %3563 = vmatpush1.bf16.msra.mxu1 %v6319_v22  ;;  %3523 = vmatprep.subr.bf16.mxu0 %v6324_v23  ;;  %v6390_v22 = vld [vmem:[%s9169_s1 + $0x4ec] ss:$16 sps:$4 sm:$0xff]  }
 0x115   :  { %3564 = vmatprep.subr.bf16.mxu1 %v6327_v44  ;;  %v6393_v23 = vld [vmem:[%s9169_s1 + $0x6ec] ss:$16 sps:$4 sm:$0xff]   ;;  %v6388_v44 = vld [vmem:[%s9169_s1 + $0x4e8] ss:$16 sps:$4 sm:$0xff]  }
 0x117   :  { %3524 = vmatpush1.bf16.msra.mxu0 %v6322_v45  ;;  %v6391_v45 = vld [vmem:[%s9169_s1 + $0x6e8] ss:$16 sps:$4 sm:$0xff]  }
 0x118   :  { %3565 = vmatpush1.bf16.msra.mxu1 %v6325_v46  ;;  %3525 = vmatprep.subr.bf16.mxu0 %v6330_v48  ;;  %v6396_v46 = vld [vmem:[%s9169_s1 + $0x4cc] ss:$16 sps:$4 sm:$0xff]  }
 0x119   :  { %3566 = vmatprep.subr.bf16.mxu1 %v6333_v49  ;;  %v6399_v48 = vld [vmem:[%s9169_s1 + $0x6cc] ss:$16 sps:$4 sm:$0xff]  }
 0x11b   :  { %3526 = vmatpush1.bf16.msra.mxu0 %v6328_v50 }
 0x11c   :  { %3567 = vmatpush1.bf16.msra.mxu1 %v6331_v52  ;;  %3527 = vmatprep.subr.bf16.mxu0 %v6336_v54  ;;  %v6394_v54 = vld [vmem:[%s9169_s1 + $0x4c8] ss:$16 sps:$4 sm:$0xff]  }
 0x11d   :  { %3568 = vmatprep.subr.bf16.mxu1 %v6339_v55  ;;  %v6397_v55 = vld [vmem:[%s9169_s1 + $0x6c8] ss:$16 sps:$4 sm:$0xff]  }
 0x11f   :  { %3528 = vmatpush1.bf16.msra.mxu0 %v6334_v56 }
 0x120   :  { %3569 = vmatpush1.bf16.msra.mxu1 %v6337_v57  ;;  %3529 = vmatprep.subr.bf16.mxu0 %v6342_v58 }
 0x121   :  { %3570 = vmatprep.subr.bf16.mxu1 %v6345_v60 }
 0x123   :  { %3530 = vmatpush2.bf16.msra.mxu0 %v6340_v61 }
 0x124   :  { %3571 = vmatpush2.bf16.msra.mxu1 %v6343_v1  ;;  %3531 = vmatprep.subr.bf16.mxu0 %v6348_v2  ;;  %v6400_v2 = vld [vmem:[%s9169_s1 + $0x4a8] ss:$16 sps:$4 sm:$0xff]  }
 0x125   :  { %3572 = vmatprep.subr.bf16.mxu1 %v6351_v3  ;;  %v6403_v3 = vld [vmem:[%s9169_s1 + $0x6a8] ss:$16 sps:$4 sm:$0xff]  }
 0x127   :  { %3532 = vmatpush2.bf16.msra.mxu0 %v6346_v35 }
 0x128   :  { %3573 = vmatpush2.bf16.msra.mxu1 %v6349_v40  ;;  %3533 = vmatprep.subr.bf16.mxu0 %v6354_v4  ;;  %v6406_v40 = vld [vmem:[%s9169_s1 + $0x488] ss:$16 sps:$4 sm:$0xff]  }
 0x129   :  { %3574 = vmatprep.subr.bf16.mxu1 %v6357_v5  ;;  %v6409_v4 = vld [vmem:[%s9169_s1 + $0x688] ss:$16 sps:$4 sm:$0xff]   ;;  %v6414_v5 = vld [vmem:[%s9169_s1 + $0x46c] ss:$16 sps:$4 sm:$0xff]  }
 0x12b   :  { %3534 = vmatpush2.bf16.msra.mxu0 %v6352_v8  ;;  %v6417_v8 = vld [vmem:[%s9169_s1 + $0x66c] ss:$16 sps:$4 sm:$0xff]  }
 0x12c   :  { %3575 = vmatpush2.bf16.msra.mxu1 %v6355_v9  ;;  %3535 = vmatprep.subr.bf16.mxu0 %v6360_v10  ;;  %v6412_v9 = vld [vmem:[%s9169_s1 + $0x468] ss:$16 sps:$4 sm:$0xff]  }
 0x12d   :  { %3576 = vmatprep.subr.bf16.mxu1 %v6363_v11  ;;  %v6415_v10 = vld [vmem:[%s9169_s1 + $0x668] ss:$16 sps:$4 sm:$0xff]   ;;  %v6420_v11 = vld [vmem:[%s9169_s1 + $0x44c] ss:$16 sps:$4 sm:$0xff]  }
 0x12f   :  { %3536 = vmatpush2.bf16.msra.mxu0 %v6358_v12  ;;  %v6423_v12 = vld [vmem:[%s9169_s1 + $0x64c] ss:$16 sps:$4 sm:$0xff]  }
 0x130   :  { %3577 = vmatpush2.bf16.msra.mxu1 %v6361_v13  ;;  %3537 = vmatprep.subr.bf16.mxu0 %v6366_v14  ;;  %v6418_v13 = vld [vmem:[%s9169_s1 + $0x448] ss:$16 sps:$4 sm:$0xff]  }
 0x131   :  { %3578 = vmatprep.subr.bf16.mxu1 %v6369_v15  ;;  %v6421_v14 = vld [vmem:[%s9169_s1 + $0x648] ss:$16 sps:$4 sm:$0xff]   ;;  %v6426_v15 = vld [vmem:[%s9169_s1 + $0x42c] ss:$16 sps:$4 sm:$0xff]  }
 0x133   :  { %3538 = vmatpush2.bf16.msra.mxu0 %v6364_v19  ;;  %v6429_v19 = vld [vmem:[%s9169_s1 + $0x62c] ss:$16 sps:$4 sm:$0xff]  }
 0x134   :  { %3579 = vmatpush2.bf16.msra.mxu1 %v6367_v20  ;;  %3539 = vmatprep.subr.bf16.mxu0 %v6372_v21  ;;  %v6424_v20 = vld [vmem:[%s9169_s1 + $0x428] ss:$16 sps:$4 sm:$0xff]  }
 0x135   :  { %3580 = vmatprep.subr.bf16.mxu1 %v6375_v26  ;;  %v6427_v21 = vld [vmem:[%s9169_s1 + $0x628] ss:$16 sps:$4 sm:$0xff]   ;;  %v6432_v26 = vld [vmem:[%s9169_s1 + $0x40c] ss:$16 sps:$4 sm:$0xff]  }
 0x137   :  { %3540 = vmatpush2.bf16.msra.mxu0 %v6370_v28  ;;  %v6435_v28 = vld [vmem:[%s9169_s1 + $0x60c] ss:$16 sps:$4 sm:$0xff]  }
 0x138   :  { %3581 = vmatpush2.bf16.msra.mxu1 %v6373_v29  ;;  %3541 = vmatprep.subr.bf16.mxu0 %v6378_v30  ;;  %v6430_v29 = vld [vmem:[%s9169_s1 + $0x408] ss:$16 sps:$4 sm:$0xff]  }
 0x139   :  { %3582 = vmatprep.subr.bf16.mxu1 %v6381_v47  ;;  %v6433_v30 = vld [vmem:[%s9169_s1 + $0x608] ss:$16 sps:$4 sm:$0xff]   ;;  %v6438_v47 = vld [vmem:[%s9169_s1 + $0x5ec] ss:$16 sps:$4 sm:$0xff]  }
 0x13b   :  { %3542 = vmatpush2.bf16.msra.mxu0 %v6376_v51  ;;  %v6441_v51 = vld [vmem:[%s9169_s1 + $0x7ec] ss:$16 sps:$4 sm:$0xff]  }
 0x13c   :  { %3583 = vmatpush2.bf16.msra.mxu1 %v6379_v31  ;;  %3543 = vmatprep.subr.bf16.mxu0 %v6384_v32  ;;  %v6436_v31 = vld [vmem:[%s9169_s1 + $0x5e8] ss:$16 sps:$4 sm:$0xff]  }
 0x13d   :  { %3584 = vmatprep.subr.bf16.mxu1 %v6387_v33  ;;  %v6439_v32 = vld [vmem:[%s9169_s1 + $0x7e8] ss:$16 sps:$4 sm:$0xff]   ;;  %v6444_v33 = vld [vmem:[%s9169_s1 + $0x5cc] ss:$16 sps:$4 sm:$0xff]  }
 0x13f   :  { %3544 = vmatpush2.bf16.msra.mxu0 %v6382_v34  ;;  %v6447_v34 = vld [vmem:[%s9169_s1 + $0x7cc] ss:$16 sps:$4 sm:$0xff]  }
 0x140   :  { %3585 = vmatpush2.bf16.msra.mxu1 %v6385_v41  ;;  %3595 = vmatprep.subr.bf16.mxu0 %v6390_v22  ;;  %v6442_v41 = vld [vmem:[%s9169_s1 + $0x5c8] ss:$16 sps:$4 sm:$0xff]  }
 0x141   :  { %3636 = vmatprep.subr.bf16.mxu1 %v6393_v23  ;;  %v6445_v22 = vld [vmem:[%s9169_s1 + $0x7c8] ss:$16 sps:$4 sm:$0xff]   ;;  %v6450_v23 = vld [vmem:[%s9169_s1 + $0x5ac] ss:$16 sps:$4 sm:$0xff]  }
 0x142   :  { %v3301_v49 = vpop.f32.mrf.mxu0  ;;  %3546 = vmatmul.mubr.bf16.vlgmr.msra.gmra.mxu0 %v7151_v6  ;;  %v6402_v6 = vld [vmem:[%s9169_s1 + $0x4ac] ss:$16 sps:$4 sm:$0xff]  }
 0x143   :  { %v3342_v50 = vpop.f32.mrf.mxu1  ;;  %3587 = vmatmul.mubr.bf16.vlgmr.msra.gmra.mxu1 %v7153_v7  ;;  %v3302_v52 = vadd.f32 %v3301_v49, %v7858_v18  ;;  %3596 = vmatpush1.bf16.msra.mxu0 %v6388_v44  ;;  %v6405_v7 = vld [vmem:[%s9169_s1 + $0x6ac] ss:$16 sps:$4 sm:$0xff]  }
 0x144   :  { %3637 = vmatpush1.bf16.msra.mxu1 %v6391_v45  ;;  %v3303_v56 = vpop.f32.mrf.mxu0  ;;  %3597 = vmatprep.subr.bf16.mxu0 %v6396_v46  ;;  %v6453_v44 = vld [vmem:[%s9169_s1 + $0x7ac] ss:$16 sps:$4 sm:$0xff]   ;;  %v6448_v45 = vld [vmem:[%s9169_s1 + $0x5a8] ss:$16 sps:$4 sm:$0xff]  }
 0x145   :  { %v3344_v57 = vpop.f32.mrf.mxu1  ;;  %3638 = vmatprep.subr.bf16.mxu1 %v6399_v48  ;;  %v8059_v18 = vadd.f32 %v3342_v50, %v3302_v52  ;;  %v3304_v58 = vadd.f32 %v3303_v56, %v7865_v27  ;;  %3627 = vmatprep.mubr.bf16.mxu0 %v7247_v36  ;;  %v6408_v36 = vld [vmem:[%s9169_s1 + $0x48c] ss:$16 sps:$4 sm:$0xff]   ;;  %v6451_v46 = vld [vmem:[%s9169_s1 + $0x7a8] ss:$16 sps:$4 sm:$0xff]  }
 0x146   :  { %3668 = vmatprep.mubr.bf16.mxu1 %v7251_v37  ;;  %v3305_v60 = vpop.f32.mrf.mxu0  ;;  %v6411_v37 = vld [vmem:[%s9169_s1 + $0x68c] ss:$16 sps:$4 sm:$0xff]   ;;  %v6454_v50 = vld [vmem:[%s9169_s1 + $0x588] ss:$16 sps:$4 sm:$0xff]  }
 0x147   :  { %v3346_v61 = vpop.f32.mrf.mxu1  ;;  %v8064_v1 = vadd.f32 %v3344_v57, %v3304_v58  ;;  %3598 = vmatpush1.bf16.msra.mxu0 %v6394_v54  ;;  %v6456_v48 = vld [vmem:[%s9169_s1 + $0x58c] ss:$16 sps:$4 sm:$0xff]   ;;  %v6457_v52 = vld [vmem:[%s9169_s1 + $0x788] ss:$16 sps:$4 sm:$0xff]  }
 0x148   :  { %3639 = vmatpush1.bf16.msra.mxu1 %v6397_v55  ;;  %v3306_v35 = vpop.f32.mrf.mxu0  ;;  %3599 = vmatprep.subr.bf16.mxu0 %v6402_v6  ;;  %v6459_v49 = vld [vmem:[%s9169_s1 + $0x78c] ss:$16 sps:$4 sm:$0xff]   ;;  %v6460_v56 = vld [vmem:[%s9169_s1 + $0x568] ss:$16 sps:$4 sm:$0xff]  }
 0x149   :  { %v3347_v27 = vpop.f32.mrf.mxu1  ;;  %3640 = vmatprep.subr.bf16.mxu1 %v6405_v7  ;;  %v6462_v54 = vld [vmem:[%s9169_s1 + $0x56c] ss:$16 sps:$4 sm:$0xff]   ;;  %v6463_v57 = vld [vmem:[%s9169_s1 + $0x768] ss:$16 sps:$4 sm:$0xff]  }
 0x14a   :  { %v6465_v55 = vld [vmem:[%s9169_s1 + $0x76c] ss:$16 sps:$4 sm:$0xff]   ;;  %v6466_v58 = vld [vmem:[%s9169_s1 + $0x548] ss:$16 sps:$4 sm:$0xff]  }
 0x14b   :  { %3600 = vmatpush1.bf16.msra.mxu0 %v6400_v2  ;;  %v6468_v6 = vld [vmem:[%s9169_s1 + $0x54c] ss:$16 sps:$4 sm:$0xff]   ;;  %v6469_v60 = vld [vmem:[%s9169_s1 + $0x748] ss:$16 sps:$4 sm:$0xff]  }
 0x14c   :  { %3641 = vmatpush1.bf16.msra.mxu1 %v6403_v3  ;;  %3601 = vmatprep.subr.bf16.mxu0 %v6408_v36  ;;  %v6471_v7 = vld [vmem:[%s9169_s1 + $0x74c] ss:$16 sps:$4 sm:$0xff]   ;;  %v6472_v3 = vld [vmem:[%s9169_s1 + $0x528] ss:$16 sps:$4 sm:$0xff]  }
 0x14d   :  { %3642 = vmatprep.subr.bf16.mxu1 %v6411_v37  ;;  %v6474_v61 = vld [vmem:[%s9169_s1 + $0x52c] ss:$16 sps:$4 sm:$0xff]   ;;  %v6475_v35 = vld [vmem:[%s9169_s1 + $0x728] ss:$16 sps:$4 sm:$0xff]  }
 0x14e   :  { %v6477_v2 = vld [vmem:[%s9169_s1 + $0x72c] ss:$16 sps:$4 sm:$0xff]   ;;  %v6478_v37 = vld [vmem:[%s9169_s1 + $0x508] ss:$16 sps:$4 sm:$0xff]  }
 0x14f   :  { %3602 = vmatpush1.bf16.msra.mxu0 %v6406_v40  ;;  %v6480_v27 = vld [vmem:[%s9169_s1 + $0x50c] ss:$16 sps:$4 sm:$0xff]   ;;  %v6481_v40 = vld [vmem:[%s9169_s1 + $0x708] ss:$16 sps:$4 sm:$0xff]  }
 0x150   :  { %3643 = vmatpush1.bf16.msra.mxu1 %v6409_v4  ;;  %3603 = vmatprep.subr.bf16.mxu0 %v6414_v5  ;;  %v6483_v36 = vld [vmem:[%s9169_s1 + $0x70c] ss:$16 sps:$4 sm:$0xff]  }
 0x151   :  { %3644 = vmatprep.subr.bf16.mxu1 %v6417_v8  ;;  %v6486_v4 = vld [vmem:[%s9169_s1 + $0x8ec] ss:$16 sps:$4 sm:$0xff]   ;;  %v6484_v8 = vld [vmem:[%s9169_s1 + $0x8e8] ss:$16 sps:$4 sm:$0xff]  }
 0x152   :  { %v6489_v5 = vld [vmem:[%s9169_s1 + $0xaec] ss:$16 sps:$4 sm:$0xff]  }
 0x153   :  { %3604 = vmatpush1.bf16.msra.mxu0 %v6412_v9  ;;  %v6487_v9 = vld [vmem:[%s9169_s1 + $0xae8] ss:$16 sps:$4 sm:$0xff]  }
 0x154   :  { %3645 = vmatpush1.bf16.msra.mxu1 %v6415_v10  ;;  %3605 = vmatprep.subr.bf16.mxu0 %v6420_v11  ;;  %v6492_v10 = vld [vmem:[%s9169_s1 + $0x8cc] ss:$16 sps:$4 sm:$0xff]  }
 0x155   :  { %3646 = vmatprep.subr.bf16.mxu1 %v6423_v12  ;;  %v6495_v11 = vld [vmem:[%s9169_s1 + $0xacc] ss:$16 sps:$4 sm:$0xff]   ;;  %v6490_v12 = vld [vmem:[%s9169_s1 + $0x8c8] ss:$16 sps:$4 sm:$0xff]  }
 0x157   :  { %3606 = vmatpush1.bf16.msra.mxu0 %v6418_v13  ;;  %v6493_v13 = vld [vmem:[%s9169_s1 + $0xac8] ss:$16 sps:$4 sm:$0xff]  }
 0x158   :  { %3647 = vmatpush1.bf16.msra.mxu1 %v6421_v14  ;;  %3607 = vmatprep.subr.bf16.mxu0 %v6426_v15 }
 0x159   :  { %3648 = vmatprep.subr.bf16.mxu1 %v6429_v19  ;;  %v6498_v19 = vld [vmem:[%s9169_s1 + $0x8ac] ss:$16 sps:$4 sm:$0xff]  }
 0x15b   :  { %3608 = vmatpush1.bf16.msra.mxu0 %v6424_v20 }
 0x15c   :  { %3649 = vmatpush1.bf16.msra.mxu1 %v6427_v21  ;;  %3609 = vmatprep.subr.bf16.mxu0 %v6432_v26 }
 0x15d   :  { %3650 = vmatprep.subr.bf16.mxu1 %v6435_v28  ;;  %v6501_v28 = vld [vmem:[%s9169_s1 + $0xaac] ss:$16 sps:$4 sm:$0xff]  }
 0x15f   :  { %3610 = vmatpush1.bf16.msra.mxu0 %v6430_v29 }
 0x160   :  { %3651 = vmatpush1.bf16.msra.mxu1 %v6433_v30  ;;  %3611 = vmatprep.subr.bf16.mxu0 %v6438_v47 }
 0x161   :  { %3652 = vmatprep.subr.bf16.mxu1 %v6441_v51 }
 0x163   :  { %3612 = vmatpush2.bf16.msra.mxu0 %v6436_v31 }
 0x164   :  { %3653 = vmatpush2.bf16.msra.mxu1 %v6439_v32  ;;  %3613 = vmatprep.subr.bf16.mxu0 %v6444_v33  ;;  %v6504_v32 = vld [vmem:[%s9169_s1 + $0x88c] ss:$16 sps:$4 sm:$0xff]   ;;  %v6505_v33 = vld [vmem:[%s9169_s1 + $0xa88] ss:$16 sps:$4 sm:$0xff]  }
 0x165   :  { %3654 = vmatprep.subr.bf16.mxu1 %v6447_v34  ;;  %v6510_v34 = vld [vmem:[%s9169_s1 + $0x86c] ss:$16 sps:$4 sm:$0xff]  }
 0x167   :  { %3614 = vmatpush2.bf16.msra.mxu0 %v6442_v41  ;;  %v6513_v41 = vld [vmem:[%s9169_s1 + $0xa6c] ss:$16 sps:$4 sm:$0xff]  }
 0x168   :  { %3655 = vmatpush2.bf16.msra.mxu1 %v6445_v22  ;;  %3615 = vmatprep.subr.bf16.mxu0 %v6450_v23  ;;  %v6508_v22 = vld [vmem:[%s9169_s1 + $0x868] ss:$16 sps:$4 sm:$0xff]  }
 0x169   :  { %3656 = vmatprep.subr.bf16.mxu1 %v6453_v44  ;;  %v6511_v23 = vld [vmem:[%s9169_s1 + $0xa68] ss:$16 sps:$4 sm:$0xff]   ;;  %v6516_v44 = vld [vmem:[%s9169_s1 + $0x84c] ss:$16 sps:$4 sm:$0xff]  }
 0x16b   :  { %3616 = vmatpush2.bf16.msra.mxu0 %v6448_v45  ;;  %v6519_v45 = vld [vmem:[%s9169_s1 + $0xa4c] ss:$16 sps:$4 sm:$0xff]  }
 0x16c   :  { %3657 = vmatpush2.bf16.msra.mxu1 %v6451_v46  ;;  %3617 = vmatprep.subr.bf16.mxu0 %v6456_v48  ;;  %v6514_v46 = vld [vmem:[%s9169_s1 + $0x848] ss:$16 sps:$4 sm:$0xff]  }
 0x16d   :  { %3658 = vmatprep.subr.bf16.mxu1 %v6459_v49  ;;  %v6517_v48 = vld [vmem:[%s9169_s1 + $0xa48] ss:$16 sps:$4 sm:$0xff]   ;;  %v6522_v49 = vld [vmem:[%s9169_s1 + $0x82c] ss:$16 sps:$4 sm:$0xff]  }
 0x16f   :  { %3618 = vmatpush2.bf16.msra.mxu0 %v6454_v50  ;;  %v6525_v50 = vld [vmem:[%s9169_s1 + $0xa2c] ss:$16 sps:$4 sm:$0xff]  }
 0x170   :  { %3659 = vmatpush2.bf16.msra.mxu1 %v6457_v52  ;;  %3619 = vmatprep.subr.bf16.mxu0 %v6462_v54  ;;  %v6520_v52 = vld [vmem:[%s9169_s1 + $0x828] ss:$16 sps:$4 sm:$0xff]  }
 0x171   :  { %3660 = vmatprep.subr.bf16.mxu1 %v6465_v55  ;;  %v6523_v54 = vld [vmem:[%s9169_s1 + $0xa28] ss:$16 sps:$4 sm:$0xff]   ;;  %v6528_v55 = vld [vmem:[%s9169_s1 + $0x80c] ss:$16 sps:$4 sm:$0xff]  }
 0x173   :  { %3620 = vmatpush2.bf16.msra.mxu0 %v6460_v56  ;;  %v6531_v56 = vld [vmem:[%s9169_s1 + $0xa0c] ss:$16 sps:$4 sm:$0xff]  }
 0x174   :  { %3661 = vmatpush2.bf16.msra.mxu1 %v6463_v57  ;;  %3621 = vmatprep.subr.bf16.mxu0 %v6468_v6  ;;  %v6526_v57 = vld [vmem:[%s9169_s1 + $0x808] ss:$16 sps:$4 sm:$0xff]  }
 0x175   :  { %3662 = vmatprep.subr.bf16.mxu1 %v6471_v7  ;;  %v6529_v6 = vld [vmem:[%s9169_s1 + $0xa08] ss:$16 sps:$4 sm:$0xff]   ;;  %v6534_v7 = vld [vmem:[%s9169_s1 + $0x9ec] ss:$16 sps:$4 sm:$0xff]  }
 0x177   :  { %3622 = vmatpush2.bf16.msra.mxu0 %v6466_v58  ;;  %v6537_v58 = vld [vmem:[%s9169_s1 + $0xbec] ss:$16 sps:$4 sm:$0xff]  }
 0x178   :  { %3663 = vmatpush2.bf16.msra.mxu1 %v6469_v60  ;;  %3623 = vmatprep.subr.bf16.mxu0 %v6474_v61  ;;  %v6532_v60 = vld [vmem:[%s9169_s1 + $0x9e8] ss:$16 sps:$4 sm:$0xff]  }
 0x179   :  { %3664 = vmatprep.subr.bf16.mxu1 %v6477_v2  ;;  %v6535_v61 = vld [vmem:[%s9169_s1 + $0xbe8] ss:$16 sps:$4 sm:$0xff]   ;;  %v6540_v2 = vld [vmem:[%s9169_s1 + $0x9cc] ss:$16 sps:$4 sm:$0xff]  }
 0x17b   :  { %3624 = vmatpush2.bf16.msra.mxu0 %v6472_v3  ;;  %v6543_v3 = vld [vmem:[%s9169_s1 + $0xbcc] ss:$16 sps:$4 sm:$0xff]  }
 0x17c   :  { %3665 = vmatpush2.bf16.msra.mxu1 %v6475_v35  ;;  %3625 = vmatprep.subr.bf16.mxu0 %v6480_v27  ;;  %v6538_v35 = vld [vmem:[%s9169_s1 + $0x9c8] ss:$16 sps:$4 sm:$0xff]  }
 0x17d   :  { %3666 = vmatprep.subr.bf16.mxu1 %v6483_v36  ;;  %v6541_v27 = vld [vmem:[%s9169_s1 + $0xbc8] ss:$16 sps:$4 sm:$0xff]   ;;  %v6546_v36 = vld [vmem:[%s9169_s1 + $0x9ac] ss:$16 sps:$4 sm:$0xff]  }
 0x17f   :  { %3626 = vmatpush2.bf16.msra.mxu0 %v6478_v37  ;;  %v6549_v37 = vld [vmem:[%s9169_s1 + $0xbac] ss:$16 sps:$4 sm:$0xff]  }
 0x180   :  { %3667 = vmatpush2.bf16.msra.mxu1 %v6481_v40  ;;  %3677 = vmatprep.subr.bf16.mxu0 %v6486_v4  ;;  %v6544_v40 = vld [vmem:[%s9169_s1 + $0x9a8] ss:$16 sps:$4 sm:$0xff]  }
 0x181   :  { %3718 = vmatprep.subr.bf16.mxu1 %v6489_v5  ;;  %v6547_v4 = vld [vmem:[%s9169_s1 + $0xba8] ss:$16 sps:$4 sm:$0xff]   ;;  %v6552_v5 = vld [vmem:[%s9169_s1 + $0x98c] ss:$16 sps:$4 sm:$0xff]  }
 0x182   :  { %v3383_v14 = vpop.f32.mrf.mxu0  ;;  %3628 = vmatmul.mubr.bf16.vlgmr.msra.gmra.mxu0 %v7371_v16 }
 0x183   :  { %v3424_v15 = vpop.f32.mrf.mxu1  ;;  %3669 = vmatmul.mubr.bf16.vlgmr.msra.gmra.mxu1 %v7375_v17  ;;  %v3384_v20 = vadd.f32 %v3383_v14, %v8059_v18  ;;  %3678 = vmatpush1.bf16.msra.mxu0 %v6484_v8  ;;  %v6496_v17 = vld [vmem:[%s9169_s1 + $0x8a8] ss:$16 sps:$4 sm:$0xff]   ;;  %v6555_v8 = vld [vmem:[%s9169_s1 + $0xb8c] ss:$16 sps:$4 sm:$0xff]  }
 0x184   :  { %3719 = vmatpush1.bf16.msra.mxu1 %v6487_v9  ;;  %v3385_v21 = vpop.f32.mrf.mxu0  ;;  %3679 = vmatprep.subr.bf16.mxu0 %v6492_v10  ;;  %v6499_v18 = vld [vmem:[%s9169_s1 + $0xaa8] ss:$16 sps:$4 sm:$0xff]  }
 0x185   :  { %v3426_v26 = vpop.f32.mrf.mxu1  ;;  %3720 = vmatprep.subr.bf16.mxu1 %v6495_v11  ;;  %v8261_v29 = vadd.f32 %v3424_v15, %v3384_v20  ;;  %v3386_v16 = vadd.f32 %v3385_v21, %v8064_v1  ;;  %3709 = vmatprep.mubr.bf16.mxu0 %v7401_v24  ;;  %v6507_v24 = vld [vmem:[%s9169_s1 + $0xa8c] ss:$16 sps:$4 sm:$0xff]   ;;  %v6550_v9 = vld [vmem:[%s9169_s1 + $0x988] ss:$16 sps:$4 sm:$0xff]  }
 0x186   :  { %3750 = vmatprep.mubr.bf16.mxu1 %v7405_v25  ;;  %v3387_v30 = vpop.f32.mrf.mxu0  ;;  %v6502_v25 = vld [vmem:[%s9169_s1 + $0x888] ss:$16 sps:$4 sm:$0xff]   ;;  %v6558_v11 = vld [vmem:[%s9169_s1 + $0x96c] ss:$16 sps:$4 sm:$0xff]  }
 0x187   :  { %v3428_v47 = vpop.f32.mrf.mxu1  ;;  %v8272_v51 = vadd.f32 %v3426_v26, %v3386_v16  ;;  %3680 = vmatpush1.bf16.msra.mxu0 %v6490_v12  ;;  %v6553_v10 = vld [vmem:[%s9169_s1 + $0xb88] ss:$16 sps:$4 sm:$0xff]   ;;  %v6561_v12 = vld [vmem:[%s9169_s1 + $0xb6c] ss:$16 sps:$4 sm:$0xff]  }
 0x188   :  { %3721 = vmatpush1.bf16.msra.mxu1 %v6493_v13  ;;  %v3388_v31 = vpop.f32.mrf.mxu0  ;;  %3681 = vmatprep.subr.bf16.mxu0 %v6498_v19  ;;  %v6556_v13 = vld [vmem:[%s9169_s1 + $0x968] ss:$16 sps:$4 sm:$0xff]   ;;  %v6564_v15 = vld [vmem:[%s9169_s1 + $0x94c] ss:$16 sps:$4 sm:$0xff]  }
 0x189   :  { %v3429_v1 = vpop.f32.mrf.mxu1  ;;  %3722 = vmatprep.subr.bf16.mxu1 %v6501_v28  ;;  %v6559_v14 = vld [vmem:[%s9169_s1 + $0xb68] ss:$16 sps:$4 sm:$0xff]   ;;  %v6567_v19 = vld [vmem:[%s9169_s1 + $0xb4c] ss:$16 sps:$4 sm:$0xff]  }
 0x18a   :  { %v6562_v20 = vld [vmem:[%s9169_s1 + $0x948] ss:$16 sps:$4 sm:$0xff]   ;;  %v6570_v26 = vld [vmem:[%s9169_s1 + $0x92c] ss:$16 sps:$4 sm:$0xff]  }
 0x18b   :  { %3682 = vmatpush1.bf16.msra.mxu0 %v6496_v17  ;;  %v6565_v21 = vld [vmem:[%s9169_s1 + $0xb48] ss:$16 sps:$4 sm:$0xff]   ;;  %v6573_v28 = vld [vmem:[%s9169_s1 + $0xb2c] ss:$16 sps:$4 sm:$0xff]  }
 0x18c   :  { %3723 = vmatpush1.bf16.msra.mxu1 %v6499_v18  ;;  %3683 = vmatprep.subr.bf16.mxu0 %v6504_v32  ;;  %v6568_v16 = vld [vmem:[%s9169_s1 + $0x928] ss:$16 sps:$4 sm:$0xff]   ;;  %v6576_v18 = vld [vmem:[%s9169_s1 + $0x90c] ss:$16 sps:$4 sm:$0xff]  }
 0x18d   :  { %3724 = vmatprep.subr.bf16.mxu1 %v6507_v24  ;;  %v6571_v17 = vld [vmem:[%s9169_s1 + $0xb28] ss:$16 sps:$4 sm:$0xff]   ;;  %v6579_v30 = vld [vmem:[%s9169_s1 + $0xb0c] ss:$16 sps:$4 sm:$0xff]  }
 0x18e   :  { %v6574_v47 = vld [vmem:[%s9169_s1 + $0x908] ss:$16 sps:$4 sm:$0xff]   ;;  %v6582_v1 = vld [vmem:[%s9169_s1 + $0xcec] ss:$16 sps:$4 sm:$0xff]  }
 0x18f   :  { %3684 = vmatpush1.bf16.msra.mxu0 %v6502_v25  ;;  %v6577_v31 = vld [vmem:[%s9169_s1 + $0xb08] ss:$16 sps:$4 sm:$0xff]   ;;  %v6585_v32 = vld [vmem:[%s9169_s1 + $0xeec] ss:$16 sps:$4 sm:$0xff]  }
 0x190   :  { %3725 = vmatpush1.bf16.msra.mxu1 %v6505_v33  ;;  %3685 = vmatprep.subr.bf16.mxu0 %v6510_v34  ;;  %v6580_v24 = vld [vmem:[%s9169_s1 + $0xce8] ss:$16 sps:$4 sm:$0xff]   ;;  %v6588_v33 = vld [vmem:[%s9169_s1 + $0xccc] ss:$16 sps:$4 sm:$0xff]  }
 0x191   :  { %3726 = vmatprep.subr.bf16.mxu1 %v6513_v41  ;;  %v6583_v25 = vld [vmem:[%s9169_s1 + $0xee8] ss:$16 sps:$4 sm:$0xff]   ;;  %v6591_v34 = vld [vmem:[%s9169_s1 + $0xecc] ss:$16 sps:$4 sm:$0xff]  }
 0x193   :  { %3686 = vmatpush1.bf16.msra.mxu0 %v6508_v22 }
 0x194   :  { %3727 = vmatpush1.bf16.msra.mxu1 %v6511_v23  ;;  %3687 = vmatprep.subr.bf16.mxu0 %v6516_v44  ;;  %v6586_v44 = vld [vmem:[%s9169_s1 + $0xcc8] ss:$16 sps:$4 sm:$0xff]  }
 0x195   :  { %3728 = vmatprep.subr.bf16.mxu1 %v6519_v45  ;;  %v6589_v45 = vld [vmem:[%s9169_s1 + $0xec8] ss:$16 sps:$4 sm:$0xff]  }
 0x197   :  { %3688 = vmatpush1.bf16.msra.mxu0 %v6514_v46 }
 0x198   :  { %3729 = vmatpush1.bf16.msra.mxu1 %v6517_v48  ;;  %3689 = vmatprep.subr.bf16.mxu0 %v6522_v49 }
 0x199   :  { %3730 = vmatprep.subr.bf16.mxu1 %v6525_v50 }
 0x19b   :  { %3690 = vmatpush1.bf16.msra.mxu0 %v6520_v52  ;;  %v6592_v52 = vld [vmem:[%s9169_s1 + $0xca8] ss:$16 sps:$4 sm:$0xff]  }
 0x19c   :  { %3731 = vmatpush1.bf16.msra.mxu1 %v6523_v54  ;;  %3691 = vmatprep.subr.bf16.mxu0 %v6528_v55  ;;  %v6595_v54 = vld [vmem:[%s9169_s1 + $0xea8] ss:$16 sps:$4 sm:$0xff]  }
 0x19d   :  { %3732 = vmatprep.subr.bf16.mxu1 %v6531_v56 }
 0x19f   :  { %3692 = vmatpush1.bf16.msra.mxu0 %v6526_v57  ;;  %v6598_v57 = vld [vmem:[%s9169_s1 + $0xc88] ss:$16 sps:$4 sm:$0xff]  }
 0x1a0   :  { %3733 = vmatpush1.bf16.msra.mxu1 %v6529_v6  ;;  %3693 = vmatprep.subr.bf16.mxu0 %v6534_v7  ;;  %v6601_v6 = vld [vmem:[%s9169_s1 + $0xe88] ss:$16 sps:$4 sm:$0xff]   ;;  %v6606_v7 = vld [vmem:[%s9169_s1 + $0xc6c] ss:$16 sps:$4 sm:$0xff]  }
 0x1a1   :  { %3734 = vmatprep.subr.bf16.mxu1 %v6537_v58  ;;  %v6609_v58 = vld [vmem:[%s9169_s1 + $0xe6c] ss:$16 sps:$4 sm:$0xff]  }
 0x1a3   :  { %3694 = vmatpush2.bf16.msra.mxu0 %v6532_v60  ;;  %v6604_v60 = vld [vmem:[%s9169_s1 + $0xc68] ss:$16 sps:$4 sm:$0xff]  }
 0x1a4   :  { %3735 = vmatpush2.bf16.msra.mxu1 %v6535_v61  ;;  %3695 = vmatprep.subr.bf16.mxu0 %v6540_v2  ;;  %v6607_v61 = vld [vmem:[%s9169_s1 + $0xe68] ss:$16 sps:$4 sm:$0xff]   ;;  %v6612_v2 = vld [vmem:[%s9169_s1 + $0xc4c] ss:$16 sps:$4 sm:$0xff]  }
 0x1a5   :  { %3736 = vmatprep.subr.bf16.mxu1 %v6543_v3  ;;  %v6615_v3 = vld [vmem:[%s9169_s1 + $0xe4c] ss:$16 sps:$4 sm:$0xff]  }
 0x1a7   :  { %3696 = vmatpush2.bf16.msra.mxu0 %v6538_v35  ;;  %v6610_v35 = vld [vmem:[%s9169_s1 + $0xc48] ss:$16 sps:$4 sm:$0xff]  }
 0x1a8   :  { %3737 = vmatpush2.bf16.msra.mxu1 %v6541_v27  ;;  %3697 = vmatprep.subr.bf16.mxu0 %v6546_v36  ;;  %v6613_v27 = vld [vmem:[%s9169_s1 + $0xe48] ss:$16 sps:$4 sm:$0xff]   ;;  %v6618_v36 = vld [vmem:[%s9169_s1 + $0xc2c] ss:$16 sps:$4 sm:$0xff]  }
 0x1a9   :  { %3738 = vmatprep.subr.bf16.mxu1 %v6549_v37  ;;  %v6621_v37 = vld [vmem:[%s9169_s1 + $0xe2c] ss:$16 sps:$4 sm:$0xff]  }
 0x1ab   :  { %3698 = vmatpush2.bf16.msra.mxu0 %v6544_v40  ;;  %v6616_v40 = vld [vmem:[%s9169_s1 + $0xc28] ss:$16 sps:$4 sm:$0xff]  }
 0x1ac   :  { %3739 = vmatpush2.bf16.msra.mxu1 %v6547_v4  ;;  %3699 = vmatprep.subr.bf16.mxu0 %v6552_v5  ;;  %v6619_v4 = vld [vmem:[%s9169_s1 + $0xe28] ss:$16 sps:$4 sm:$0xff]   ;;  %v6624_v5 = vld [vmem:[%s9169_s1 + $0xc0c] ss:$16 sps:$4 sm:$0xff]  }
 0x1ad   :  { %3740 = vmatprep.subr.bf16.mxu1 %v6555_v8  ;;  %v6627_v8 = vld [vmem:[%s9169_s1 + $0xe0c] ss:$16 sps:$4 sm:$0xff]  }
 0x1af   :  { %3700 = vmatpush2.bf16.msra.mxu0 %v6550_v9  ;;  %v6622_v9 = vld [vmem:[%s9169_s1 + $0xc08] ss:$16 sps:$4 sm:$0xff]  }
 0x1b0   :  { %3741 = vmatpush2.bf16.msra.mxu1 %v6553_v10  ;;  %3701 = vmatprep.subr.bf16.mxu0 %v6558_v11  ;;  %v6625_v10 = vld [vmem:[%s9169_s1 + $0xe08] ss:$16 sps:$4 sm:$0xff]   ;;  %v6630_v11 = vld [vmem:[%s9169_s1 + $0xdec] ss:$16 sps:$4 sm:$0xff]  }
 0x1b1   :  { %3742 = vmatprep.subr.bf16.mxu1 %v6561_v12  ;;  %v6633_v12 = vld [vmem:[%s9169_s1 + $0xfec] ss:$16 sps:$4 sm:$0xff]  }
 0x1b3   :  { %3702 = vmatpush2.bf16.msra.mxu0 %v6556_v13  ;;  %v6628_v13 = vld [vmem:[%s9169_s1 + $0xde8] ss:$16 sps:$4 sm:$0xff]  }
 0x1b4   :  { %3743 = vmatpush2.bf16.msra.mxu1 %v6559_v14  ;;  %3703 = vmatprep.subr.bf16.mxu0 %v6564_v15  ;;  %v6631_v14 = vld [vmem:[%s9169_s1 + $0xfe8] ss:$16 sps:$4 sm:$0xff]   ;;  %v6636_v15 = vld [vmem:[%s9169_s1 + $0xdcc] ss:$16 sps:$4 sm:$0xff]  }
 0x1b5   :  { %3744 = vmatprep.subr.bf16.mxu1 %v6567_v19  ;;  %v6639_v19 = vld [vmem:[%s9169_s1 + $0xfcc] ss:$16 sps:$4 sm:$0xff]  }
 0x1b7   :  { %3704 = vmatpush2.bf16.msra.mxu0 %v6562_v20  ;;  %v6634_v20 = vld [vmem:[%s9169_s1 + $0xdc8] ss:$16 sps:$4 sm:$0xff]  }
 0x1b8   :  { %3745 = vmatpush2.bf16.msra.mxu1 %v6565_v21  ;;  %3705 = vmatprep.subr.bf16.mxu0 %v6570_v26  ;;  %v6637_v21 = vld [vmem:[%s9169_s1 + $0xfc8] ss:$16 sps:$4 sm:$0xff]   ;;  %v6642_v26 = vld [vmem:[%s9169_s1 + $0xdac] ss:$16 sps:$4 sm:$0xff]  }
 0x1b9   :  { %3746 = vmatprep.subr.bf16.mxu1 %v6573_v28  ;;  %v6645_v28 = vld [vmem:[%s9169_s1 + $0xfac] ss:$16 sps:$4 sm:$0xff]  }
 0x1bb   :  { %3706 = vmatpush2.bf16.msra.mxu0 %v6568_v16  ;;  %v6640_v16 = vld [vmem:[%s9169_s1 + $0xda8] ss:$16 sps:$4 sm:$0xff]  }
 0x1bc   :  { %3747 = vmatpush2.bf16.msra.mxu1 %v6571_v17  ;;  %3707 = vmatprep.subr.bf16.mxu0 %v6576_v18  ;;  %v6643_v17 = vld [vmem:[%s9169_s1 + $0xfa8] ss:$16 sps:$4 sm:$0xff]   ;;  %v6648_v18 = vld [vmem:[%s9169_s1 + $0xd8c] ss:$16 sps:$4 sm:$0xff]  }
 0x1bd   :  { %3748 = vmatprep.subr.bf16.mxu1 %v6579_v30  ;;  %v6651_v30 = vld [vmem:[%s9169_s1 + $0xf8c] ss:$16 sps:$4 sm:$0xff]  }
 0x1bf   :  { %3708 = vmatpush2.bf16.msra.mxu0 %v6574_v47  ;;  %v6646_v47 = vld [vmem:[%s9169_s1 + $0xd88] ss:$16 sps:$4 sm:$0xff]  }
 0x1c0   :  { %3749 = vmatpush2.bf16.msra.mxu1 %v6577_v31  ;;  %3759 = vmatprep.subr.bf16.mxu0 %v6582_v1  ;;  %v6649_v31 = vld [vmem:[%s9169_s1 + $0xf88] ss:$16 sps:$4 sm:$0xff]   ;;  %v6654_v1 = vld [vmem:[%s9169_s1 + $0xd6c] ss:$16 sps:$4 sm:$0xff]  }
 0x1c1   :  { %3800 = vmatprep.subr.bf16.mxu1 %v6585_v32  ;;  %v6657_v32 = vld [vmem:[%s9169_s1 + $0xf6c] ss:$16 sps:$4 sm:$0xff]  }
 0x1c2   :  { %v3465_v41 = vpop.f32.mrf.mxu0  ;;  %3710 = vmatmul.mubr.bf16.vlgmr.msra.gmra.mxu0 %v7601_v38  ;;  %v6594_v38 = vld [vmem:[%s9169_s1 + $0xcac] ss:$16 sps:$4 sm:$0xff]  }
 0x1c3   :  { %v3506_v22 = vpop.f32.mrf.mxu1  ;;  %3751 = vmatmul.mubr.bf16.vlgmr.msra.gmra.mxu1 %v7605_v39  ;;  %v3466_v23 = vadd.f32 %v3465_v41, %v8261_v29  ;;  %3760 = vmatpush1.bf16.msra.mxu0 %v6580_v24  ;;  %v6597_v39 = vld [vmem:[%s9169_s1 + $0xeac] ss:$16 sps:$4 sm:$0xff]   ;;  %v6652_v24 = vld [vmem:[%s9169_s1 + $0xd68] ss:$16 sps:$4 sm:$0xff]  }
 0x1c4   :  { %3801 = vmatpush1.bf16.msra.mxu1 %v6583_v25  ;;  %v8457_v46 = vpop.f32.mrf.mxu0  ;;  %3761 = vmatprep.subr.bf16.mxu0 %v6588_v33  ;;  %v6655_v25 = vld [vmem:[%s9169_s1 + $0xf68] ss:$16 sps:$4 sm:$0xff]   ;;  %v6660_v33 = vld [vmem:[%s9169_s1 + $0xd4c] ss:$16 sps:$4 sm:$0xff]  }
 0x1c5   :  { %v8459_v48 = vpop.f32.mrf.mxu1  ;;  %3802 = vmatprep.subr.bf16.mxu1 %v6591_v34  ;;  %v8467_v29 = vadd.f32 %v3506_v22, %v3466_v23  ;;  %3791 = vmatprep.mubr.bf16.mxu0 %v7623_v42  ;;  %v6600_v42 = vld [vmem:[%s9169_s1 + $0xc8c] ss:$16 sps:$4 sm:$0xff]   ;;  %v6658_v41 = vld [vmem:[%s9169_s1 + $0xd48] ss:$16 sps:$4 sm:$0xff]  }
 0x1c6   :  { %3832 = vmatprep.mubr.bf16.mxu1 %v7627_v43  ;;  %v3469_v49 = vpop.f32.mrf.mxu0  ;;  %v6603_v43 = vld [vmem:[%s9169_s1 + $0xe8c] ss:$16 sps:$4 sm:$0xff]   ;;  %v6661_v22 = vld [vmem:[%s9169_s1 + $0xf48] ss:$16 sps:$4 sm:$0xff]  }
 0x1c7   :  { %v3510_v50 = vpop.f32.mrf.mxu1  ;;  %3762 = vmatpush1.bf16.msra.mxu0 %v6586_v44  ;;  %v6663_v34 = vld [vmem:[%s9169_s1 + $0xf4c] ss:$16 sps:$4 sm:$0xff]  }
 0x1c8   :  { %3803 = vmatpush1.bf16.msra.mxu1 %v6589_v45  ;;  %v3470_v55 = vpop.f32.mrf.mxu0  ;;  %3763 = vmatprep.subr.bf16.mxu0 %v6594_v38  ;;  %v6666_v23 = vld [vmem:[%s9169_s1 + $0xd2c] ss:$16 sps:$4 sm:$0xff]   ;;  %v3468_v45 = vadd.f32 %v8457_v46, %v8272_v51  ;;  %v6664_v38 = vld [vmem:[%s9169_s1 + $0xd28] ss:$16 sps:$4 sm:$0xff]  }
 0x1c9   :  { %v3511_v56 = vpop.f32.mrf.mxu1  ;;  %3804 = vmatprep.subr.bf16.mxu1 %v6597_v39  ;;  %v6669_v44 = vld [vmem:[%s9169_s1 + $0xf2c] ss:$16 sps:$4 sm:$0xff]   ;;  %v6667_v39 = vld [vmem:[%s9169_s1 + $0xf28] ss:$16 sps:$4 sm:$0xff]   ;;  %v6678_v55 = vld [vmem:[%s9172_s3 + $0xe4] ss:$16 sps:$4 sm:$0xff]  }
 0x1ca   :  { %v6672_v49 = vld [vmem:[%s9169_s1 + $0xd0c] ss:$16 sps:$4 sm:$0xff]   ;;  %v3509_v46 = vadd.f32 %v8459_v48, %v3468_v45  ;;  %v6670_v50 = vld [vmem:[%s9169_s1 + $0xd08] ss:$16 sps:$4 sm:$0xff]   ;;  %v563_v48 = vsub.s32 3, %v7795_v53 }
 0x1cb   :  { %3764 = vmatpush1.bf16.msra.mxu0 %v6592_v52  ;;  %v6675_v51 = vld [vmem:[%s9169_s1 + $0xf0c] ss:$16 sps:$4 sm:$0xff]   ;;  %v6673_v52 = vld [vmem:[%s9169_s1 + $0xf08] ss:$16 sps:$4 sm:$0xff]   ;;  %v6795_v45 = vld [vmem:[%s9172_s3 + $0x204] ss:$16 sps:$4 sm:$0xff]  }
 0x1cc   :  { %3805 = vmatpush1.bf16.msra.mxu1 %v6595_v54  ;;  %3765 = vmatprep.subr.bf16.mxu0 %v6600_v42  ;;  %v559_v54 = vsub.s32 2, %v7795_v53  ;;  %v3842_v56 = vmax.f32 %v3509_v46, 0.0  ;;  %v6900_v42 = vld [vmem:[%s9171_s2] sm:$0xf] }
 0x1cd   :  { %3806 = vmatprep.subr.bf16.mxu1 %v6603_v43  ;;  %v6706_v46 = vld [vmem:[%s9172_s3 + $0x1a0] ss:$16 sps:$4 sm:$0xff]  }
 0x1ce   :  { %v560_v43 = vrot.slane %v6900_v42, %v559_v54 }
 0x1cf   :  { %3766 = vmatpush1.bf16.msra.mxu0 %v6598_v57  ;;  %v6676_v57 = vld [vmem:[%s9172_s3 + $0xe0] ss:$16 sps:$4 sm:$0xff]  }
 0x1d0   :  { %3807 = vmatpush1.bf16.msra.mxu1 %v6601_v6  ;;  %3767 = vmatprep.subr.bf16.mxu0 %v6606_v7  ;;  %v6681_v6 = vld [vmem:[%s9172_s3 + $0xc4] ss:$16 sps:$4 sm:$0xff]   ;;  %v8652_v7 = vpack.c.bf16 %v3842_v56, %v3842_v56  ;;  %v6709_v56 = vld [vmem:[%s9172_s3 + $0x180] ss:$16 sps:$4 sm:$0xff]  }
 0x1d1   :  { %3808 = vmatprep.subr.bf16.mxu1 %v6609_v58  ;;  %v564_v58 = vrot.slane %v6900_v42, %v563_v48  ;;  %v6799_v42 = vld [vmem:[%s9172_s3 + $0x3c0] ss:$16 sps:$4 sm:$0xff]  }
 0x1d3   :  { %3768 = vmatpush1.bf16.msra.mxu0 %v6604_v60 }
 0x1d4   :  { %3809 = vmatpush1.bf16.msra.mxu1 %v6607_v61  ;;  %3769 = vmatprep.subr.bf16.mxu0 %v6612_v2 }
 0x1d5   :  { %3810 = vmatprep.subr.bf16.mxu1 %v6615_v3  ;;  %v6679_v3 = vld [vmem:[%s9172_s3 + $0xc0] ss:$16 sps:$4 sm:$0xff]  }
 0x1d7   :  { %3770 = vmatpush1.bf16.msra.mxu0 %v6610_v35 }
 0x1d8   :  { %3811 = vmatpush1.bf16.msra.mxu1 %v6613_v27  ;;  %3771 = vmatprep.subr.bf16.mxu0 %v6618_v36  ;;  %v6684_v36 = vld [vmem:[%s9172_s3 + $0xa4] ss:$16 sps:$4 sm:$0xff]  }
 0x1d9   :  { %3812 = vmatprep.subr.bf16.mxu1 %v6621_v37 }
 0x1db   :  { %3772 = vmatpush1.bf16.msra.mxu0 %v6616_v40 }
 0x1dc   :  { %3813 = vmatpush1.bf16.msra.mxu1 %v6619_v4  ;;  %3773 = vmatprep.subr.bf16.mxu0 %v6624_v5  ;;  %v6682_v5 = vld [vmem:[%s9172_s3 + $0xa0] ss:$16 sps:$4 sm:$0xff]  }
 0x1dd   :  { %3814 = vmatprep.subr.bf16.mxu1 %v6627_v8 }
 0x1df   :  { %3774 = vmatpush1.bf16.msra.mxu0 %v6622_v9 }
 0x1e0   :  { %3815 = vmatpush1.bf16.msra.mxu1 %v6625_v10  ;;  %3775 = vmatprep.subr.bf16.mxu0 %v6630_v11  ;;  %v6687_v10 = vld [vmem:[%s9172_s3 + $0x84] ss:$16 sps:$4 sm:$0xff]   ;;  %v6772_v11 = vld [vmem:[%s9172_s3 + $0x2e0] ss:$16 sps:$4 sm:$0xff]  }
 0x1e1   :  { %3816 = vmatprep.subr.bf16.mxu1 %v6633_v12  ;;  %v6774_v12 = vld [vmem:[%s9172_s3 + $0x2e4] ss:$16 sps:$4 sm:$0xff]  }
 0x1e3   :  { %3776 = vmatpush2.bf16.msra.mxu0 %v6628_v13  ;;  %v6777_v13 = vld [vmem:[%s9172_s3 + $0x2c4] ss:$16 sps:$4 sm:$0xff]  }
 0x1e4   :  { %3817 = vmatpush2.bf16.msra.mxu1 %v6631_v14  ;;  %3777 = vmatprep.subr.bf16.mxu0 %v6636_v15  ;;  %v6685_v14 = vld [vmem:[%s9172_s3 + $0x80] ss:$16 sps:$4 sm:$0xff]  }
 0x1e5   :  { %3818 = vmatprep.subr.bf16.mxu1 %v6639_v19  ;;  %v6775_v15 = vld [vmem:[%s9172_s3 + $0x2c0] ss:$16 sps:$4 sm:$0xff]   ;;  %v6690_v19 = vld [vmem:[%s9172_s3 + $0x64] ss:$16 sps:$4 sm:$0xff]  }
 0x1e7   :  { %3778 = vmatpush2.bf16.msra.mxu0 %v6634_v20  ;;  %v6780_v20 = vld [vmem:[%s9172_s3 + $0x2a4] ss:$16 sps:$4 sm:$0xff]  }
 0x1e8   :  { %3819 = vmatpush2.bf16.msra.mxu1 %v6637_v21  ;;  %3779 = vmatprep.subr.bf16.mxu0 %v6642_v26  ;;  %v6688_v21 = vld [vmem:[%s9172_s3 + $0x60] ss:$16 sps:$4 sm:$0xff]  }
 0x1e9   :  { %3820 = vmatprep.subr.bf16.mxu1 %v6645_v28  ;;  %v6778_v26 = vld [vmem:[%s9172_s3 + $0x2a0] ss:$16 sps:$4 sm:$0xff]   ;;  %v6693_v28 = vld [vmem:[%s9172_s3 + $0x44] ss:$16 sps:$4 sm:$0xff]  }
 0x1eb   :  { %3780 = vmatpush2.bf16.msra.mxu0 %v6640_v16  ;;  %v6783_v16 = vld [vmem:[%s9172_s3 + $0x284] ss:$16 sps:$4 sm:$0xff]  }
 0x1ec   :  { %3821 = vmatpush2.bf16.msra.mxu1 %v6643_v17  ;;  %3781 = vmatprep.subr.bf16.mxu0 %v6648_v18  ;;  %v6691_v17 = vld [vmem:[%s9172_s3 + $0x40] ss:$16 sps:$4 sm:$0xff]  }
 0x1ed   :  { %3822 = vmatprep.subr.bf16.mxu1 %v6651_v30  ;;  %v6781_v18 = vld [vmem:[%s9172_s3 + $0x280] ss:$16 sps:$4 sm:$0xff]   ;;  %v6696_v30 = vld [vmem:[%s9172_s3 + $0x24] ss:$16 sps:$4 sm:$0xff]  }
 0x1ef   :  { %3782 = vmatpush2.bf16.msra.mxu0 %v6646_v47  ;;  %v6786_v47 = vld [vmem:[%s9172_s3 + $0x264] ss:$16 sps:$4 sm:$0xff]  }
 0x1f0   :  { %3823 = vmatpush2.bf16.msra.mxu1 %v6649_v31  ;;  %3783 = vmatprep.subr.bf16.mxu0 %v6654_v1  ;;  %v6694_v31 = vld [vmem:[%s9172_s3 + $0x20] ss:$16 sps:$4 sm:$0xff]  }
 0x1f1   :  { %3824 = vmatprep.subr.bf16.mxu1 %v6657_v32  ;;  %v6784_v1 = vld [vmem:[%s9172_s3 + $0x260] ss:$16 sps:$4 sm:$0xff]   ;;  %v6699_v32 = vld [vmem:[%s9172_s3 + $0x4] ss:$16 sps:$4 sm:$0xff]  }
 0x1f3   :  { %3784 = vmatpush2.bf16.msra.mxu0 %v6652_v24  ;;  %v6789_v24 = vld [vmem:[%s9172_s3 + $0x244] ss:$16 sps:$4 sm:$0xff]  }
 0x1f4   :  { %3825 = vmatpush2.bf16.msra.mxu1 %v6655_v25  ;;  %3785 = vmatprep.subr.bf16.mxu0 %v6660_v33  ;;  %v6697_v25 = vld [vmem:[%s9172_s3] ss:$16 sps:$4 sm:$0xff]  }
 0x1f5   :  { %3826 = vmatprep.subr.bf16.mxu1 %v6663_v34  ;;  %v6787_v33 = vld [vmem:[%s9172_s3 + $0x240] ss:$16 sps:$4 sm:$0xff]   ;;  %v6702_v34 = vld [vmem:[%s9172_s3 + $0x1e4] ss:$16 sps:$4 sm:$0xff]  }
 0x1f7   :  { %3786 = vmatpush2.bf16.msra.mxu0 %v6658_v41  ;;  %v6792_v41 = vld [vmem:[%s9172_s3 + $0x224] ss:$16 sps:$4 sm:$0xff]  }
 0x1f8   :  { %3827 = vmatpush2.bf16.msra.mxu1 %v6661_v22  ;;  %3787 = vmatprep.subr.bf16.mxu0 %v6666_v23  ;;  %v6700_v22 = vld [vmem:[%s9172_s3 + $0x1e0] ss:$16 sps:$4 sm:$0xff]  }
 0x1f9   :  { %3828 = vmatprep.subr.bf16.mxu1 %v6669_v44  ;;  %v6790_v23 = vld [vmem:[%s9172_s3 + $0x220] ss:$16 sps:$4 sm:$0xff]   ;;  %v6705_v44 = vld [vmem:[%s9172_s3 + $0x1c4] ss:$16 sps:$4 sm:$0xff]  }
 0x1fb   :  { %3788 = vmatpush2.bf16.msra.mxu0 %v6664_v38  ;;  %v6703_v38 = vld [vmem:[%s9172_s3 + $0x1c0] ss:$16 sps:$4 sm:$0xff]  }
 0x1fc   :  { %3829 = vmatpush2.bf16.msra.mxu1 %v6667_v39  ;;  %3789 = vmatprep.subr.bf16.mxu0 %v6672_v49  ;;  %v6793_v39 = vld [vmem:[%s9172_s3 + $0x200] ss:$16 sps:$4 sm:$0xff]   ;;  %v6708_v49 = vld [vmem:[%s9172_s3 + $0x1a4] ss:$16 sps:$4 sm:$0xff]  }
 0x1fd   :  { %3830 = vmatprep.subr.bf16.mxu1 %v6675_v51  ;;  %v6798_v51 = vld [vmem:[%s9172_s3 + $0x3e4] ss:$16 sps:$4 sm:$0xff]  }
 0x1ff   :  { %3790 = vmatpush2.bf16.msra.mxu0 %v6670_v50  ;;  %v6796_v50 = vld [vmem:[%s9172_s3 + $0x3e0] ss:$16 sps:$4 sm:$0xff]  }
 0x200   :  { %3831 = vmatpush2.bf16.msra.mxu1 %v6673_v52  ;;  %4639 = vmatprep.subr.bf16.mxu0 %v6678_v55  ;;  %v6711_v52 = vld [vmem:[%s9172_s3 + $0x184] ss:$16 sps:$4 sm:$0xff]  }
 0x201   :  { %4680 = vmatprep.subr.bf16.mxu1 %v6774_v12  ;;  %v6801_v55 = vld [vmem:[%s9172_s3 + $0x3c4] ss:$16 sps:$4 sm:$0xff]  }
 0x202   :  { %v3547_v60 = vpop.f32.mrf.mxu0  ;;  %3792 = vmatmul.mubr.bf16.vlgmr.msra.gmra.mxu0 %v7822_v63 }
 0x203   :  { %v3588_v61 = vpop.f32.mrf.mxu1  ;;  %3833 = vmatmul.mubr.bf16.vlgmr.msra.gmra.mxu1 %v7826_v0  ;;  %v3548_v2 = vadd.f32 %v3547_v60, %v560_v43  ;;  %4640 = vmatpush1.bf16.msra.mxu0 %v6676_v57  ;;  %v6714_v43 = vld [vmem:[%s9172_s3 + $0x164] ss:$16 sps:$4 sm:$0xff]  }
 0x204   :  { %4671 = vmatprep.mubr.bf16.mxu0 %v8652_v7  ;;  %v3549_v35 = vpop.f32.mrf.mxu0  ;;  %4641 = vmatprep.subr.bf16.mxu0 %v6681_v6  ;;  %v6804_v57 = vld [vmem:[%s9172_s3 + $0x3a4] ss:$16 sps:$4 sm:$0xff]   ;;  %v6712_v6 = vld [vmem:[%s9172_s3 + $0x160] ss:$16 sps:$4 sm:$0xff]  }
 0x205   :  { %v3590_v27 = vpop.f32.mrf.mxu1  ;;  %v8665_v37 = vadd.f32 %v3588_v61, %v3548_v2  ;;  %v3550_v63 = vadd.f32 %v3549_v35, %v564_v58  ;;  %4681 = vmatpush1.bf16.msra.mxu1 %v6772_v11  ;;  %v6802_v58 = vld [vmem:[%s9172_s3 + $0x3a0] ss:$16 sps:$4 sm:$0xff]   ;;  %v6717_v60 = vld [vmem:[%s9172_s3 + $0x144] ss:$16 sps:$4 sm:$0xff]   ;;  %v6724_v11 = vld [vmem:[%s9172_s3 + $0xe8] ss:$16 sps:$4 sm:$0xff]  }
 0x206   :  { %v3551_v40 = vpop.f32.mrf.mxu0  ;;  %4682 = vmatprep.subr.bf16.mxu1 %v6777_v13  ;;  %v6807_v61 = vld [vmem:[%s9172_s3 + $0x384] ss:$16 sps:$4 sm:$0xff]   ;;  %v6715_v2 = vld [vmem:[%s9172_s3 + $0x140] ss:$16 sps:$4 sm:$0xff]   ;;  %v6729_v13 = vld [vmem:[%s9172_s3 + $0xcc] ss:$16 sps:$4 sm:$0xff]  }
 0x207   :  { %v3592_v0 = vpop.f32.mrf.mxu1  ;;  %v8667_v4 = vadd.f32 %v3590_v27, %v3550_v63  ;;  %4642 = vmatpush1.bf16.msra.mxu0 %v6679_v3  ;;  %v6805_v3 = vld [vmem:[%s9172_s3 + $0x380] ss:$16 sps:$4 sm:$0xff]   ;;  %v6720_v35 = vld [vmem:[%s9172_s3 + $0x124] ss:$16 sps:$4 sm:$0xff]  }
 0x208   :  { %v3552_v8 = vpop.f32.mrf.mxu0  ;;  %4643 = vmatprep.subr.bf16.mxu0 %v6684_v36  ;;  %v6810_v27 = vld [vmem:[%s9172_s3 + $0x364] ss:$16 sps:$4 sm:$0xff]   ;;  %v6718_v36 = vld [vmem:[%s9172_s3 + $0x120] ss:$16 sps:$4 sm:$0xff]  }
 0x209   :  { %v3593_v9 = vpop.f32.mrf.mxu1  ;;  %4683 = vmatpush1.bf16.msra.mxu1 %v6775_v15  ;;  %v6808_v63 = vld [vmem:[%s9172_s3 + $0x360] ss:$16 sps:$4 sm:$0xff]   ;;  %v6723_v40 = vld [vmem:[%s9172_s3 + $0x104] ss:$16 sps:$4 sm:$0xff]  }
 0x20a   :  { %4684 = vmatprep.subr.bf16.mxu1 %v6780_v20  ;;  %v6813_v0 = vld [vmem:[%s9172_s3 + $0x344] ss:$16 sps:$4 sm:$0xff]   ;;  %v6811_v8 = vld [vmem:[%s9172_s3 + $0x340] ss:$16 sps:$4 sm:$0xff]   ;;  %v3841_v9 = vmax.f32 %v8467_v29, 0.0 }
 0x20b   :  { %4644 = vmatpush1.bf16.msra.mxu0 %v6682_v5  ;;  %v6721_v5 = vld [vmem:[%s9172_s3 + $0x100] ss:$16 sps:$4 sm:$0xff]   ;;  %v6816_v20 = vld [vmem:[%s9172_s3 + $0x324] ss:$16 sps:$4 sm:$0xff]  }
 0x20c   :  { %4645 = vmatprep.subr.bf16.mxu0 %v6687_v10  ;;  %v6726_v10 = vld [vmem:[%s9172_s3 + $0xec] ss:$16 sps:$4 sm:$0xff]   ;;  %v8841_v12 = vpack.c.bf16 %v3841_v9, %v3841_v9 }
 0x20d   :  { %4685 = vmatpush1.bf16.msra.mxu1 %v6778_v26 }
 0x20e   :  { %4686 = vmatprep.subr.bf16.mxu1 %v6783_v16 }
 0x20f   :  { %4646 = vmatpush1.bf16.msra.mxu0 %v6685_v14 }
 0x210   :  { %4647 = vmatprep.subr.bf16.mxu0 %v6690_v19  ;;  %v6727_v19 = vld [vmem:[%s9172_s3 + $0xc8] ss:$16 sps:$4 sm:$0xff]  }
 0x211   :  { %4687 = vmatpush1.bf16.msra.mxu1 %v6781_v18 }
 0x212   :  { %4688 = vmatprep.subr.bf16.mxu1 %v6786_v47  ;;  %v6730_v47 = vld [vmem:[%s9172_s3 + $0xa8] ss:$16 sps:$4 sm:$0xff]  }
 0x213   :  { %4648 = vmatpush1.bf16.msra.mxu0 %v6688_v21 }
 0x214   :  { %4649 = vmatprep.subr.bf16.mxu0 %v6693_v28  ;;  %v6732_v28 = vld [vmem:[%s9172_s3 + $0xac] ss:$16 sps:$4 sm:$0xff]  }
 0x215   :  { %4689 = vmatpush1.bf16.msra.mxu1 %v6784_v1 }
 0x216   :  { %4690 = vmatprep.subr.bf16.mxu1 %v6789_v24  ;;  %v6817_v24 = vld [vmem:[%s9172_s3 + $0x300] ss:$16 sps:$4 sm:$0xff]  }
 0x217   :  { %4650 = vmatpush1.bf16.msra.mxu0 %v6691_v17 }
 0x218   :  { %4651 = vmatprep.subr.bf16.mxu0 %v6696_v30 }
 0x219   :  { %4691 = vmatpush1.bf16.msra.mxu1 %v6787_v33  ;;  %v6822_v33 = vld [vmem:[%s9172_s3 + $0x2ec] ss:$16 sps:$4 sm:$0xff]  }
 0x21a   :  { %4692 = vmatprep.subr.bf16.mxu1 %v6792_v41  ;;  %v6736_v41 = vld [vmem:[%s9172_s3 + $0x68] ss:$16 sps:$4 sm:$0xff]  }
 0x21b   :  { %4652 = vmatpush1.bf16.msra.mxu0 %v6694_v31  ;;  %v6819_v31 = vld [vmem:[%s9172_s3 + $0x304] ss:$16 sps:$4 sm:$0xff]  }
 0x21c   :  { %4653 = vmatprep.subr.bf16.mxu0 %v6699_v32 }
 0x21d   :  { %4693 = vmatpush1.bf16.msra.mxu1 %v6790_v23  ;;  %v6739_v23 = vld [vmem:[%s9172_s3 + $0x48] ss:$16 sps:$4 sm:$0xff]  }
 0x21e   :  { %4694 = vmatprep.subr.bf16.mxu1 %v6795_v45  ;;  %v6742_v45 = vld [vmem:[%s9172_s3 + $0x28] ss:$16 sps:$4 sm:$0xff]  }
 0x21f   :  { %4654 = vmatpush1.bf16.msra.mxu0 %v6697_v25  ;;  %v6733_v25 = vld [vmem:[%s9172_s3 + $0x88] ss:$16 sps:$4 sm:$0xff]  }
 0x220   :  { %4655 = vmatprep.subr.bf16.mxu0 %v6702_v34  ;;  %v6738_v34 = vld [vmem:[%s9172_s3 + $0x6c] ss:$16 sps:$4 sm:$0xff]  }
 0x221   :  { %4695 = vmatpush1.bf16.msra.mxu1 %v6793_v39  ;;  %v6745_v39 = vld [vmem:[%s9172_s3 + $0x8] ss:$16 sps:$4 sm:$0xff]  }
 0x222   :  { %4696 = vmatprep.subr.bf16.mxu1 %v6798_v51  ;;  %v6748_v51 = vld [vmem:[%s9172_s3 + $0x1e8] ss:$16 sps:$4 sm:$0xff]  }
 0x223   :  { %4656 = vmatpush2.bf16.msra.mxu0 %v6700_v22  ;;  %v6741_v22 = vld [vmem:[%s9172_s3 + $0x4c] ss:$16 sps:$4 sm:$0xff]  }
 0x224   :  { %4657 = vmatprep.subr.bf16.mxu0 %v6705_v44  ;;  %v6744_v44 = vld [vmem:[%s9172_s3 + $0x2c] ss:$16 sps:$4 sm:$0xff]  }
 0x225   :  { %4697 = vmatpush2.bf16.msra.mxu1 %v6796_v50  ;;  %v6751_v50 = vld [vmem:[%s9172_s3 + $0x1c8] ss:$16 sps:$4 sm:$0xff]  }
 0x226   :  { %4698 = vmatprep.subr.bf16.mxu1 %v6801_v55  ;;  %v6754_v55 = vld [vmem:[%s9172_s3 + $0x1a8] ss:$16 sps:$4 sm:$0xff]  }
 0x227   :  { %4658 = vmatpush2.bf16.msra.mxu0 %v6703_v38  ;;  %v6747_v38 = vld [vmem:[%s9172_s3 + $0xc] ss:$16 sps:$4 sm:$0xff]  }
 0x228   :  { %4659 = vmatprep.subr.bf16.mxu0 %v6708_v49  ;;  %v6750_v49 = vld [vmem:[%s9172_s3 + $0x1ec] ss:$16 sps:$4 sm:$0xff]  }
 0x229   :  { %4699 = vmatpush2.bf16.msra.mxu1 %v6799_v42  ;;  %v6757_v42 = vld [vmem:[%s9172_s3 + $0x188] ss:$16 sps:$4 sm:$0xff]  }
 0x22a   :  { %4700 = vmatprep.subr.bf16.mxu1 %v6804_v57  ;;  %v6760_v57 = vld [vmem:[%s9172_s3 + $0x168] ss:$16 sps:$4 sm:$0xff]  }
 0x22b   :  { %4660 = vmatpush2.bf16.msra.mxu0 %v6706_v46  ;;  %v6753_v46 = vld [vmem:[%s9172_s3 + $0x1cc] ss:$16 sps:$4 sm:$0xff]  }
 0x22c   :  { %4661 = vmatprep.subr.bf16.mxu0 %v6711_v52  ;;  %v6756_v52 = vld [vmem:[%s9172_s3 + $0x1ac] ss:$16 sps:$4 sm:$0xff]  }
 0x22d   :  { %4701 = vmatpush2.bf16.msra.mxu1 %v6802_v58  ;;  %v6763_v58 = vld [vmem:[%s9172_s3 + $0x148] ss:$16 sps:$4 sm:$0xff]  }
 0x22e   :  { %4702 = vmatprep.subr.bf16.mxu1 %v6807_v61  ;;  %v6766_v61 = vld [vmem:[%s9172_s3 + $0x128] ss:$16 sps:$4 sm:$0xff]  }
 0x22f   :  { %4662 = vmatpush2.bf16.msra.mxu0 %v6709_v56  ;;  %v6759_v56 = vld [vmem:[%s9172_s3 + $0x18c] ss:$16 sps:$4 sm:$0xff]  }
 0x230   :  { %4663 = vmatprep.subr.bf16.mxu0 %v6714_v43  ;;  %v6762_v43 = vld [vmem:[%s9172_s3 + $0x16c] ss:$16 sps:$4 sm:$0xff]  }
 0x231   :  { %4703 = vmatpush2.bf16.msra.mxu1 %v6805_v3  ;;  %v6769_v3 = vld [vmem:[%s9172_s3 + $0x108] ss:$16 sps:$4 sm:$0xff]  }
 0x232   :  { %4704 = vmatprep.subr.bf16.mxu1 %v6810_v27 }
 0x233   :  { %4664 = vmatpush2.bf16.msra.mxu0 %v6712_v6  ;;  %v6765_v6 = vld [vmem:[%s9172_s3 + $0x14c] ss:$16 sps:$4 sm:$0xff]  }
 0x234   :  { %4665 = vmatprep.subr.bf16.mxu0 %v6717_v60  ;;  %v6768_v60 = vld [vmem:[%s9172_s3 + $0x12c] ss:$16 sps:$4 sm:$0xff]  }
 0x235   :  { %4705 = vmatpush2.bf16.msra.mxu1 %v6808_v63 }
 0x236   :  { %4706 = vmatprep.subr.bf16.mxu1 %v6813_v0 }
 0x237   :  { %4666 = vmatpush2.bf16.msra.mxu0 %v6715_v2  ;;  %v6771_v2 = vld [vmem:[%s9172_s3 + $0x10c] ss:$16 sps:$4 sm:$0xff]  }
 0x238   :  { %4667 = vmatprep.subr.bf16.mxu0 %v6720_v35 }
 0x239   :  { %4707 = vmatpush2.bf16.msra.mxu1 %v6811_v8 }
 0x23a   :  { %4708 = vmatprep.subr.bf16.mxu1 %v6816_v20 }
 0x23b   :  { %4668 = vmatpush2.bf16.msra.mxu0 %v6718_v36 }
 0x23c   :  { %4669 = vmatprep.subr.bf16.mxu0 %v6723_v40 }
 0x23f   :  { %4670 = vmatpush2.bf16.msra.mxu0 %v6721_v5 }
 0x240   :  { %4721 = vmatprep.subr.bf16.mxu0 %v6726_v10 }
 0x242   :  { %v3629_v29 = vpop.f32.mrf.mxu0  ;;  %4672 = vmatmul.mubr.bf16.vlgmr.msra.gmra.mxu0 %v8841_v12 }
 0x243   :  { %v3670_v14 = vpop.f32.mrf.mxu1  ;;  %v3630_v15 = vadd.f32 %v3629_v29, %v8665_v37  ;;  %4722 = vmatpush1.bf16.msra.mxu0 %v6724_v11  ;;  %4753 = vmatprep.mubr.bf16.mxu0 %v8652_v7  ;;  %v6814_v37 = vld [vmem:[%s9172_s3 + $0x320] ss:$16 sps:$4 sm:$0xff]  }
 0x244   :  { %v3631_v21 = vpop.f32.mrf.mxu0  ;;  %4723 = vmatprep.subr.bf16.mxu0 %v6729_v13  ;;  %4709 = vmatpush2.bf16.msra.mxu1 %v6814_v37 }
 0x245   :  { %v3672_v26 = vpop.f32.mrf.mxu1  ;;  %v8861_v7 = vadd.f32 %v3670_v14, %v3630_v15  ;;  %v3632_v16 = vadd.f32 %v3631_v21, %v8667_v4  ;;  %v6735_v4 = vld [vmem:[%s9172_s3 + $0x8c] ss:$16 sps:$4 sm:$0xff]   ;;  %4710 = vmatprep.subr.bf16.mxu1 %v6819_v31 }
 0x246   :  { %v3633_v17 = vpop.f32.mrf.mxu0  ;;  %v6825_v31 = vld [vmem:[%s9172_s3 + $0x2cc] ss:$16 sps:$4 sm:$0xff]  }
 0x247   :  { %v3674_v18 = vpop.f32.mrf.mxu1  ;;  %v8864_v30 = vadd.f32 %v3672_v26, %v3632_v16  ;;  %4724 = vmatpush1.bf16.msra.mxu0 %v6727_v19 }
 0x248   :  { %v3634_v1 = vpop.f32.mrf.mxu0  ;;  %4725 = vmatprep.subr.bf16.mxu0 %v6732_v28  ;;  %4711 = vmatpush2.bf16.msra.mxu1 %v6817_v24 }
 0x249   :  { %v3675_v32 = vpop.f32.mrf.mxu1  ;;  %4762 = vmatprep.subr.bf16.mxu1 %v6822_v33  ;;  %v6869_v1 = vld [vmem:[%s9173_s5 + $0x38] sm:$0xff]   ;;  %v6872_v33 = vld [vmem:[%s9173_s5 + $0x68] sm:$0xff]  }
 0x24b   :  { %4726 = vmatpush1.bf16.msra.mxu0 %v6730_v47  ;;  %v6820_v47 = vld [vmem:[%s9172_s3 + $0x2e8] ss:$16 sps:$4 sm:$0xff]  }
 0x24c   :  { %4727 = vmatprep.subr.bf16.mxu0 %v6735_v4  ;;  %v6870_v4 = vld [vmem:[%s9173_s5 + $0x70] sm:$0xff]  }
 0x24f   :  { %4728 = vmatpush1.bf16.msra.mxu0 %v6733_v25  ;;  %v6871_v25 = vld [vmem:[%s9173_s5 + $0x30] sm:$0xff]  }
 0x250   :  { %4729 = vmatprep.subr.bf16.mxu0 %v6738_v34  ;;  %v6823_v34 = vld [vmem:[%s9172_s3 + $0x2c8] ss:$16 sps:$4 sm:$0xff]  }
 0x253   :  { %4730 = vmatpush1.bf16.msra.mxu0 %v6736_v41  ;;  %v6828_v41 = vld [vmem:[%s9172_s3 + $0x2ac] ss:$16 sps:$4 sm:$0xff]  }
 0x254   :  { %4731 = vmatprep.subr.bf16.mxu0 %v6741_v22  ;;  %v6873_v22 = vld [vmem:[%s9173_s5 + $0x28] sm:$0xff]  }
 0x257   :  { %4732 = vmatpush1.bf16.msra.mxu0 %v6739_v23  ;;  %v6826_v23 = vld [vmem:[%s9172_s3 + $0x2a8] ss:$16 sps:$4 sm:$0xff]  }
 0x258   :  { %4733 = vmatprep.subr.bf16.mxu0 %v6744_v44  ;;  %v6874_v44 = vld [vmem:[%s9173_s5 + $0x60] sm:$0xff]  }
 0x25b   :  { %4734 = vmatpush1.bf16.msra.mxu0 %v6742_v45  ;;  %v6831_v45 = vld [vmem:[%s9172_s3 + $0x28c] ss:$16 sps:$4 sm:$0xff]  }
 0x25c   :  { %4735 = vmatprep.subr.bf16.mxu0 %v6747_v38  ;;  %v6875_v38 = vld [vmem:[%s9173_s5 + $0x20] sm:$0xff]  }
 0x25f   :  { %4736 = vmatpush1.bf16.msra.mxu0 %v6745_v39  ;;  %v6876_v39 = vld [vmem:[%s9173_s5 + $0x58] sm:$0xff]  }
 0x260   :  { %4737 = vmatprep.subr.bf16.mxu0 %v6750_v49  ;;  %v6829_v49 = vld [vmem:[%s9172_s3 + $0x288] ss:$16 sps:$4 sm:$0xff]  }
 0x263   :  { %4738 = vmatpush2.bf16.msra.mxu0 %v6748_v51  ;;  %v6834_v51 = vld [vmem:[%s9172_s3 + $0x26c] ss:$16 sps:$4 sm:$0xff]  }
 0x264   :  { %4739 = vmatprep.subr.bf16.mxu0 %v6753_v46  ;;  %v6877_v46 = vld [vmem:[%s9173_s5 + $0x18] sm:$0xff]  }
 0x267   :  { %4740 = vmatpush2.bf16.msra.mxu0 %v6751_v50  ;;  %v6878_v50 = vld [vmem:[%s9173_s5 + $0x50] sm:$0xff]  }
 0x268   :  { %4741 = vmatprep.subr.bf16.mxu0 %v6756_v52  ;;  %v6832_v52 = vld [vmem:[%s9172_s3 + $0x268] ss:$16 sps:$4 sm:$0xff]  }
 0x26b   :  { %4742 = vmatpush2.bf16.msra.mxu0 %v6754_v55  ;;  %v6837_v55 = vld [vmem:[%s9172_s3 + $0x24c] ss:$16 sps:$4 sm:$0xff]  }
 0x26c   :  { %4743 = vmatprep.subr.bf16.mxu0 %v6759_v56  ;;  %v6879_v56 = vld [vmem:[%s9173_s5 + $0x10] sm:$0xff]  }
 0x26f   :  { %4744 = vmatpush2.bf16.msra.mxu0 %v6757_v42  ;;  %v6835_v42 = vld [vmem:[%s9172_s3 + $0x248] ss:$16 sps:$4 sm:$0xff]  }
 0x270   :  { %4745 = vmatprep.subr.bf16.mxu0 %v6762_v43  ;;  %v6840_v43 = vld [vmem:[%s9172_s3 + $0x22c] ss:$16 sps:$4 sm:$0xff]  }
 0x273   :  { %4746 = vmatpush2.bf16.msra.mxu0 %v6760_v57  ;;  %v6838_v57 = vld [vmem:[%s9172_s3 + $0x228] ss:$16 sps:$4 sm:$0xff]  }
 0x274   :  { %4747 = vmatprep.subr.bf16.mxu0 %v6765_v6  ;;  %v6843_v6 = vld [vmem:[%s9172_s3 + $0x20c] ss:$16 sps:$4 sm:$0xff]  }
 0x277   :  { %4748 = vmatpush2.bf16.msra.mxu0 %v6763_v58  ;;  %v6841_v58 = vld [vmem:[%s9172_s3 + $0x208] ss:$16 sps:$4 sm:$0xff]  }
 0x278   :  { %4749 = vmatprep.subr.bf16.mxu0 %v6768_v60  ;;  %v6846_v60 = vld [vmem:[%s9172_s3 + $0x3ec] ss:$16 sps:$4 sm:$0xff]  }
 0x27b   :  { %4750 = vmatpush2.bf16.msra.mxu0 %v6766_v61  ;;  %v6844_v61 = vld [vmem:[%s9172_s3 + $0x3e8] ss:$16 sps:$4 sm:$0xff]  }
 0x27c   :  { %4751 = vmatprep.subr.bf16.mxu0 %v6771_v2  ;;  %v6849_v2 = vld [vmem:[%s9172_s3 + $0x3cc] ss:$16 sps:$4 sm:$0xff]  }
 0x27f   :  { %4752 = vmatpush2.bf16.msra.mxu0 %v6769_v3  ;;  %v6847_v3 = vld [vmem:[%s9172_s3 + $0x3c8] ss:$16 sps:$4 sm:$0xff]  }
 0x282   :  { %v3711_v35 = vpop.f32.mrf.mxu0  ;;  %4754 = vmatmul.mubr.bf16.vlgmr.msra.gmra.mxu0 %v8841_v12 }
 0x283   :  { %v3752_v27 = vpop.f32.mrf.mxu1  ;;  %v3712_v36 = vadd.f32 %v3711_v35, %v8861_v7  ;;  %v6852_v35 = vld [vmem:[%s9172_s3 + $0x3ac] ss:$16 sps:$4 sm:$0xff]  }
 0x284   :  { %v3713_v63 = vpop.f32.mrf.mxu0 }
 0x285   :  { %v3754_v40 = vpop.f32.mrf.mxu1  ;;  %v3753_v0 = vadd.f32 %v3752_v27, %v3712_v36  ;;  %v3714_v11 = vadd.f32 %v3713_v63, %v8864_v30  ;;  %v6868_v30 = vld [vmem:[%s9173_s5 + $0x78] sm:$0xff]  }
 0x286   :  { %v3715_v5 = vpop.f32.mrf.mxu0  ;;  %5848 = vmatprep.subr.bf16.mxu0 %v6868_v30  ;;  %v6850_v27 = vld [vmem:[%s9172_s3 + $0x3a8] ss:$16 sps:$4 sm:$0xff]   ;;  %v6855_v36 = vld [vmem:[%s9172_s3 + $0x38c] ss:$16 sps:$4 sm:$0xff]   ;;  %v6891_v30 = vld [vmem:[%s9173_s5 + $0xa0] sm:$0xff]  }
 0x287   :  { %v3756_v8 = vpop.f32.mrf.mxu1  ;;  %v3755_v14 = vadd.f32 %v3754_v40, %v3714_v11  ;;  %5849 = vmatpush3.bf16.msra.mxu0 %v6869_v1  ;;  %v6853_v63 = vld [vmem:[%s9172_s3 + $0x388] ss:$16 sps:$4 sm:$0xff]   ;;  %v6858_v40 = vld [vmem:[%s9172_s3 + $0x36c] ss:$16 sps:$4 sm:$0xff]  }
 0x288   :  { %v3716_v9 = vpop.f32.mrf.mxu0  ;;  %5850 = vmatprep.subr.bf16.mxu0 %v6870_v4  ;;  %v6861_v5 = vld [vmem:[%s9172_s3 + $0x34c] ss:$16 sps:$4 sm:$0xff]   ;;  %v6859_v8 = vld [vmem:[%s9172_s3 + $0x348] ss:$16 sps:$4 sm:$0xff]   ;;  %v6895_v4 = vld [vmem:[%s9173_s5 + $0x90] sm:$0xff]  }
 0x289   :  { %v3757_v10 = vpop.f32.mrf.mxu1  ;;  %v6864_v9 = vld [vmem:[%s9172_s3 + $0x32c] ss:$16 sps:$4 sm:$0xff]   ;;  %v6862_v11 = vld [vmem:[%s9172_s3 + $0x328] ss:$16 sps:$4 sm:$0xff]  }
 0x28a   :  { %v6893_v1 = vld [vmem:[%s9173_s5 + $0x98] sm:$0xff]  }
 0x28b   :  { %5851 = vmatpush3.bf16.msra.mxu0 %v6871_v25 }
 0x28c   :  { %5852 = vmatprep.subr.bf16.mxu0 %v6872_v33 }
 0x28f   :  { %5853 = vmatpush3.bf16.msra.mxu0 %v6873_v22  ;;  %v6897_v22 = vld [vmem:[%s9173_s5 + $0x88] sm:$0xff]  }
 0x290   :  { %5854 = vmatprep.subr.bf16.mxu0 %v6874_v44  ;;  %v6899_v44 = vld [vmem:[%s9173_s5 + $0x80] sm:$0xff]  }
 0x293   :  { %5855 = vmatpush3.bf16.msra.mxu0 %v6875_v38 }
 0x294   :  { %5856 = vmatprep.subr.bf16.mxu0 %v6876_v39 }
 0x297   :  { %5857 = vmatpush3.bf16.msra.mxu0 %v6877_v46 }
 0x298   :  { %5858 = vmatprep.subr.bf16.mxu0 %v6878_v50 }
 0x29b   :  { %5859 = vmatpush3.bf16.msra.mxu0 %v6879_v56 }
 0x2c2   :  { %v3793_v13 = vpop.f32.mrf.mxu0 }
 0x2c3   :  { %v3834_v29 = vpop.f32.mrf.mxu1  ;;  %v3794_v15 = vadd.f32 %v3793_v13, %v3753_v0  ;;  %v6856_v0 = vld [vmem:[%s9172_s3 + $0x368] ss:$16 sps:$4 sm:$0xff]  }
 0x2c4   :  { %v3795_v19 = vpop.f32.mrf.mxu0 }
 0x2c5   :  { %v3836_v20 = vpop.f32.mrf.mxu1  ;;  %v3835_v21 = vadd.f32 %v3834_v29, %v3794_v15  ;;  %v3796_v26 = vadd.f32 %v3795_v19, %v3755_v14  ;;  %v6867_v29 = vld [vmem:[%s9172_s3 + $0x30c] ss:$16 sps:$4 sm:$0xff]   ;;  %v6865_v15 = vld [vmem:[%s9172_s3 + $0x308] ss:$16 sps:$4 sm:$0xff]  }
 0x2c6   :  { %v3797_v12 = vpop.f32.mrf.mxu0 }
 0x2c7   :  { %v3838_v28 = vpop.f32.mrf.mxu1  ;;  %v3837_v37 = vadd.f32 %v3836_v20, %v3796_v26  ;;  %v3843_v7 = vmax.f32 %v3835_v21, 0.0  ;;  %v6880_v20 = vld [vmem:[%s9173_s5 + $0x48] sm:$0xff]   ;;  %v6882_v26 = vld [vmem:[%s9173_s5 + $0x40] sm:$0xff]  }
 0x2c8   :  { %v3798_v16 = vpop.f32.mrf.mxu0  ;;  %v6881_v21 = vld [vmem:[%s9173_s5 + $0x8] sm:$0xff]   ;;  %5860 = vmatprep.subr.bf16.mxu0 %v6880_v20  ;;  %v6883_v12 = vld [vmem:[%s9173_s5] sm:$0xff]   ;;  %v6884_v28 = vld [vmem:[%s9173_s5 + $0xf8] sm:$0xff]  }
 0x2c9   :  { %v3839_v17 = vpop.f32.mrf.mxu1  ;;  %v3844_v18 = vmax.f32 %v3837_v37, 0.0  ;;  %v8974_v24 = vpack.c.bf16 %v3843_v7, %v3843_v7  ;;  %5861 = vmatpush3.bf16.msra.mxu0 %v6881_v21  ;;  %v6885_v37 = vld [vmem:[%s9173_s5 + $0xb8] sm:$0xff]   ;;  %v6886_v7 = vld [vmem:[%s9173_s5 + $0xf0] sm:$0xff]  }
 0x2ca   :  { %5862 = vmatprep.subr.bf16.mxu0 %v6882_v26  ;;  %v6887_v16 = vld [vmem:[%s9173_s5 + $0xb0] sm:$0xff]   ;;  %v6888_v17 = vld [vmem:[%s9173_s5 + $0xe8] sm:$0xff]  }
 0x2cb   :  { %v3848_v32 = vpack.c.bf16 %v3844_v18, %v3844_v18  ;;  %v6889_v18 = vld [vmem:[%s9173_s5 + $0xa8] sm:$0xff]  }
 0x2cd   :  { %4712 = vmatprep.mubr.bf16.mxu1 %v3848_v32  ;;  %5863 = vmatpush3.bf16.msra.mxu0 %v6883_v12 }
 0x2ce   :  { %4713 = vmatmul.mubr.bf16.vlgmr.msra.gmra.mxu1 %v8974_v24 }
 0x2cf   :  { %4763 = vmatpush1.bf16.msra.mxu1 %v6820_v47  ;;  %4794 = vmatprep.mubr.bf16.mxu1 %v3848_v32  ;;  %v6890_v47 = vld [vmem:[%s9173_s5 + $0xe0] sm:$0xff]   ;;  %v6894_v32 = vld [vmem:[%s9173_s5 + $0xd0] sm:$0xff]  }
 0x2d0   :  { %4764 = vmatprep.subr.bf16.mxu1 %v6825_v31  ;;  %v6892_v31 = vld [vmem:[%s9173_s5 + $0xd8] sm:$0xff]  }
 0x2d3   :  { %4765 = vmatpush1.bf16.msra.mxu1 %v6823_v34 }
 0x2d4   :  { %4766 = vmatprep.subr.bf16.mxu1 %v6828_v41  ;;  %v6896_v41 = vld [vmem:[%s9173_s5 + $0xc8] sm:$0xff]  }
 0x2d7   :  { %4767 = vmatpush1.bf16.msra.mxu1 %v6826_v23  ;;  %v6898_v23 = vld [vmem:[%s9173_s5 + $0xc0] sm:$0xff]  }
 0x2d8   :  { %4768 = vmatprep.subr.bf16.mxu1 %v6831_v45  ;;  %v3977_v45 = vld [vmem:[%s9174_s4] sm:$0xf] }
 0x2d9   :  { %v3982_v38 = vrot.slane %v3977_v45, %v551_v59  ;;  %v3986_v39 = vrot.slane %v3977_v45, %v555_v62  ;;  %v3990_v59 = vrot.slane %v3977_v45, %v559_v54  ;;  %v3994_v62 = vrot.slane %v3977_v45, %v563_v48  ;;  %v5815_v48 = vld [vmem:[%s9175_s6] ss:$0 sm:$0xff] }
 0x2db   :  { %4769 = vmatpush1.bf16.msra.mxu1 %v6829_v49 }
 0x2dc   :  { %4770 = vmatprep.subr.bf16.mxu1 %v6834_v51 }
 0x2df   :  { %4771 = vmatpush1.bf16.msra.mxu1 %v6832_v52 }
 0x2e0   :  { %4772 = vmatprep.subr.bf16.mxu1 %v6837_v55 }
 0x2e3   :  { %4773 = vmatpush1.bf16.msra.mxu1 %v6835_v42 }
 0x2e4   :  { %4774 = vmatprep.subr.bf16.mxu1 %v6840_v43 }
 0x2e7   :  { %4775 = vmatpush1.bf16.msra.mxu1 %v6838_v57 }
 0x2e8   :  { %4776 = vmatprep.subr.bf16.mxu1 %v6843_v6 }
 0x2eb   :  { %4777 = vmatpush1.bf16.msra.mxu1 %v6841_v58 }
 0x2ec   :  { %4778 = vmatprep.subr.bf16.mxu1 %v6846_v60 }
 0x2ef   :  { %4779 = vmatpush2.bf16.msra.mxu1 %v6844_v61 }
 0x2f0   :  { %4780 = vmatprep.subr.bf16.mxu1 %v6849_v2 }
 0x2f3   :  { %4781 = vmatpush2.bf16.msra.mxu1 %v6847_v3 }
 0x2f4   :  { %4782 = vmatprep.subr.bf16.mxu1 %v6852_v35 }
 0x2f7   :  { %4783 = vmatpush2.bf16.msra.mxu1 %v6850_v27 }
 0x2f8   :  { %4784 = vmatprep.subr.bf16.mxu1 %v6855_v36 }
 0x2fb   :  { %4785 = vmatpush2.bf16.msra.mxu1 %v6853_v63 }
 0x2fc   :  { %4786 = vmatprep.subr.bf16.mxu1 %v6858_v40 }
 0x2ff   :  { %4787 = vmatpush2.bf16.msra.mxu1 %v6856_v0 }
 0x300   :  { %4788 = vmatprep.subr.bf16.mxu1 %v6861_v5 }
 0x302   :  { %v4673_v10 = vpop.f32.mrf.mxu0 }
 0x303   :  { %4789 = vmatpush2.bf16.msra.mxu1 %v6859_v8  ;;  %v4674_v49 = vadd.f32 %v4673_v10, %v3982_v38 }
 0x304   :  { %v4675_v13 = vpop.f32.mrf.mxu0  ;;  %4790 = vmatprep.subr.bf16.mxu1 %v6864_v9 }
 0x305   :  { %v4676_v46 = vadd.f32 %v4675_v13, %v3986_v39 }
 0x306   :  { %v4677_v14 = vpop.f32.mrf.mxu0 }
 0x307   :  { %4791 = vmatpush2.bf16.msra.mxu1 %v6862_v11 }
 0x308   :  { %v4678_v19 = vpop.f32.mrf.mxu0  ;;  %4792 = vmatprep.subr.bf16.mxu1 %v6867_v29 }
 0x30b   :  { %4793 = vmatpush2.bf16.msra.mxu1 %v6865_v15 }
 0x30c   :  { %5870 = vmatprep.subr.bf16.mxu1 %v6884_v28 }
 0x30e   :  { %4795 = vmatmul.mubr.bf16.vlgmr.msra.gmra.mxu1 %v8974_v24 }
 0x30f   :  { %5871 = vmatpush3.bf16.msra.mxu1 %v6885_v37 }
 0x310   :  { %5872 = vmatprep.subr.bf16.mxu1 %v6886_v7 }
 0x313   :  { %5873 = vmatpush3.bf16.msra.mxu1 %v6887_v16 }
 0x314   :  { %5874 = vmatprep.subr.bf16.mxu1 %v6888_v17 }
 0x317   :  { %5875 = vmatpush3.bf16.msra.mxu1 %v6889_v18 }
 0x318   :  { %5876 = vmatprep.subr.bf16.mxu1 %v6890_v47 }
 0x31b   :  { %5877 = vmatpush3.bf16.msra.mxu1 %v6891_v30 }
 0x31c   :  { %5878 = vmatprep.subr.bf16.mxu1 %v6892_v31 }
 0x31f   :  { %5879 = vmatpush3.bf16.msra.mxu1 %v6893_v1 }
 0x320   :  { %5880 = vmatprep.subr.bf16.mxu1 %v6894_v32 }
 0x323   :  { %5881 = vmatpush3.bf16.msra.mxu1 %v6895_v4 }
 0x324   :  { %5882 = vmatprep.subr.bf16.mxu1 %v6896_v41 }
 0x327   :  { %5883 = vmatpush3.bf16.msra.mxu1 %v6897_v22 }
 0x328   :  { %5884 = vmatprep.subr.bf16.mxu1 %v6898_v23 }
 0x32b   :  { %5885 = vmatpush3.bf16.msra.mxu1 %v6899_v44 }
 0x342   :  { %v4755_v24 = vpop.f32.mrf.mxu0 }
 0x343   :  { %v4756_v60 = vadd.f32 %v4755_v24, %v3990_v59 }
 0x344   :  { %v4757_v25 = vpop.f32.mrf.mxu0 }
 0x345   :  { %v4758_v2 = vadd.f32 %v4757_v25, %v3994_v62 }
 0x346   :  { %v4759_v33 = vpop.f32.mrf.mxu0 }
 0x348   :  { %v4760_v34 = vpop.f32.mrf.mxu0 }
 0x38e   :  { %v4714_v51 = vpop.f32.mrf.mxu1 }
 0x38f   :  { %v4715_v50 = vadd.f32 %v4714_v51, %v4674_v49 }
 0x390   :  { %v4716_v52 = vpop.f32.mrf.mxu1 }
 0x391   :  { %v4717_v55 = vadd.f32 %v4716_v52, %v4676_v46  ;;  %v4803_v56 = vmax.f32 %v4715_v50, 0.0 }
 0x392   :  { %v4718_v42 = vpop.f32.mrf.mxu1 }
 0x393   :  { %v4804_v43 = vmax.f32 %v4717_v55, 0.0  ;;  %v4807_v58 = vpack.c.bf16 %v4803_v56, %v4803_v56 }
 0x394   :  { %v4719_v57 = vpop.f32.mrf.mxu1 }
 0x395   :  { %v4808_v6 = vpack.c.bf16 %v4804_v43, %v4804_v43 }
 0x397   :  { %5106 = vmatprep.mubr.bf16.mxu0 %v4808_v6 }
 0x398   :  { %5107 = vmatmul.mubr.bf16.vlgmr.msra.gmra.mxu0 %v4807_v58 }
 0x3ce   :  { %v4796_v61 = vpop.f32.mrf.mxu1 }
 0x3cf   :  { %v4797_v3 = vadd.f32 %v4796_v61, %v4756_v60 }
 0x3d0   :  { %v4798_v35 = vpop.f32.mrf.mxu1 }
 0x3d1   :  { %v4799_v27 = vadd.f32 %v4798_v35, %v4758_v2  ;;  %v4805_v36 = vmax.f32 %v4797_v3, 0.0 }
 0x3d2   :  { %v4800_v63 = vpop.f32.mrf.mxu1 }
 0x3d3   :  { %v4806_v40 = vmax.f32 %v4799_v27, 0.0  ;;  %v4809_v8 = vpack.c.bf16 %v4805_v36, %v4805_v36 }
 0x3d4   :  { %v4801_v0 = vpop.f32.mrf.mxu1 }
 0x3d5   :  { %v4810_v5 = vpack.c.bf16 %v4806_v40, %v4806_v40 }
 0x3d7   :  { %5146 = vmatprep.mubr.bf16.mxu1 %v4810_v5 }
 0x3d8   :  { %5147 = vmatmul.mubr.bf16.vlgmr.msra.gmra.mxu1 %v4809_v8 }
 0x458   :  { %v5864_v9 = vpop.f32.mrf.mxu0 }
 0x45a   :  { %v5865_v10 = vpop.f32.mrf.mxu0 }
 0x45b   :  { %v5866_v53 = vadd.f32 %v5865_v10, %v5864_v9 }
 0x45c   :  { %v5867_v54 = vpop.f32.mrf.mxu0 }
 0x45d   :  { %v5109_v14 = vadd.f32 %v5866_v53, %v5815_v48 }
 0x45e   :  { %v5868_v11 = vpop.f32.mrf.mxu0 }
 0x498   :  { %v5886_v13 = vpop.f32.mrf.mxu1 }
 0x49a   :  { %v5887_v29 = vpop.f32.mrf.mxu1 }
 0x49b   :  { %v5888_v15 = vadd.f32 %v5887_v29, %v5886_v13 }
 0x49c   :  { %v5889_v19 = vpop.f32.mrf.mxu1 }
 0x49d   :  { %v5149_v20 = vadd.f32 %v5888_v15, %v5109_v14 }
 0x49e   :  { %v5890_v21 = vpop.f32.mrf.mxu1 }
 0x49f   :  { %5154 = vst [vmem:[%s9176_s7] sm:$0xff] %v5149_v20 }

</bundles_post_ra>
